<compile_context>
chip_gen: v7x
topology: tpu7x:2x2x1
jax: 0.10.0
libtpu: 0.0.40
codegen_flags: <defaults>
</compile_context>

<pallas_src>
import numpy as np
import jax
import jax.numpy as jnp
from jax import lax
from jax.experimental import pallas as pl
from jax.experimental.pallas import tpu as pltpu


# ---------------------------------------------------------------------------
# Fused InteractionLayer stack: one grid step == one layer, both directions
# unrolled in the body.
# ---------------------------------------------------------------------------
def _interaction_stack_kernel(y0_ref, edge_ref, g1h_ref, s1h_ref, w_ref, out_ref):
    """grid = (L,): layer l updates the resident atom state in out_ref.

    y0_ref  : (N, C)        initial atom embeddings (residual seed, resident)
    edge_ref: (E, F)        edge features (layer-invariant, resident)
    g1h_ref : (2, E, N)     one-hot gather matrices   (dir 0: src, dir 1: dst+n0)
    s1h_ref : (2, N, E)     one-hot scatter matrices  (dir 0: dst+n0, dir 1: src)
    w_ref   : (2, F*C, C)   this layer's fused TP weights, 1/sqrt(N) folded in
    out_ref : (N, C)        resident accumulator carrying y across layers
    """
    l = pl.program_id(0)

    @pl.when(l == 0)
    def _seed():
        out_ref[...] = y0_ref[...]                      # residual init (layer 0 only)

    y = out_ref[...]                                    # pre-update atom features
    edge = edge_ref[...]                                # (E, F)
    E, F = edge_ref.shape
    N, C = out_ref.shape

    delta = jnp.zeros((N, C), jnp.float32)
    for d in range(2):                                  # unrolled: 0 = s2d, 1 = d2s
        # Gather y[idx] as a one-hot MXU matmul (exact selection; DEFAULT = 1 pass).
        gath = jnp.dot(g1h_ref[d], y,
                       preferred_element_type=jnp.float32)              # (E, C)

        # Fully-connected tensor product over scalar irreps as ONE fused matmul:
        #   msg[e, k] = sum_{i,j} edge[e, i] * gath[e, j] * W[i, j, k]
        z = (edge[:, :, None] * gath[:, None, :]).reshape(E, F * C)     # (E, F*C)
        msg = jnp.dot(z, w_ref[d], precision=lax.Precision.HIGHEST,
                      preferred_element_type=jnp.float32)               # (E, C)

        # SiLU (1/sqrt(N) message scale already folded into the weights).
        msg = msg * jax.nn.sigmoid(msg)

        # Scatter-add over destination atoms as a one-hot MXU matmul.
        delta = delta + jnp.dot(s1h_ref[d], msg,
                                preferred_element_type=jnp.float32)     # (N, C)

    out_ref[...] = y + delta


def interaction_stack(y0, edge_feat, gather_1h, scatter_1h, w_stack):
    """Apply all L InteractionLayers: y <- y + scatter(SiLU(TP(edge, y[gather])))
    for both directions, L times, in a single pallas_call."""
    N, C = y0.shape
    E, F = edge_feat.shape
    L, _, FC, _ = w_stack.shape
    return pl.pallas_call(
        _interaction_stack_kernel,
        out_shape=jax.ShapeDtypeStruct((N, C), jnp.float32),
        grid=(L,),
        in_specs=[
            pl.BlockSpec((N, C), lambda l: (0, 0)),            # y0 (resident)
            pl.BlockSpec((E, F), lambda l: (0, 0)),            # edge features (resident)
            pl.BlockSpec((2, E, N), lambda l: (0, 0, 0)),      # gather one-hots (resident)
            pl.BlockSpec((2, N, E), lambda l: (0, 0, 0)),      # scatter one-hots (resident)
            pl.BlockSpec((None, 2, FC, C), lambda l: (l, 0, 0, 0)),  # per-layer weights
        ],
        # Same output block every layer -> resident accumulator across the grid.
        out_specs=pl.BlockSpec((N, C), lambda l: (0, 0)),
        compiler_params=pltpu.CompilerParams(
            dimension_semantics=("arbitrary",)),
    )(y0, edge_feat, gather_1h, scatter_1h, w_stack)


# ---------------------------------------------------------------------------
# Host-side parameter prep: stack per-layer TP weights to (L, 2, F*C, C) with
# the 1/sqrt(N) message scale (exp = 0.5) folded in; precompute Gaussian mus.
# ---------------------------------------------------------------------------
def prepare_params(emb_w, emb_b, ro_w, ro_b, raw_layers,
                   mu_min, mu_max, step, n_atoms_total):
    n_mu = int(np.ceil((mu_max - mu_min) / step) + 1)
    mu = jnp.asarray(np.linspace(mu_min, mu_max, n_mu, dtype=np.float32))
    scale = 1.0 / np.sqrt(float(n_atoms_total))         # N ** (-0.5)
    F, C, _ = raw_layers[0][0].shape
    w_stack = jnp.stack([
        jnp.stack([ws.reshape(F * C, C), wd.reshape(F * C, C)])
        for (ws, wd) in raw_layers
    ]).astype(jnp.float32) * scale                       # (L, 2, F*C, C)
    return {
        "emb_w": emb_w, "emb_b": emb_b, "ro_w": ro_w, "ro_b": ro_b,
        "mu": mu, "inv_sigma": np.float32(1.0 / step), "w_stack": w_stack,
    }


# ---------------------------------------------------------------------------
# Full model forward (jitted as one executable).
# Embedding / edge features / readout are tiny elementwise + 1-matmul ops that
# XLA fuses for free; the interaction stack is the single Pallas kernel above.
# ---------------------------------------------------------------------------
def dimer_model_forward(params, z0, z1, r, src, dst):
    n0 = z0.shape[0]
    N = n0 + z1.shape[0]
    E = r.shape[0]
    max_z, C = params["emb_w"].shape

    # AtomicEmbedding on concatenated z0||z1 (one-hot + Linear).
    z = jnp.concatenate([z0, z1]).astype(jnp.int32)
    onehot = jax.nn.one_hot(z, max_z, dtype=jnp.float32)
    y0 = jnp.dot(onehot, params["emb_w"],
                 precision=lax.Precision.HIGHEST) + params["emb_b"]       # (N, C)

    # GaussianExpansion(r) ++ l=0 spherical harmonic (== 1 under 'component').
    diff = (r[:, None] - params["mu"][None, :]) * params["inv_sigma"]
    ged = jnp.exp(-0.5 * diff * diff)                                     # (E, n_mu)
    edge_feat = jnp.concatenate([ged, jnp.ones((E, 1), jnp.float32)], axis=-1)

    # Layer-invariant one-hot gather/scatter matrices (computed once under jit).
    #   dir 0 (s2d): gather y0[src]  -> scatter into y1 rows (dst + n0)
    #   dir 1 (d2s): gather y1[dst]  -> scatter into y0 rows (src)
    src_i = src.astype(jnp.int32)
    dst_i = dst.astype(jnp.int32) + n0
    g_src = jax.nn.one_hot(src_i, N, dtype=jnp.float32)                   # (E, N)
    g_dst = jax.nn.one_hot(dst_i, N, dtype=jnp.float32)                   # (E, N)
    gather_1h = jnp.stack([g_src, g_dst])                                 # (2, E, N)
    scatter_1h = jnp.stack([g_dst.T, g_src.T])                            # (2, N, E)

    # Fused InteractionLayer stack (single pallas_call).
    y = interaction_stack(y0, edge_feat, gather_1h, scatter_1h, params["w_stack"])

    # ReadoutLayer: Linear(C -> 1) + SiLU + sum.
    v = jnp.dot(y, params["ro_w"], precision=lax.Precision.HIGHEST) + params["ro_b"]
    v = v * jax.nn.sigmoid(v)
    return y, jnp.sum(v)


dimer_model_forward_jit = jax.jit(dimer_model_forward)


# ---------------------------------------------------------------------------
# Pure-JAX reference (mirrors the PyTorch module step-by-step, accurate f32).
# ---------------------------------------------------------------------------
def reference_forward(raw, z0, z1, r, src, dst, mu_min, mu_max, step, max_z):
    hi = lax.Precision.HIGHEST

    def silu(x):
        return x * jax.nn.sigmoid(x)

    emb0 = jnp.dot(jax.nn.one_hot(z0, max_z, dtype=jnp.float32), raw["emb_w"],
                   precision=hi) + raw["emb_b"]
    emb1 = jnp.dot(jax.nn.one_hot(z1, max_z, dtype=jnp.float32), raw["emb_w"],
                   precision=hi) + raw["emb_b"]
    y0, y1 = emb0, emb1

    E = r.shape[0]
    n_mu = int(np.ceil((mu_max - mu_min) / step) + 1)
    mu = jnp.asarray(np.linspace(mu_min, mu_max, n_mu, dtype=np.float32))
    ged = jnp.exp(-0.5 * ((r[:, None] - mu[None, :]) / step) ** 2)
    sh = jnp.ones((E, 1), jnp.float32)                 # l=0 spherical harmonic
    edge = jnp.concatenate([ged, sh], axis=-1)

    N = y0.shape[0] + y1.shape[0]
    for (w_s2d, w_d2s) in raw["layers"]:
        s2d = jnp.einsum("ef,ec,fck->ek", edge, y0[src], w_s2d,
                         precision=hi) / np.sqrt(float(N))
        s2d = silu(s2d)
        s2d = jnp.zeros_like(y1).at[dst].add(s2d)
        d2s = jnp.einsum("ef,ec,fck->ek", edge, y1[dst], w_d2s,
                         precision=hi) / np.sqrt(float(N))
        d2s = silu(d2s)
        d2s = jnp.zeros_like(y0).at[src].add(d2s)
        y0, y1 = y0 + d2s, y1 + s2d

    yc = jnp.concatenate([y0, y1], axis=0)
    v = silu(jnp.dot(yc, raw["ro_w"], precision=hi) + raw["ro_b"])
    return yc, v.sum()


if __name__ == "__main__":
    key = jax.random.PRNGKey(0)
    keys = jax.random.split(key, 10)

    # Small shapes consistent with the module.
    max_z = 10
    C = dim_atoms = 32                       # irreps_atom = "32x0e"
    mu_min, mu_max, step = 0.0, 3.5, 0.25    # -> n_mu = 15; with 1x0e sh -> F = 16
    natoms0, natoms1 = 8, 8
    E = 16                                   # number of dimer edges
    n_interactions = 2
    n_mu = int(np.ceil((mu_max - mu_min) / step) + 1)
    F = n_mu + 1
    N = natoms0 + natoms1

    z0 = jax.random.randint(keys[0], (natoms0,), 1, max_z, dtype=jnp.int32)
    z1 = jax.random.randint(keys[1], (natoms1,), 1, max_z, dtype=jnp.int32)
    r = jax.random.uniform(keys[2], (E,), minval=0.5, maxval=3.0, dtype=jnp.float32)
    src = jax.random.randint(keys[3], (E,), 0, natoms0, dtype=jnp.int32)
    dst = jax.random.randint(keys[4], (E,), 0, natoms1, dtype=jnp.int32)

    emb_w = jax.random.normal(keys[5], (max_z, C), jnp.float32) / np.sqrt(float(max_z))
    emb_b = jax.random.normal(keys[6], (C,), jnp.float32) * 0.1
    ro_w = jax.random.normal(keys[7], (C, 1), jnp.float32) / np.sqrt(float(C))
    ro_b = jax.random.normal(keys[8], (1,), jnp.float32) * 0.1

    # FullyConnectedTensorProduct weights, e3nn path norm 1/sqrt(F*C) folded in.
    wnorm = 1.0 / np.sqrt(float(F * C))
    layer_keys = jax.random.split(keys[9], n_interactions * 2)
    raw_layers = []
    for l in range(n_interactions):
        w_s2d = jax.random.normal(layer_keys[2 * l], (F, C, C), jnp.float32) * wnorm
        w_d2s = jax.random.normal(layer_keys[2 * l + 1], (F, C, C), jnp.float32) * wnorm
        raw_layers.append((w_s2d, w_d2s))

    params = prepare_params(emb_w, emb_b, ro_w, ro_b, raw_layers,
                            mu_min, mu_max, step, N)

    y_out, energy = dimer_model_forward_jit(params, z0, z1, r, src, dst)
    jax.block_until_ready((y_out, energy))

    raw = {"emb_w": emb_w, "emb_b": emb_b, "ro_w": ro_w, "ro_b": ro_b,
           "layers": raw_layers}
    y_ref, e_ref = reference_forward(raw, z0, z1, r, src, dst,
                                     mu_min, mu_max, step, max_z)

    np.testing.assert_allclose(np.asarray(y_out), np.asarray(y_ref),
                               rtol=2e-3, atol=2e-3)
    np.testing.assert_allclose(np.asarray(energy), np.asarray(e_ref),
                               rtol=2e-3, atol=2e-3)

    print("KERNEL_OK")
</pallas_src>

<mosaic_0001>
module attributes {stable_mosaic.version = 11 : i64} {
  func.func @_interaction_stack_kernel(%arg0: i32, %arg1: memref<16x32xf32, #tpu.memory_space<vmem>>, %arg2: memref<16x16xf32, #tpu.memory_space<vmem>>, %arg3: memref<2x16x16xf32, #tpu.memory_space<vmem>>, %arg4: memref<2x16x16xf32, #tpu.memory_space<vmem>>, %arg5: memref<1x2x512x32xf32, #tpu.memory_space<vmem>>, %arg6: memref<16x32xf32, #tpu.memory_space<vmem>>) attributes {dimension_semantics = [#tpu.dimension_semantics<arbitrary>], iteration_bounds = array<i64: 2>, scalar_prefetch = 0 : i64, scratch_operands = 0 : i64, tpu.core_type = #tpu.core_type<tc>, window_params = [{pipeline_mode = #tpu.pipeline_mode<synchronous>, transform_indices = @transform_0, window_bounds = array<i64: 16, 32>}, {pipeline_mode = #tpu.pipeline_mode<synchronous>, transform_indices = @transform_1, window_bounds = array<i64: 16, 16>}, {pipeline_mode = #tpu.pipeline_mode<synchronous>, transform_indices = @transform_2, window_bounds = array<i64: 2, 16, 16>}, {pipeline_mode = #tpu.pipeline_mode<synchronous>, transform_indices = @transform_3, window_bounds = array<i64: 2, 16, 16>}, {transform_indices = @transform_4, window_bounds = array<i64: 1, 2, 512, 32>}, {pipeline_mode = #tpu.pipeline_mode<synchronous>, transform_indices = @transform_5, window_bounds = array<i64: 16, 32>}]} {
    %c0_i32 = arith.constant 0 : i32
    %0 = arith.cmpi eq, %arg0, %c0_i32 : i32
    %1 = arith.extui %0 : i1 to i32
    %c0_i32_0 = arith.constant 0 : i32
    %2 = arith.cmpi ne, %1, %c0_i32_0 : i32
    scf.if %2 {
      %c0_33 = arith.constant 0 : index
      %c0_34 = arith.constant 0 : index
      %52 = vector.load %arg1[%c0_33, %c0_34] : memref<16x32xf32, #tpu.memory_space<vmem>>, vector<16x32xf32>
      %c0_35 = arith.constant 0 : index
      %c0_36 = arith.constant 0 : index
      %53 = vector.load %arg6[%c0_35, %c0_36] : memref<16x32xf32, #tpu.memory_space<vmem>>, vector<16x32xf32>
      tpu.vector_store %arg6[%c0_35, %c0_36], %52 {strides = array<i32>} : memref<16x32xf32, #tpu.memory_space<vmem>>, vector<16x32xf32>,
    } else {
    }
    %c0 = arith.constant 0 : index
    %c0_1 = arith.constant 0 : index
    %3 = vector.load %arg6[%c0, %c0_1] : memref<16x32xf32, #tpu.memory_space<vmem>>, vector<16x32xf32>
    %c0_2 = arith.constant 0 : index
    %c0_3 = arith.constant 0 : index
    %4 = vector.load %arg2[%c0_2, %c0_3] : memref<16x16xf32, #tpu.memory_space<vmem>>, vector<16x16xf32>
    %cst = arith.constant 0.000000e+00 : f32
    %5 = vector.broadcast %cst : f32 to vector<16x32xf32>
    %c0_4 = arith.constant 0 : index
    %c0_5 = arith.constant 0 : index
    %c0_6 = arith.constant 0 : index
    %6 = vector.load %arg3[%c0_4, %c0_5, %c0_6] : memref<2x16x16xf32, #tpu.memory_space<vmem>>, vector<1x16x16xf32>
    %7 = vector.shape_cast %6 : vector<1x16x16xf32> to vector<16x16xf32>
    %cst_7 = arith.constant dense<0.000000e+00> : vector<16x32xf32>
    %8 = tpu.matmul %7, %3, %cst_7 {dimension_numbers = #tpu.dot_dimension_numbers<[1], [0], [0], [1], [0, 0, 1, 1], [], []>} : vector<16x16xf32>, vector<16x32xf32>, vector<16x32xf32> -> vector<16x32xf32>
    %9 = vector.shape_cast %4 : vector<16x16xf32> to vector<16x16x1xf32>
    %10 = vector.shape_cast %8 : vector<16x32xf32> to vector<16x1x32xf32>
    %11 = vector.broadcast %9 : vector<16x16x1xf32> to vector<16x16x32xf32>
    %12 = vector.broadcast %10 : vector<16x1x32xf32> to vector<16x16x32xf32>
    %13 = arith.mulf %11, %12 : vector<16x16x32xf32>
    %14 = vector.shape_cast %13 : vector<16x16x32xf32> to vector<16x512xf32>
    %c0_8 = arith.constant 0 : index
    %c0_9 = arith.constant 0 : index
    %c0_10 = arith.constant 0 : index
    %c0_11 = arith.constant 0 : index
    %15 = vector.load %arg5[%c0_8, %c0_9, %c0_10, %c0_11] : memref<1x2x512x32xf32, #tpu.memory_space<vmem>>, vector<1x1x512x32xf32>
    %16 = vector.shape_cast %15 : vector<1x1x512x32xf32> to vector<512x32xf32>
    %cst_12 = arith.constant dense<0.000000e+00> : vector<16x32xf32>
    %17 = tpu.matmul %14, %16, %cst_12 {dimension_numbers = #tpu.dot_dimension_numbers<[1], [0], [0], [1], [0, 0, 1, 1], [], []>, precision = #tpu.contract_precision<fp32>} : vector<16x512xf32>, vector<512x32xf32>, vector<16x32xf32> -> vector<16x32xf32>
    %18 = arith.negf %17 : vector<16x32xf32>
    %19 = math.exp %18 : vector<16x32xf32>
    %cst_13 = arith.constant 1.000000e+00 : f32
    %20 = vector.broadcast %cst_13 : f32 to vector<16x32xf32>
    %21 = arith.addf %20, %19 : vector<16x32xf32>
    %22 = arith.divf %20, %21 : vector<16x32xf32>
    %23 = arith.mulf %17, %22 : vector<16x32xf32>
    %c0_14 = arith.constant 0 : index
    %c0_15 = arith.constant 0 : index
    %c0_16 = arith.constant 0 : index
    %24 = vector.load %arg4[%c0_14, %c0_15, %c0_16] : memref<2x16x16xf32, #tpu.memory_space<vmem>>, vector<1x16x16xf32>
    %25 = vector.shape_cast %24 : vector<1x16x16xf32> to vector<16x16xf32>
    %cst_17 = arith.constant dense<0.000000e+00> : vector<16x32xf32>
    %26 = tpu.matmul %25, %23, %cst_17 {dimension_numbers = #tpu.dot_dimension_numbers<[1], [0], [0], [1], [0, 0, 1, 1], [], []>} : vector<16x16xf32>, vector<16x32xf32>, vector<16x32xf32> -> vector<16x32xf32>
    %27 = arith.addf %5, %26 : vector<16x32xf32>
    %c1 = arith.constant 1 : index
    %c0_18 = arith.constant 0 : index
    %c0_19 = arith.constant 0 : index
    %28 = vector.load %arg3[%c1, %c0_18, %c0_19] : memref<2x16x16xf32, #tpu.memory_space<vmem>>, vector<1x16x16xf32>
    %29 = vector.shape_cast %28 : vector<1x16x16xf32> to vector<16x16xf32>
    %cst_20 = arith.constant dense<0.000000e+00> : vector<16x32xf32>
    %30 = tpu.matmul %29, %3, %cst_20 {dimension_numbers = #tpu.dot_dimension_numbers<[1], [0], [0], [1], [0, 0, 1, 1], [], []>} : vector<16x16xf32>, vector<16x32xf32>, vector<16x32xf32> -> vector<16x32xf32>
    %31 = vector.shape_cast %4 : vector<16x16xf32> to vector<16x16x1xf32>
    %32 = vector.shape_cast %30 : vector<16x32xf32> to vector<16x1x32xf32>
    %33 = vector.broadcast %31 : vector<16x16x1xf32> to vector<16x16x32xf32>
    %34 = vector.broadcast %32 : vector<16x1x32xf32> to vector<16x16x32xf32>
    %35 = arith.mulf %33, %34 : vector<16x16x32xf32>
    %36 = vector.shape_cast %35 : vector<16x16x32xf32> to vector<16x512xf32>
    %c0_21 = arith.constant 0 : index
    %c1_22 = arith.constant 1 : index
    %c0_23 = arith.constant 0 : index
    %c0_24 = arith.constant 0 : index
    %37 = vector.load %arg5[%c0_21, %c1_22, %c0_23, %c0_24] : memref<1x2x512x32xf32, #tpu.memory_space<vmem>>, vector<1x1x512x32xf32>
    %38 = vector.shape_cast %37 : vector<1x1x512x32xf32> to vector<512x32xf32>
    %cst_25 = arith.constant dense<0.000000e+00> : vector<16x32xf32>
    %39 = tpu.matmul %36, %38, %cst_25 {dimension_numbers = #tpu.dot_dimension_numbers<[1], [0], [0], [1], [0, 0, 1, 1], [], []>, precision = #tpu.contract_precision<fp32>} : vector<16x512xf32>, vector<512x32xf32>, vector<16x32xf32> -> vector<16x32xf32>
    %40 = arith.negf %39 : vector<16x32xf32>
    %41 = math.exp %40 : vector<16x32xf32>
    %cst_26 = arith.constant 1.000000e+00 : f32
    %42 = vector.broadcast %cst_26 : f32 to vector<16x32xf32>
    %43 = arith.addf %42, %41 : vector<16x32xf32>
    %44 = arith.divf %42, %43 : vector<16x32xf32>
    %45 = arith.mulf %39, %44 : vector<16x32xf32>
    %c1_27 = arith.constant 1 : index
    %c0_28 = arith.constant 0 : index
    %c0_29 = arith.constant 0 : index
    %46 = vector.load %arg4[%c1_27, %c0_28, %c0_29] : memref<2x16x16xf32, #tpu.memory_space<vmem>>, vector<1x16x16xf32>
    %47 = vector.shape_cast %46 : vector<1x16x16xf32> to vector<16x16xf32>
    %cst_30 = arith.constant dense<0.000000e+00> : vector<16x32xf32>
    %48 = tpu.matmul %47, %45, %cst_30 {dimension_numbers = #tpu.dot_dimension_numbers<[1], [0], [0], [1], [0, 0, 1, 1], [], []>} : vector<16x16xf32>, vector<16x32xf32>, vector<16x32xf32> -> vector<16x32xf32>
    %49 = arith.addf %27, %48 : vector<16x32xf32>
    %50 = arith.addf %3, %49 : vector<16x32xf32>
    %c0_31 = arith.constant 0 : index
    %c0_32 = arith.constant 0 : index
    %51 = vector.load %arg6[%c0_31, %c0_32] : memref<16x32xf32, #tpu.memory_space<vmem>>, vector<16x32xf32>
    tpu.vector_store %arg6[%c0_31, %c0_32], %50 {strides = array<i32>} : memref<16x32xf32, #tpu.memory_space<vmem>>, vector<16x32xf32>,
    return
  }
  func.func @transform_0(%arg0: i32) -> (i32, i32) {
    %c0_i32 = arith.constant 0 : i32
    %c0_i32_0 = arith.constant 0 : i32
    %c0_i32_1 = arith.constant 0 : i32
    return %c0_i32, %c0_i32_0 : i32, i32
  }
  func.func @transform_1(%arg0: i32) -> (i32, i32) {
    %c0_i32 = arith.constant 0 : i32
    %c0_i32_0 = arith.constant 0 : i32
    %c0_i32_1 = arith.constant 0 : i32
    return %c0_i32, %c0_i32_0 : i32, i32
  }
  func.func @transform_2(%arg0: i32) -> (i32, i32, i32) {
    %c0_i32 = arith.constant 0 : i32
    %c0_i32_0 = arith.constant 0 : i32
    %c0_i32_1 = arith.constant 0 : i32
    %c0_i32_2 = arith.constant 0 : i32
    return %c0_i32, %c0_i32_0, %c0_i32_1 : i32, i32, i32
  }
  func.func @transform_3(%arg0: i32) -> (i32, i32, i32) {
    %c0_i32 = arith.constant 0 : i32
    %c0_i32_0 = arith.constant 0 : i32
    %c0_i32_1 = arith.constant 0 : i32
    %c0_i32_2 = arith.constant 0 : i32
    return %c0_i32, %c0_i32_0, %c0_i32_1 : i32, i32, i32
  }
  func.func @transform_4(%arg0: i32) -> (i32, i32, i32, i32) {
    %c0_i32 = arith.constant 0 : i32
    %c0_i32_0 = arith.constant 0 : i32
    %c0_i32_1 = arith.constant 0 : i32
    %c0_i32_2 = arith.constant 0 : i32
    return %arg0, %c0_i32, %c0_i32_0, %c0_i32_1 : i32, i32, i32, i32
  }
  func.func @transform_5(%arg0: i32) -> (i32, i32) {
    %c0_i32 = arith.constant 0 : i32
    %c0_i32_0 = arith.constant 0 : i32
    %c0_i32_1 = arith.constant 0 : i32
    return %c0_i32, %c0_i32_0 : i32, i32
  }
}

</mosaic_0001>

<bundles_post_ra>
// kernel: dimer_model_forward.1
= control target key start
LH: loop header
LB: loop body
LE: loop exit
PB: predicated region body
PF: predicated region fallthrough
CT: control target
= control target key end

     0   :  { %s8258_s18 = smov 0   ;;  %s12250_s0 = inlined_call_operand.vmem [shape: f32[16,32], index: 0, kind: input, shape index: {}]   ;;  %s12251_s1 = inlined_call_operand.vmem [shape: f32[16,16], index: 1, kind: input, shape index: {}]   ;;  %s12252_s2 = inlined_call_operand.vmem [shape: f32[2,16,16], index: 2, kind: input, shape index: {}]   ;;  %s12253_s3 = inlined_call_operand.vmem [shape: f32[2,16,16], index: 3, kind: input, shape index: {}]   ;;  %s12254_s4 = inlined_call_operand.vmem [shape: f32[2,2,512,32], index: 4, kind: input, shape index: {}]   ;;  %s12255_s5 = inlined_call_operand.vmem [shape: f32[16,32], index: 5, kind: output, shape index: {}]  }
   0x1 LB: > { %s6350_s19 = sadd.s32 4294967295, %s8220_s18   ;;  %p6353_p0 = scmp.ge.s32.totalorder %s8220_s18, 1  ;;  %s8220_s18 = sphi %s8258_s18, %s15_s18  }
   0x2   : > { %p182_p1 = scmp.lt.s32.totalorder %s8220_s18, 3 }
   0x4   : > { %p183_p2 = pnand %p6353_p0, %p182_p1 }
   0x6   : > { %186 = sbr.rel (%p183_p2) target bundleno = 1674 (0x68a), region = 40 }
   0xd   : > { %p205_p3 = scmp.lt.s32.totalorder %s6350_s19, 1  ;;  %p6356_p4 = scmp.ne.s32.totalorder %s6350_s19, 0 }
   0xe   : > { %v214_v0 = vld [vmem:[%s12250_s0] sm:$0xff] (!%p6356_p4)  ;;  %vm216_vm0 = vcmask (!%p6356_p4), 261120   ;;  %v215_v1 = vld [vmem:[%s12250_s0 + $0x8] sm:$0xff] (!%p6356_p4) }
   0xf   : > { %s206_s20 = scalar_select %p205_p3, %s6350_s19, 1 }
  0x10   : > { %213 = sbr.rel (%p6356_p4) target bundleno = 23 (0x17), region = 44  ;;  %217 = vst.msk [vmem:[%s12255_s5] sm:$0xff] (!%p6356_p4), %vm216_vm0, %v214_v0  ;;  %218 = vst.msk [vmem:[%s12255_s5 + $0x8] sm:$0xff] (!%p6356_p4), %vm216_vm0, %v215_v1 }
  0x11   : > { %s6439_s21 = sshll.u32 %s206_s20, 10 }
  0x12   : > { %s8269_s24 = scalar_lea.vmem %s12254_s4, %s6439_s21 }
  0x17 PF: > { %v219_v2 = vld [vmem:[%s12255_s5] sm:$0xff]  ;;  %v220_v3 = vld [vmem:[%s12255_s5 + $0x8] sm:$0xff]  ;;  %vm225_vm1 = vcmask 130048   ;;  %v307_v5 = vlaneseq  ;;  %v8374_v42 = vld [vmem:[%s8269_s24 + $0x90] sm:$0xff]  ;;  %s8225_s21 = smov 32   ;;  %s8226_s22 = smov 64  }
  0x18   : > { %v223_v4 = vld [vmem:[%s12252_s2] sm:$0xff]  ;;  %v8292_v6 = vpack.c.bf16 %v220_v3, %v219_v2  ;;  %v224_v9 = vld [vmem:[%s12252_s2 + $0x8] sm:$0xff]  ;;  %v8377_v43 = vld [vmem:[%s8269_s24 + $0x98] sm:$0xff]  ;;  %v1481_v45 = vand.u32 4294901760, %v8374_v42  ;;  %s8227_s23 = smov 96   ;;  %vm1335_vm2 = vcmask 261120  }
  0x19   : > { %7372 = vmatprep.mubr.msk.f32.mxu0 %vm225_vm1, %v223_v4  ;;  %v8295_v7 = vshrl.u32 %v307_v5, 7  ;;  %v221_v8 = vld [vmem:[%s12251_s1] sm:$0xff]  ;;  %v222_v26 = vld [vmem:[%s12251_s1 + $0x8] sm:$0xff]  ;;  %v1484_v46 = vand.u32 4294901760, %v8377_v43  ;;  %v8382_v47 = vld [vmem:[%s8269_s24 + $0x10] sm:$0xff]  ;;  %vm1338_vm3 = vcmask 523264  }
  0x1a   : > { %12696 = vst [vmem:[#allocation2_spill] sm:$0xff] %v8292_v6  ;;  %7397 = vmatprep.subr.bf16.mxu0 %v8292_v6  ;;  %v1378_v35 = vld [vmem:[%s8269_s24 + $0x80] sm:$0xff]  ;;  %v1379_v36 = vld [vmem:[%s8269_s24 + $0x88] sm:$0xff]  ;;  %v8385_v48 = vld [vmem:[%s8269_s24 + $0x18] sm:$0xff]  ;;  %v1433_v52 = vand.u32 4294901760, %v8382_v47  ;;  %v8397_v54 = vsub.f32 %v8374_v42, %v1481_v45  ;;  %vm1341_vm4 = vcmask 785408  }
  0x1b   : > { %7399 = vmatpush3.bf16.msra.mxu0 %v8292_v6  ;;  %v8306_v10 = vsub.s32 0, %v8295_v7  ;;  %v331_v11 = vsub.s32 2, %v8295_v7  ;;  %v320_v12 = vsub.s32 1, %v8295_v7  ;;  %v342_v13 = vsub.s32 3, %v8295_v7  ;;  %v1362_v37 = vld [vmem:[%s8269_s24] sm:$0xff]  ;;  %v1363_v40 = vld [vmem:[%s8269_s24 + $0x8] sm:$0xff] }
  0x1c   : > { %v353_v18 = vsub.s32 4, %v8295_v7  ;;  %v364_v19 = vsub.s32 5, %v8295_v7  ;;  %v375_v22 = vsub.s32 6, %v8295_v7  ;;  %v386_v23 = vsub.s32 7, %v8295_v7  ;;  %12702 = vst [vmem:[#allocation8_spill] sm:$0xff] %v8397_v54  ;;  %v8453_v42 = vld [vmem:[%s8269_s24 + $0x28] sm:$0xff] }
  0x1d   : > { %12697 = vst [vmem:[#allocation3_spill] sm:$0xff] %v8306_v10  ;;  %v8312_v14 = vrot.slane %v221_v8, %v8306_v10  ;;  %v8314_v15 = vrot.slane %v221_v8, %v331_v11  ;;  %v8319_v16 = vrot.slane %v221_v8, %v320_v12  ;;  %v8321_v17 = vrot.slane %v221_v8, %v342_v13 }
  0x1e   : > { %7373 = vmatmul.mubr.msk.f32.vlgmr.msra.gmra.mrb[0].mxu0 %vm225_vm1, %v224_v9  ;;  %v8327_v20 = vrot.slane %v221_v8, %v353_v18  ;;  %v8329_v21 = vrot.slane %v221_v8, %v364_v19  ;;  %v8335_v24 = vrot.slane %v221_v8, %v375_v22  ;;  %v8337_v25 = vrot.slane %v221_v8, %v386_v23 }
  0x1f   : > { %312 = vbcast.lane.b32.xlu0 %v8312_v14, 256  ;;  %334 = vbcast.lane.b32.xlu1 %v8314_v15, 256  ;;  %v8345_v27 = vrot.slane %v222_v26, %v8306_v10  ;;  %v8347_v28 = vrot.slane %v222_v26, %v320_v12  ;;  %v8351_v29 = vrot.slane %v222_v26, %v331_v11  ;;  %v1475_v38 = vand.u32 4294901760, %v1378_v35  ;;  %v8438_v12 = vld [vmem:[%s8269_s24 + $0xa0] sm:$0xff] }
  0x20   : > { %v8353_v30 = vrot.slane %v222_v26, %v342_v13  ;;  %v8357_v31 = vrot.slane %v222_v26, %v353_v18  ;;  %v8359_v32 = vrot.slane %v222_v26, %v364_v19  ;;  %v8363_v33 = vrot.slane %v222_v26, %v375_v22 }
  0x21   : > { %v8365_v34 = vrot.slane %v222_v26, %v386_v23  ;;  %v1478_v39 = vand.u32 4294901760, %v1379_v36  ;;  %v1427_v41 = vand.u32 4294901760, %v1362_v37  ;;  %v1430_v44 = vand.u32 4294901760, %v1363_v40  ;;  %v8444_v23 = vld [vmem:[%s8269_s24 + $0xa8] sm:$0xff] }
  0x22   : > { %12698 = vst [vmem:[#allocation4_spill] sm:$0xff] %v8363_v33  ;;  %v8387_v49 = vsub.f32 %v1378_v35, %v1475_v38  ;;  %v8400_v55 = vsub.f32 %v8377_v43, %v1484_v46  ;;  %v1436_v56 = vand.u32 4294901760, %v8385_v48  ;;  %v8409_v60 = vsub.f32 %v8382_v47, %v1433_v52 }
  0x23   : > { %323 = vbcast.lane.b32.xlu0 %v8319_v16, 256  ;;  %345 = vbcast.lane.b32.xlu1 %v8321_v17, 256  ;;  %12699 = vst [vmem:[#allocation5_spill] sm:$0xff] %v8365_v34  ;;  %v8389_v50 = vsub.f32 %v1379_v36, %v1478_v39  ;;  %v8391_v51 = vsub.f32 %v1362_v37, %v1427_v41  ;;  %v12259_v62 = vand.u32 4294901760, %v8397_v54 }
  0x24   : > { %v8394_v53 = vsub.f32 %v1363_v40, %v1430_v44  ;;  %12703 = vst [vmem:[#allocation9_spill] sm:$0xff] %v8400_v55  ;;  %v12266_v57 = vand.u32 4294901760, %v8387_v49  ;;  %12704 = vst [vmem:[#allocation10_spill] sm:$0xff] %v8409_v60  ;;  %v12257_v63 = vand.u32 4294901760, %v8400_v55  ;;  %v8415_v0 = vsub.f32 %v8385_v48, %v1436_v56  ;;  %v8450_v40 = vld [vmem:[%s8269_s24 + $0x20] sm:$0xff] }
  0x25   : > { %12700 = vst [vmem:[#allocation6_spill] sm:$0xff] %v8391_v51  ;;  %v12264_v58 = vand.u32 4294901760, %v8389_v50  ;;  %v12263_v59 = vand.u32 4294901760, %v8391_v51  ;;  %v12256_v4 = vand.u32 4294901760, %v8409_v60  ;;  %v1683_v8 = vsub.f32 %v8397_v54, %v12259_v62 }
  0x26   : > { %12701 = vst [vmem:[#allocation7_spill] sm:$0xff] %v8394_v53  ;;  %v12261_v61 = vand.u32 4294901760, %v8394_v53  ;;  %12705 = vst [vmem:[#allocation11_spill] sm:$0xff] %v8415_v0  ;;  %v1669_v1 = vsub.f32 %v8387_v49, %v12266_v57  ;;  %v1690_v9 = vsub.f32 %v8400_v55, %v12257_v63  ;;  %v12258_v11 = vand.u32 4294901760, %v8415_v0  ;;  %v8463_v63 = vld [vmem:[%s8269_s24 + $0xb8] sm:$0xff]  ;;  %v8548_v57 = vld [vmem:[%s8269_s24 + $0xc0] sm:$0xff] }
  0x27   : > { %356 = vbcast.lane.b32.xlu0 %v8327_v20, 256  ;;  %367 = vbcast.lane.b32.xlu1 %v8329_v21, 256  ;;  %v1676_v2 = vsub.f32 %v8389_v50, %v12264_v58  ;;  %v1557_v3 = vsub.f32 %v8391_v51, %v12263_v59  ;;  %v1571_v22 = vsub.f32 %v8409_v60, %v12256_v4  ;;  %v1684_v35 = vand.u32 4294901760, %v1683_v8 }
  0x28   : > { %v1564_v5 = vsub.f32 %v8394_v53, %v12261_v61  ;;  %v1670_v13 = vand.u32 4294901760, %v1669_v1  ;;  %v1691_v36 = vand.u32 4294901760, %v1690_v9  ;;  %v1578_v37 = vsub.f32 %v8415_v0, %v12258_v11 }
  0x29   : > { %v1677_v18 = vand.u32 4294901760, %v1676_v2  ;;  %v1558_v19 = vand.u32 4294901760, %v1557_v3  ;;  %v1572_v48 = vand.u32 4294901760, %v1571_v22  ;;  %v8455_v1 = vpack.c.bf16 %v1478_v39, %v1475_v38  ;;  %v8459_v3 = vld [vmem:[%s8269_s24 + $0xb0] sm:$0xff] }
  0x2a   : > { %v1565_v26 = vand.u32 4294901760, %v1564_v5  ;;  %v1487_v2 = vand.u32 4294901760, %v8438_v12  ;;  %v7436_v8 = vpack.c.bf16 %v1691_v36, %v1684_v35  ;;  %v1579_v9 = vand.u32 4294901760, %v1578_v37  ;;  %v8494_v37 = vld [vmem:[%s8269_s24 + $0x38] sm:$0xff] }
  0x2b   : > { %378 = vbcast.lane.b32.xlu0 %v8335_v24, 256  ;;  %389 = vbcast.lane.b32.xlu1 %v8337_v25, 256  ;;  %v7432_v43 = vpack.c.bf16 %v1677_v18, %v1670_v13  ;;  %v1490_v4 = vand.u32 4294901760, %v8444_v23  ;;  %v8469_v38 = vpack.c.bf16 %v1430_v44, %v1427_v41  ;;  %v12270_v39 = vand.u32 4294901760, %v8450_v40 }
  0x2c   : > { %v7434_v5 = vpack.c.bf16 %v1565_v26, %v1558_v19  ;;  %7401 = vmatprep.subr.bf16.mxu1 %v8455_v1  ;;  %v8467_v13 = vsub.f32 %v8438_v12, %v1487_v2  ;;  %v1442_v18 = vand.u32 4294901760, %v8453_v42  ;;  %v8474_v19 = vld [vmem:[%s8269_s24 + $0x30] sm:$0xff]  ;;  %v7438_v22 = vpack.c.bf16 %v1579_v9, %v1572_v48 }
  0x2d   : > { %7433 = vmatprep.subr.bf16.mxu0 %v7432_v43  ;;  %12707 = vst [vmem:[#allocation13_spill] sm:$0xff] %v8469_v38  ;;  %v8477_v26 = vsub.f32 %v8444_v23, %v1490_v4  ;;  %v8479_v35 = vpack.c.bf16 %v1484_v46, %v1481_v45  ;;  %v12269_v36 = vand.u32 4294901760, %v8459_v3  ;;  %7403 = vmatpush3.bf16.msra.mxu1 %v8469_v38  ;;  %v1496_v23 = vand.u32 4294901760, %v8463_v63 }
  0x2e   : > { %12706 = vst [vmem:[#allocation12_spill] sm:$0xff] %v8467_v13  ;;  %7435 = vmatpush3.bf16.msra.mxu0 %v7434_v5  ;;  %v12260_v12 = vand.u32 4294901760, %v8467_v13  ;;  %v8487_v41 = vsub.f32 %v8450_v40, %v12270_v39  ;;  %v8490_v44 = vsub.f32 %v8453_v42, %v1442_v18  ;;  %v8505_v43 = vpack.c.bf16 %v1436_v56, %v1433_v52 }
  0x2f   : > { %400 = vbcast.lane.b32.xlu0 %v8345_v27, 256  ;;  %411 = vbcast.lane.b32.xlu1 %v8347_v28, 256  ;;  %12708 = vst [vmem:[#allocation14_spill] sm:$0xff] %v8477_v26  ;;  %12709 = vst [vmem:[#allocation15_spill] sm:$0xff] %v8479_v35  ;;  %v12262_v45 = vand.u32 4294901760, %v8477_v26  ;;  %v8501_v46 = vsub.f32 %v8459_v3, %v12269_v36  ;;  %v12268_v42 = vand.u32 4294901760, %v8474_v19 }
  0x30   : > { %7437 = vmatprep.subr.bf16.mxu0 %v7436_v8  ;;  %12710 = vst [vmem:[#allocation16_spill] sm:$0xff] %v8487_v41  ;;  %12711 = vst [vmem:[#allocation17_spill] sm:$0xff] %v8490_v44  ;;  %7405 = vmatprep.subr.bf16.mxu1 %v8479_v35  ;;  %v1697_v5 = vsub.f32 %v8467_v13, %v12260_v12  ;;  %v12265_v8 = vand.u32 4294901760, %v8487_v41  ;;  %v12267_v9 = vand.u32 4294901760, %v8490_v44  ;;  %v12274_v56 = vand.u32 4294901760, %v8494_v37 }
  0x31   : > { %12712 = vst [vmem:[#allocation18_spill] sm:$0xff] %v8501_v46  ;;  %12713 = vst [vmem:[#allocation19_spill] sm:$0xff] %v8505_v43  ;;  %v8516_v11 = vsub.f32 %v8463_v63, %v1496_v23  ;;  %v1704_v47 = vsub.f32 %v8477_v26, %v12262_v45  ;;  %v12271_v52 = vand.u32 4294901760, %v8501_v46  ;;  %v8528_v12 = vsub.f32 %v8474_v19, %v12268_v42 }
  0x32   : > { %7439 = vmatpush3.bf16.msra.mxu0 %v7438_v22  ;;  %v1698_v63 = vand.u32 4294901760, %v1697_v5  ;;  %v1585_v61 = vsub.f32 %v8487_v41, %v12265_v8  ;;  %v1592_v22 = vsub.f32 %v8490_v44, %v12267_v9  ;;  %7407 = vmatpush3.bf16.msra.mxu1 %v8505_v43  ;;  %v8545_v8 = vsub.f32 %v8494_v37, %v12274_v56  ;;  %v8551_v9 = vld [vmem:[%s8269_s24 + $0xc8] sm:$0xff] }
  0x33   : > { %422 = vbcast.lane.b32.xlu0 %v8351_v29, 256  ;;  %433 = vbcast.lane.b32.xlu1 %v8353_v30, 256  ;;  %12715 = vst [vmem:[#allocation21_spill] sm:$0xff] %v8516_v11  ;;  %12717 = vst [vmem:[#allocation23_spill] sm:$0xff] %v8528_v12  ;;  %v12283_v45 = vand.u32 4294901760, %v8516_v11  ;;  %v1705_v59 = vand.u32 4294901760, %v1704_v47  ;;  %v1711_v58 = vsub.f32 %v8501_v46, %v12271_v52 }
  0x34   : > { %12718 = vst [vmem:[#allocation24_spill] sm:$0xff] %v8545_v8  ;;  %v1586_v42 = vand.u32 4294901760, %v1585_v61  ;;  %v1593_v36 = vand.u32 4294901760, %v1592_v22  ;;  %v8556_v39 = vpack.c.bf16 %v1490_v4, %v1487_v2  ;;  %v8559_v52 = vld [vmem:[%s8269_s24 + $0x40] sm:$0xff]  ;;  %v12720_v56 = vand.u32 4294901760, %v8528_v12  ;;  %v8566_v61 = vld [vmem:[%s8269_s24 + $0x48] sm:$0xff] }
  0x35   : > { %v1718_v47 = vsub.f32 %v8516_v11, %v12283_v45  ;;  %v7440_v5 = vpack.c.bf16 %v1705_v59, %v1698_v63  ;;  %v1712_v6 = vand.u32 4294901760, %v1711_v58  ;;  %v12286_v46 = vand.u32 4294901760, %v8545_v8  ;;  %v8574_v58 = vld [vmem:[%s8269_s24 + $0xd0] sm:$0xff] }
  0x36   : > { %12719 = vst [vmem:[#allocation25_spill] sm:$0xff] %v8556_v39  ;;  %v1599_v43 = vsub.f32 %v8528_v12, %v12720_v56  ;;  %v7442_v44 = vpack.c.bf16 %v1593_v36, %v1586_v42  ;;  %7409 = vmatprep.subr.bf16.mxu1 %v8556_v39  ;;  %v12287_v4 = vand.u32 4294901760, %v8548_v57  ;;  %v12723_v45 = vand.u32 4294901760, %v8450_v40 }
  0x37   : > { %444 = vbcast.lane.b32.xlu0 %v8357_v31, 256  ;;  %455 = vbcast.lane.b32.xlu1 %v8359_v32, 256  ;;  %v1719_v41 = vand.u32 4294901760, %v1718_v47  ;;  %v1606_v63 = vsub.f32 %v8545_v8, %v12286_v46  ;;  %v12288_v42 = vand.u32 4294901760, %v8559_v52  ;;  %v8587_v47 = vld [vmem:[%s8269_s24 + $0xd8] sm:$0xff]  ;;  %v12291_v40 = vand.u32 4294901760, %v8566_v61 }
  0x38   : > { %7441 = vmatprep.subr.bf16.mxu0 %v7440_v5  ;;  %v1600_v56 = vand.u32 4294901760, %v1599_v43  ;;  %v8583_v36 = vpack.c.bf16 %v1442_v18, %v12723_v45  ;;  %v8592_v39 = vsub.f32 %v8548_v57, %v12287_v4  ;;  %v12726_v43 = vand.u32 4294901760, %v8551_v9 }
  0x39   : > { %7443 = vmatpush3.bf16.msra.mxu0 %v7442_v44  ;;  %v7444_v59 = vpack.c.bf16 %v1719_v41, %v1712_v6  ;;  %v1607_v18 = vand.u32 4294901760, %v1606_v63  ;;  %v8604_v44 = vsub.f32 %v8559_v52, %v12288_v42  ;;  %v12729_v6 = vand.u32 4294901760, %v8459_v3 }
  0x3a   : > { %12724 = vst [vmem:[#allocation28_spill] sm:$0xff] %v8583_v36  ;;  %12725 = vst [vmem:[#allocation29_spill] sm:$0xff] %v8592_v39  ;;  %v8597_v5 = vsub.f32 %v8551_v9, %v12726_v43  ;;  %7411 = vmatpush3.bf16.msra.mxu1 %v8583_v36  ;;  %v12292_v45 = vand.u32 4294901760, %v8574_v58  ;;  %v12295_v43 = vand.u32 4294901760, %v8592_v39  ;;  %v8616_v63 = vsub.f32 %v8566_v61, %v12291_v40 }
  0x3b   : > { %466 = vbcast.lane.b32.xlu0 %v8363_v33, 256  ;;  %477 = vbcast.lane.b32.xlu1 %v8365_v34, 256  ;;  %12728 = vst [vmem:[#allocation31_spill] sm:$0xff] %v8604_v44  ;;  %v8608_v41 = vpack.c.bf16 %v1496_v23, %v12729_v6  ;;  %v12303_v4 = vand.u32 4294901760, %v8587_v47  ;;  %v7446_v42 = vpack.c.bf16 %v1607_v18, %v1600_v56 }
  0x3c   : > { %12727 = vst [vmem:[#allocation30_spill] sm:$0xff] %v8597_v5  ;;  %7445 = vmatprep.subr.bf16.mxu0 %v7444_v59  ;;  %v12300_v46 = vand.u32 4294901760, %v8597_v5  ;;  %12731 = vst [vmem:[#allocation33_spill] sm:$0xff] %v8616_v63  ;;  %v8624_v3 = vsub.f32 %v8574_v58, %v12292_v45  ;;  %v1725_v59 = vsub.f32 %v8592_v39, %v12295_v43  ;;  %v12312_v56 = vand.u32 4294901760, %v8616_v63 }
  0x3d   : > { %12730 = vst [vmem:[#allocation32_spill] sm:$0xff] %v8608_v41  ;;  %7413 = vmatprep.subr.bf16.mxu1 %v8608_v41  ;;  %v8638_v18 = vsub.f32 %v8587_v47, %v12303_v4  ;;  %v8222_v45 = vmov 1966171168   ;;  %7447 = vmatpush3.bf16.msra.mxu0 %v7446_v42  ;;  %v12736_v41 = vand.u32 4294901760, %v8604_v44 }
  0x3e   : > { %12732 = vst [vmem:[#allocation34_spill] sm:$0xff] %v8624_v3  ;;  %v1732_v6 = vsub.f32 %v8597_v5, %v12300_v46  ;;  %v487_v36 = vunpack.c.l.s4 %v8222_v45  ;;  %v12318_v39 = vand.u32 4294901760, %v8624_v3  ;;  %v1726_v8 = vand.u32 4294901760, %v1725_v59 }
  0x3f   : > { %12734 = vst [vmem:[#allocation36_spill] sm:$0xff] %v8638_v18  ;;  %v1613_v43 = vsub.f32 %v8604_v44, %v12736_v41  ;;  %v1620_v5 = vsub.f32 %v8616_v63, %v12312_v56  ;;  %v12317_v4 = vand.u32 4294901760, %v8638_v18 }
  0x40   : > { %v1733_v46 = vand.u32 4294901760, %v1732_v6  ;;  %v1739_v45 = vsub.f32 %v8624_v3, %v12318_v39  ;;  %v488_v44 = vunpack.c.0.s8 %v487_v36 }
  0x41   : > { %v1614_v12 = vand.u32 4294901760, %v1613_v43  ;;  %v1621_v11 = vand.u32 4294901760, %v1620_v5  ;;  %v1746_v41 = vsub.f32 %v8638_v18, %v12317_v4 }
  0x42   : > { %v7448_v42 = vpack.c.bf16 %v1733_v46, %v1726_v8  ;;  %v1740_v59 = vand.u32 4294901760, %v1739_v45  ;;  %v8661_v13 = vsub.s32 %v488_v44, %v8295_v7 }
  0x43   : > { %v7450_v26 = vpack.c.bf16 %v1621_v11, %v1614_v12  ;;  %v1747_v56 = vand.u32 4294901760, %v1746_v41  ;;  %v8223_v12 = vmov 1983009808  }
  0x44   : > { %7449 = vmatprep.subr.bf16.mxu0 %v7448_v42  ;;  %12739 = vst [vmem:[#allocation40_spill] sm:$0xff] %v8661_v13  ;;  %v698_v42 = vunpack.c.l.s4 %v8223_v12 }
  0x45   : > { %7451 = vmatpush3.bf16.msra.mxu0 %v7450_v26  ;;  %v7452_v43 = vpack.c.bf16 %v1747_v56, %v1740_v59 }
  0x46   : > { %v699_v55 = vunpack.c.0.s8 %v698_v42 }
  0x47   : > { %7453 = vmatprep.subr.bf16.mxu0 %v7452_v43  ;;  %v8224_v43 = vmov 1934713408  }
  0x48   : > { %v762_v39 = vunpack.c.l.s4 %v8224_v43 }
  0x91   : > { %v8508_v48 = vpop.permute.xlu0 %312  ;;  %v8518_v62 = vpop.permute.xlu1 %334 }
  0x92   : > { %12714 = vst [vmem:[#allocation20_spill] sm:$0xff] %v8508_v48  ;;  %12716 = vst [vmem:[#allocation22_spill] sm:$0xff] %v8518_v62 }
  0x95   : > { %v8568_v22 = vpop.permute.xlu0 %323  ;;  %v8576_v2 = vpop.permute.xlu1 %345 }
  0x96   : > { %12721 = vst [vmem:[#allocation26_spill] sm:$0xff] %v8568_v22  ;;  %12722 = vst [vmem:[#allocation27_spill] sm:$0xff] %v8576_v2 }
  0x99   : > { %v8626_v23 = vpop.permute.xlu0 %356  ;;  %v8640_v40 = vpop.permute.xlu1 %367 }
  0x9a   : > { %12733 = vst [vmem:[#allocation35_spill] sm:$0xff] %v8626_v23  ;;  %12735 = vst [vmem:[#allocation37_spill] sm:$0xff] %v8640_v40 }
  0x9d   : > { %v8656_v6 = vpop.permute.xlu0 %378  ;;  %v8658_v63 = vpop.permute.xlu1 %389 }
  0x9e   : > { %12737 = vst [vmem:[#allocation38_spill] sm:$0xff] %v8656_v6  ;;  %12738 = vst [vmem:[#allocation39_spill] sm:$0xff] %v8658_v63 }
  0xa1   : > { %v8663_v46 = vpop.permute.xlu0 %400  ;;  %v8665_v5 = vpop.permute.xlu1 %411 }
  0xa2   : > { %12740 = vst [vmem:[#allocation41_spill] sm:$0xff] %v8663_v46  ;;  %12741 = vst [vmem:[#allocation42_spill] sm:$0xff] %v8665_v5 }
  0xa5   : > { %v8677_v54 = vpop.permute.xlu1 %433 }
  0xa6   : > { %12743 = vst [vmem:[#allocation44_spill] sm:$0xff] %v8677_v54 }
  0xf1   : > { %v7374_v8 = vpop.f32.mrb[0].mxu0 }
  0xf2   : > { %v541_v36 = vrot.slane %v7374_v8, %v8661_v13  ;;  %v298_v45 = vpop.f32.mrb[1].mxu0  ;;  %v534_v41 = vcombine.high %v7374_v8, %v7374_v8  ;;  %v8675_v8 = vpop.permute.xlu0 %422 }
  0xf3   : > { %v485_v4 = vcombine.high %v298_v45, %v298_v45  ;;  %v492_v11 = vrot.slane %v298_v45, %v8661_v13  ;;  %12742 = vst [vmem:[#allocation43_spill] sm:$0xff] %v8675_v8 }
  0xf4   : > { %v549_v26 = vcombine.high %v541_v36, %v541_v36  ;;  %v548_v45 = vrot.slane %v534_v41, %v8661_v13 }
  0xf5   : > { %v499_v56 = vrot.slane %v485_v4, %v8661_v13  ;;  %v500_v44 = vcombine.high %v492_v11, %v492_v11  ;;  %v508_v59 = vrot.slane %v492_v11, %v8661_v13 }
  0xf6   : > { %v571_v12 = vrot.slane %v549_v26, %v8661_v13  ;;  %v557_v26 = vrot.slane %v541_v36, %v8661_v13 }
  0xf7   : > { %v501_v18 = vcombine.high %v499_v56, %v499_v56  ;;  %v515_v3 = vrot.slane %v499_v56, %v8661_v13  ;;  %v522_v0 = vrot.slane %v500_v44, %v8661_v13  ;;  %v530_v60 = vcombine.high %v508_v59, %v508_v59 }
  0xf8   : > { %v763_v56 = vunpack.c.0.s8 %v762_v39  ;;  %v8684_v44 = vrot.slane %v508_v59, %v8306_v10  ;;  %v581_v59 = vcombine.high %v571_v12, %v571_v12 }
  0xf9   : > { %v529_v4 = vrot.slane %v501_v18, %v8661_v13  ;;  %v531_v11 = vcombine.high %v515_v3, %v515_v3  ;;  %v532_v53 = vcombine.high %v522_v0, %v522_v0  ;;  %v8681_v43 = vrot.slane %v522_v0, %v8306_v10 }
  0xfa   : > { %12745 = vst [vmem:[#allocation46_spill] sm:$0xff] %v8684_v44  ;;  %v8687_v42 = vrot.slane %v530_v60, %v8306_v10  ;;  %v8690_v41 = vrot.slane %v515_v3, %v8306_v10  ;;  %v550_v0 = vcombine.high %v548_v45, %v548_v45 }
  0xfb   : > { %12744 = vst [vmem:[#allocation45_spill] sm:$0xff] %v8681_v43  ;;  %v533_v51 = vcombine.high %v529_v4, %v529_v4  ;;  %v8694_v18 = vrot.slane %v532_v53, %v8306_v10  ;;  %v8697_v35 = vrot.slane %v531_v11, %v8306_v10  ;;  %v8700_v39 = vrot.slane %v529_v4, %v8306_v10 }
  0xfc   : > { %12746 = vst [vmem:[#allocation47_spill] sm:$0xff] %v8687_v42  ;;  %12747 = vst [vmem:[#allocation48_spill] sm:$0xff] %v8690_v41  ;;  %v667_v60 = vmul.f32 %v8687_v42, %v8518_v62  ;;  %v665_v36 = vmul.f32 %v8681_v43, %v8568_v22  ;;  %v663_v4 = vmul.f32 %v8684_v44, %v8508_v48  ;;  %v8717_v62 = vpop.permute.xlu0 %444  ;;  %v8719_v42 = vpop.permute.xlu1 %455 }
  0xfd   : > { %12748 = vst [vmem:[#allocation49_spill] sm:$0xff] %v8694_v18  ;;  %12749 = vst [vmem:[#allocation50_spill] sm:$0xff] %v8697_v35  ;;  %v8705_v3 = vrot.slane %v533_v51, %v8306_v10  ;;  %v669_v53 = vmul.f32 %v8694_v18, %v8576_v2  ;;  %v675_v11 = vmul.f32 %v8697_v35, %v8656_v6 }
  0xfe   : > { %12750 = vst [vmem:[#allocation51_spill] sm:$0xff] %v8700_v39  ;;  %v671_v38 = vmul.f32 %v8690_v41, %v8626_v23  ;;  %12752 = vst [vmem:[#allocation53_spill] sm:$0xff] %v8717_v62  ;;  %v8722_v51 = vsub.s32 %v699_v55, %v8295_v7  ;;  %v8725_v22 = vsub.s32 %v763_v56, %v8295_v7 }
  0xff   : > { %12751 = vst [vmem:[#allocation52_spill] sm:$0xff] %v8705_v3  ;;  %12753 = vst [vmem:[#allocation54_spill] sm:$0xff] %v8719_v42  ;;  %v677_v2 = vmul.f32 %v8705_v3, %v8658_v63  ;;  %v712_v6 = vcombine.high %v665_v36, %v669_v53  ;;  %v673_v48 = vmul.f32 %v8700_v39, %v8640_v40 }
 0x100   : > { %12754 = vst [vmem:[#allocation55_spill] sm:$0xff] %v8722_v51  ;;  %12755 = vst [vmem:[#allocation56_spill] sm:$0xff] %v8725_v22  ;;  %v696_v35 = vcombine.high %v663_v4, %v667_v60  ;;  %v728_v43 = vcombine.high %v671_v38, %v675_v11  ;;  %v579_v23 = vcombine.high %v557_v26, %v557_v26 }
 0x101   : > { %v8732_v41 = vrot.slane %v557_v26, %v8306_v10  ;;  %v8735_v44 = vrot.slane %v581_v59, %v8306_v10  ;;  %v564_v55 = vrot.slane %v548_v45, %v8661_v13  ;;  %v578_v7 = vrot.slane %v550_v0, %v8661_v13  ;;  %v8752_v45 = vpop.permute.xlu0 %466  ;;  %v8754_v0 = vpop.permute.xlu1 %477 }
 0x102   : > { %v711_v56 = vcombine.low %v665_v36, %v669_v53  ;;  %v8740_v63 = vrot.slane %v571_v12, %v8306_v10  ;;  %v726_v3 = vrot.slane %v712_v6, %v8722_v51  ;;  %v744_v40 = vcombine.high %v673_v48, %v677_v2  ;;  %12762 = vst [vmem:[#allocation63_spill] sm:$0xff] %v8752_v45 }
 0x103   : > { %12756 = vst [vmem:[#allocation57_spill] sm:$0xff] %v8732_v41  ;;  %12757 = vst [vmem:[#allocation58_spill] sm:$0xff] %v8735_v44  ;;  %v8744_v39 = vrot.slane %v564_v55, %v8306_v10  ;;  %v8747_v26 = vrot.slane %v578_v7, %v8306_v10  ;;  %v580_v18 = vcombine.high %v564_v55, %v564_v55 }
 0x104   : > { %12758 = vst [vmem:[#allocation59_spill] sm:$0xff] %v8740_v63  ;;  %v582_v59 = vcombine.high %v578_v7, %v578_v7  ;;  %v8750_v34 = vrot.slane %v579_v23, %v8306_v10  ;;  %12763 = vst [vmem:[#allocation64_spill] sm:$0xff] %v8754_v0  ;;  %v710_v12 = vrot.slane %v696_v35, %v8722_v51 }
 0x105   : > { %12759 = vst [vmem:[#allocation60_spill] sm:$0xff] %v8744_v39  ;;  %12760 = vst [vmem:[#allocation61_spill] sm:$0xff] %v8747_v26  ;;  %v742_v6 = vrot.slane %v728_v43, %v8722_v51  ;;  %v758_v36 = vrot.slane %v744_v40, %v8722_v51  ;;  %v695_v53 = vcombine.low %v663_v4, %v667_v60 }
 0x106   : > { %12761 = vst [vmem:[#allocation62_spill] sm:$0xff] %v8750_v34  ;;  %v685_v13 = vmul.f32 %v8735_v44, %v8677_v54  ;;  %v8762_v55 = vrot.slane %v580_v18, %v8306_v10  ;;  %v8765_v23 = vrot.slane %v582_v59, %v8306_v10  ;;  %v681_v7 = vmul.f32 %v8740_v63, %v8665_v5 }
 0x107   : > { %v687_v35 = vmul.f32 %v8744_v39, %v8717_v62  ;;  %v775_v33 = vcombine.low %v710_v12, %v726_v3  ;;  %v807_v43 = vcombine.low %v742_v6, %v758_v36  ;;  %v689_v40 = vmul.f32 %v8747_v26, %v8719_v42 }
 0x108   : > { %12764 = vst [vmem:[#allocation65_spill] sm:$0xff] %v8762_v55  ;;  %12765 = vst [vmem:[#allocation66_spill] sm:$0xff] %v8765_v23  ;;  %v691_v60 = vmul.f32 %v8762_v55, %v8752_v45  ;;  %v693_v18 = vmul.f32 %v8765_v23, %v8754_v0  ;;  %v719_v4 = vrot.slane %v711_v56, %v8722_v51 }
 0x109   : > { %v727_v59 = vcombine.low %v671_v38, %v675_v11  ;;  %v683_v5 = vmul.f32 %v8750_v34, %v8675_v8  ;;  %v847_v54 = vcombine.low %v681_v7, %v685_v13  ;;  %v703_v39 = vrot.slane %v695_v53, %v8722_v51 }
 0x10a   : > { %v864_v10 = vcombine.high %v687_v35, %v691_v60  ;;  %v880_v62 = vcombine.high %v689_v40, %v693_v18  ;;  %v848_v63 = vcombine.high %v681_v7, %v685_v13  ;;  %v8782_v42 = vrot.slane %v775_v33, %v8725_v22 }
 0x10b   : > { %v8785_v45 = vrot.slane %v807_v43, %v8725_v22  ;;  %v743_v26 = vcombine.low %v673_v48, %v677_v2  ;;  %v679_v56 = vmul.f32 %v8732_v41, %v8663_v46  ;;  %v879_v38 = vcombine.low %v689_v40, %v693_v18 }
 0x10c   : > { %v8790_v11 = vrot.slane %v880_v62, %v8722_v51  ;;  %v759_v0 = vcombine.low %v703_v39, %v719_v4  ;;  %v735_v13 = vrot.slane %v727_v59, %v8722_v51  ;;  %v776_v53 = vcombine.high %v710_v12, %v726_v3 }
 0x10d   : > { %v828_v8 = vcombine.high %v8782_v42, %v8785_v45  ;;  %v751_v33 = vrot.slane %v743_v26, %v8722_v51  ;;  %v831_v7 = vcombine.low %v679_v56, %v683_v5  ;;  %v832_v43 = vcombine.high %v679_v56, %v683_v5 }
 0x10e   : > { %v863_v23 = vcombine.low %v687_v35, %v691_v60  ;;  %v8797_v48 = vrot.slane %v864_v10, %v8722_v51  ;;  %v8800_v2 = vrot.slane %v847_v54, %v8722_v51  ;;  %v8803_v62 = vrot.slane %v848_v63, %v8722_v51 }
 0x10f   : > { %1265 = vrot.lane.b32.xlu0 %v828_v8, %s8225_s21  ;;  %v791_v40 = vcombine.low %v735_v13, %v751_v33  ;;  %v808_v18 = vcombine.high %v742_v6, %v758_v36  ;;  %v8807_v3 = vrot.slane %v879_v38, %v8722_v51  ;;  %v8812_v5 = vrot.slane %v759_v0, %v8725_v22  ;;  %v8829_v0 = vld [vmem:[%s8269_s24 + $0x50] sm:$0xff]  ;;  %v8835_v38 = vld [vmem:[%s8269_s24 + $0x58] sm:$0xff] }
 0x110   : > { %v943_v10 = vcombine.low %v8797_v48, %v8790_v11  ;;  %v792_v54 = vcombine.high %v735_v13, %v751_v33  ;;  %v790_v26 = vrot.slane %v776_v53, %v8725_v22  ;;  %v760_v12 = vcombine.high %v703_v39, %v719_v4  ;;  %v8844_v13 = vld [vmem:[%s8269_s24 + $0xe0] sm:$0xff] }
 0x111   : > { %12766 = vst [vmem:[#allocation67_spill] sm:$0xff] %v8812_v5  ;;  %v8815_v63 = vrot.slane %v791_v40, %v8725_v22  ;;  %v822_v8 = vrot.slane %v808_v18, %v8725_v22  ;;  %v8820_v6 = vrot.slane %v831_v7, %v8722_v51  ;;  %v8823_v36 = vrot.slane %v832_v43, %v8722_v51  ;;  %v8856_v40 = vld [vmem:[%s8269_s24 + $0xe8] sm:$0xff]  ;;  %v8874_v4 = vld [vmem:[%s8269_s24 + $0x60] sm:$0xff] }
 0x112   : > { %v8826_v35 = vrot.slane %v863_v23, %v8722_v51  ;;  %v806_v56 = vrot.slane %v792_v54, %v8725_v22  ;;  %v774_v33 = vrot.slane %v760_v12, %v8725_v22  ;;  %v8850_v53 = vrot.slane %v943_v10, %v8725_v22  ;;  %v8877_v43 = vld [vmem:[%s8269_s24 + $0x68] sm:$0xff] }
 0x113   : > { %12767 = vst [vmem:[#allocation68_spill] sm:$0xff] %v8815_v63  ;;  %v824_v60 = vcombine.high %v8812_v5, %v8815_v63  ;;  %v829_v59 = vcombine.low %v790_v26, %v822_v8  ;;  %v12768_v54 = vand.u32 4294901760, %v8474_v19  ;;  %v1460_v12 = vand.u32 4294901760, %v8835_v38 }
 0x114   : > { %v927_v23 = vcombine.low %v8826_v35, %v8807_v3  ;;  %v12771_v10 = vand.u32 4294901760, %v8548_v57  ;;  %v12772_v39 = vand.u32 4294901760, %v8551_v9  ;;  %v825_v46 = vcombine.low %v774_v33, %v806_v56 }
 0x115   : > { %1241 = vrot.lane.b32.xlu1 %v824_v60, %s8225_s21  ;;  %1273 = vrot.lane.b32.xlu0 %v829_v59, %s8226_s22  ;;  %v12769_v60 = vand.u32 4294901760, %v8494_v37  ;;  %v830_v18 = vcombine.high %v790_v26, %v822_v8  ;;  %v12774_v19 = vand.u32 4294901760, %v8829_v0  ;;  %v826_v57 = vcombine.high %v774_v33, %v806_v56 }
 0x116   : > { %v8871_v7 = vpack.c.bf16 %v12772_v39, %v12771_v10  ;;  %v8890_v9 = vsub.f32 %v8835_v38, %v1460_v12  ;;  %v1514_v39 = vand.u32 4294901760, %v8856_v40  ;;  %v12775_v26 = vand.u32 4294901760, %v8559_v52 }
 0x117   : > { %v8864_v59 = vpack.c.bf16 %v12769_v60, %v12768_v54  ;;  %v8882_v37 = vsub.f32 %v8829_v0, %v12774_v19  ;;  %v12373_v54 = vand.u32 4294901760, %v8844_v13  ;;  %v8886_v60 = vld [vmem:[%s8269_s24 + $0xf0] sm:$0xff]  ;;  %v12776_v8 = vand.u32 4294901760, %v8566_v61  ;;  %v1393_v19 = vld [vmem:[%s8269_s24 + $0xf8] sm:$0xff] }
 0x118   : > { %12773 = vst [vmem:[#allocation70_spill] sm:$0xff] %v8871_v7  ;;  %v1463_v33 = vand.u32 4294901760, %v8874_v4  ;;  %v1466_v52 = vand.u32 4294901760, %v8877_v43 }
 0x119   : > { %12770 = vst [vmem:[#allocation69_spill] sm:$0xff] %v8864_v59  ;;  %7415 = vmatpush3.bf16.msra.mxu1 %v8864_v59  ;;  %v8897_v10 = vpack.c.bf16 %v12776_v8, %v12775_v26  ;;  %1249 = vrot.lane.b32.xlu1 %v825_v46, %s8226_s22  ;;  %v12376_v56 = vand.u32 4294901760, %v8882_v37  ;;  %v8905_v38 = vsub.f32 %v8844_v13, %v12373_v54  ;;  %v12779_v26 = vand.u32 4294901760, %v8587_v47 }
 0x11a   : > { %1281 = vrot.lane.b32.xlu0 %v830_v18, %s8227_s23  ;;  %7417 = vmatprep.subr.bf16.mxu1 %v8871_v7  ;;  %v8913_v46 = vsub.f32 %v8856_v40, %v1514_v39  ;;  %v12778_v18 = vand.u32 4294901760, %v8574_v58  ;;  %v1517_v54 = vand.u32 4294901760, %v8886_v60  ;;  %v8927_v61 = vsub.f32 %v8874_v4, %v1463_v33 }
 0x11b   : > { %12777 = vst [vmem:[#allocation71_spill] sm:$0xff] %v8897_v10  ;;  %v1627_v55 = vsub.f32 %v8882_v37, %v12376_v56  ;;  %v12381_v44 = vand.u32 4294901760, %v8905_v38  ;;  %v8930_v40 = vsub.f32 %v8877_v43, %v1466_v52  ;;  %v12781_v58 = vand.u32 4294901760, %v8890_v9 }
 0x11c   : > { %v8919_v8 = vpack.c.bf16 %v12779_v26, %v12778_v18  ;;  %v1520_v26 = vand.u32 4294901760, %v1393_v19  ;;  %v8938_v56 = vsub.f32 %v8886_v60, %v1517_v54  ;;  %v12783_v34 = vand.u32 4294901760, %v8913_v46 }
 0x11d   : > { %v1634_v47 = vsub.f32 %v8890_v9, %v12781_v58  ;;  %7419 = vmatpush3.bf16.msra.mxu1 %v8897_v10  ;;  %1257 = vrot.lane.b32.xlu1 %v826_v57, %s8227_s23  ;;  %v1628_v4 = vand.u32 4294901760, %v1627_v55  ;;  %v1753_v43 = vsub.f32 %v8905_v38, %v12381_v44  ;;  %v12390_v58 = vand.u32 4294901760, %v8927_v61 }
 0x11e   : > { %12780 = vst [vmem:[#allocation72_spill] sm:$0xff] %v8919_v8  ;;  %12782 = vst [vmem:[#allocation73_spill] sm:$0xff] %v8938_v56  ;;  %316 = vbcast.lane.b32.xlu0 %v8312_v14, 264  ;;  %v1760_v60 = vsub.f32 %v8913_v46, %v12783_v34  ;;  %7421 = vmatprep.subr.bf16.mxu1 %v8919_v8  ;;  %v12392_v57 = vand.u32 4294901760, %v8938_v56  ;;  %v8952_v10 = vsub.f32 %v1393_v19, %v1520_v26  ;;  %v1376_v14 = vld [vmem:[%s8269_s24 + $0x70] sm:$0xff]  ;;  %v1377_v34 = vld [vmem:[%s8269_s24 + $0x78] sm:$0xff] }
 0x11f   : > { %v1635_v41 = vand.u32 4294901760, %v1634_v47  ;;  %v8956_v55 = vrot.slane %v927_v23, %v8725_v22  ;;  %v1754_v44 = vand.u32 4294901760, %v1753_v43  ;;  %v1641_v18 = vsub.f32 %v8927_v61, %v12390_v58 }
 0x120   : > { %v12784_v47 = vand.u32 4294901760, %v8930_v40  ;;  %v1761_v8 = vand.u32 4294901760, %v1760_v60  ;;  %v1767_v19 = vsub.f32 %v8938_v56, %v12392_v57  ;;  %v1773_v51 = vand.u32 4294901760, %v8952_v10 }
 0x121   : > { %v7454_v59 = vpack.c.bf16 %v1635_v41, %v1628_v4  ;;  %327 = vbcast.lane.b32.xlu1 %v8319_v16, 264  ;;  %v1642_v23 = vand.u32 4294901760, %v1641_v18  ;;  %v12785_v58 = vand.u32 4294901760, %v8829_v0  ;;  %v1472_v57 = vand.u32 4294901760, %v1377_v34 }
 0x122   : > { %v1648_v7 = vsub.f32 %v8930_v40, %v12784_v47  ;;  %338 = vbcast.lane.b32.xlu0 %v8314_v15, 264  ;;  %v1469_v47 = vand.u32 4294901760, %v1376_v14  ;;  %v7456_v41 = vpack.c.bf16 %v1761_v8, %v1754_v44  ;;  %v1768_v4 = vand.u32 4294901760, %v1767_v19 }
 0x123   : > { %v8973_v63 = vpack.c.bf16 %v1460_v12, %v12785_v58  ;;  %7455 = vmatpush3.bf16.msra.mxu0 %v7454_v59  ;;  %v1774_v60 = vsub.f32 %v8952_v10, %v1773_v51  ;;  %v12787_v15 = vand.u32 4294901760, %v8844_v13  ;;  %v8985_v0 = vpack.c.bf16 %v1466_v52, %v1463_v33 }
 0x124   : > { %v1649_v43 = vand.u32 4294901760, %v1648_v7  ;;  %v8979_v16 = vsub.f32 %v1376_v14, %v1469_v47  ;;  %v12788_v44 = vcombine.low %v8823_v36, %v8803_v62  ;;  %7457 = vmatprep.subr.bf16.mxu0 %v7456_v41  ;;  %v8993_v8 = vsub.f32 %v1377_v34, %v1472_v57 }
 0x125   : > { %7423 = vmatpush3.bf16.msra.mxu1 %v8973_v63  ;;  %v8983_v7 = vpack.c.bf16 %v1514_v39, %v12787_v15  ;;  %v1775_v12 = vand.u32 4294901760, %v1774_v60  ;;  %v8995_v18 = vpack.c.bf16 %v1520_v26, %v1517_v54  ;;  %349 = vbcast.lane.b32.xlu1 %v8321_v17, 264  ;;  %v12790_v13 = vcombine.low %v8820_v6, %v8800_v2  ;;  %v12828_v15 = vld [vmem:[#allocation17_spill] sm:$0xff] }
 0x126   : > { %v7458_v5 = vpack.c.bf16 %v1649_v43, %v1642_v23  ;;  %12786 = vst [vmem:[#allocation74_spill] sm:$0xff] %v8979_v16  ;;  %v8991_v59 = vrot.slane %v12788_v44, %v8725_v22  ;;  %12789 = vst [vmem:[#allocation75_spill] sm:$0xff] %v8993_v8  ;;  %360 = vbcast.lane.b32.xlu0 %v8327_v20, 264  ;;  %v1654_v33 = vand.u32 4294901760, %v8979_v16  ;;  %v1661_v58 = vand.u32 4294901760, %v8993_v8  ;;  %v12827_v44 = vld [vmem:[#allocation16_spill] sm:$0xff] }
 0x127   : > { %v9003_v39 = vrot.slane %v12790_v13, %v8725_v22  ;;  %v7460_v52 = vpack.c.bf16 %v1775_v12, %v1768_v4  ;;  %7425 = vmatprep.subr.bf16.mxu1 %v8983_v7  ;;  %v944_v17 = vcombine.high %v8797_v48, %v8790_v11  ;;  %v9014_v26 = vpack.c.bf16 %v1472_v57, %v1469_v47  ;;  %v12792_v12 = vld [vmem:[#allocation5_spill] sm:$0xff]  ;;  %v12829_v4 = vld [vmem:[#allocation18_spill] sm:$0xff] }
 0x128   : > { %7459 = vmatpush3.bf16.msra.mxu0 %v7458_v5  ;;  %v1655_v20 = vsub.f32 %v8979_v16, %v1654_v33  ;;  %v1662_v14 = vsub.f32 %v8993_v8, %v1661_v58  ;;  %v7464_v34 = vpack.c.bf16 %v8389_v50, %v8387_v49  ;;  %v912_v11 = vcombine.high %v8823_v36, %v8803_v62  ;;  %v12831_v5 = vld [vmem:[#allocation49_spill] sm:$0xff] }
 0x129   : > { %7427 = vmatpush3.bf16.msra.mxu1 %v8985_v0  ;;  %7461 = vmatprep.subr.bf16.mxu0 %v7460_v52  ;;  %v928_v19 = vcombine.high %v8826_v35, %v8807_v3  ;;  %v964_v23 = vcombine.high %v8991_v59, %v8850_v53  ;;  %v958_v43 = vrot.slane %v944_v17, %v8725_v22  ;;  %v12793_v13 = vand.u32 4294901760, %v8882_v37  ;;  %v12840_v16 = vld [vmem:[#allocation25_spill] sm:$0xff] }
 0x12a   : > { %7429 = vmatprep.subr.bf16.mxu1 %v8995_v18  ;;  %371 = vbcast.lane.b32.xlu1 %v8329_v21, 264  ;;  %v1656_v48 = vand.u32 4294901760, %v1655_v20  ;;  %v1663_v57 = vand.u32 4294901760, %v1662_v14  ;;  %v896_v62 = vcombine.high %v8820_v6, %v8800_v2  ;;  %v926_v21 = vrot.slane %v912_v11, %v8725_v22 }
 0x12b   : > { %382 = vbcast.lane.b32.xlu0 %v8335_v24, 264  ;;  %v960_v24 = vcombine.high %v9003_v39, %v8956_v55  ;;  %v942_v36 = vrot.slane %v928_v19, %v8725_v22  ;;  %v12794_v52 = vand.u32 4294901760, %v8890_v9  ;;  %v12802_v14 = vand.u32 4294901760, %v8938_v56 }
 0x12c   : > { %v7462_v47 = vpack.c.bf16 %v1663_v57, %v1656_v48  ;;  %v965_v3 = vcombine.low %v926_v21, %v958_v43  ;;  %v910_v2 = vrot.slane %v896_v62, %v8725_v22  ;;  %v966_v35 = vcombine.high %v926_v21, %v958_v43 }
 0x12d   : > { %7431 = vmatpush3.bf16.msra.mxu1 %v9014_v26  ;;  %v9069_v17 = vpack.c.bf16 %v12794_v52, %v12793_v13  ;;  %v9089_v11 = vpack.c.bf16 %v1661_v58, %v1654_v33  ;;  %v12807_v33 = vld [vmem:[#allocation67_spill] sm:$0xff]  ;;  %v12808_v58 = vld [vmem:[#allocation68_spill] sm:$0xff]  ;;  %v12844_v8 = vand.u32 4294901760, %v8389_v50 }
 0x12e   : > { %7465 = vmatprep.subr.bf16.mxu1 %v7464_v34  ;;  %393 = vbcast.lane.b32.xlu1 %v8337_v25, 264  ;;  %v961_v6 = vcombine.low %v910_v2, %v942_v36  ;;  %v962_v41 = vcombine.high %v910_v2, %v942_v36  ;;  %v9087_v34 = vpack.c.bf16 %v1773_v51, %v12802_v14 }
 0x12f   : > { %1267 = vrot.lane.b32.xlu0 %v964_v23, %s8225_s21  ;;  %7463 = vmatpush3.bf16.msra.mxu0 %v7462_v47  ;;  %12804 = vst [vmem:[#allocation78_spill] sm:$0xff] %v9089_v11  ;;  %v12805_v23 = vcombine.low %v8782_v42, %v8785_v45  ;;  %v12832_v11 = vld [vmem:[#allocation19_spill] sm:$0xff] }
 0x130   : > { %7497 = vmatprep.subr.bf16.mxu0 %v8455_v1  ;;  %12803 = vst [vmem:[#allocation77_spill] sm:$0xff] %v9087_v34  ;;  %v12843_v34 = vand.u32 4294901760, %v8387_v49 }
 0x132   : > { %1243 = vrot.lane.b32.xlu1 %v960_v24, %s8225_s21 }
 0x133   : > { %1275 = vrot.lane.b32.xlu0 %v965_v3, %s8226_s22  ;;  %v12809_v3 = vcombine.low %v12807_v33, %v12808_v58  ;;  %v12822_v33 = vld [vmem:[#allocation12_spill] sm:$0xff]  ;;  %v12823_v58 = vld [vmem:[#allocation14_spill] sm:$0xff] }
 0x136   : > { %1251 = vrot.lane.b32.xlu1 %v961_v6, %s8226_s22 }
 0x137   : > { %1283 = vrot.lane.b32.xlu0 %v966_v35, %s8227_s23 }
 0x13a   : > { %1259 = vrot.lane.b32.xlu1 %v962_v41, %s8227_s23 }
 0x13b   : > { %404 = vbcast.lane.b32.xlu0 %v8345_v27, 264  ;;  %v12791_v27 = vld [vmem:[#allocation4_spill] sm:$0xff] }
 0x13c   : > { %12795 = vst [vmem:[#allocation4_spill] sm:$0xff] %v9069_v17  ;;  %v12838_v17 = vld [vmem:[#allocation33_spill] sm:$0xff] }
 0x13e   : > { %415 = vbcast.lane.b32.xlu1 %v8347_v28, 264  ;;  %v12796_v28 = vand.u32 4294901760, %v8905_v38 }
 0x13f   : > { %426 = vbcast.lane.b32.xlu0 %v8351_v29, 264  ;;  %v12797_v29 = vand.u32 4294901760, %v8913_v46 }
 0x141   : > { %v9075_v20 = vpack.c.bf16 %v12797_v29, %v12796_v28  ;;  %v12814_v29 = vld [vmem:[#allocation13_spill] sm:$0xff] }
 0x142   : > { %437 = vbcast.lane.b32.xlu1 %v8353_v30, 264  ;;  %v12799_v30 = vand.u32 4294901760, %v8927_v61 }
 0x143   : > { %448 = vbcast.lane.b32.xlu0 %v8357_v31, 264  ;;  %12798 = vst [vmem:[#allocation5_spill] sm:$0xff] %v9075_v20  ;;  %v12800_v31 = vand.u32 4294901760, %v8930_v40  ;;  %v12837_v20 = vld [vmem:[#allocation31_spill] sm:$0xff] }
 0x146   : > { %459 = vbcast.lane.b32.xlu1 %v8359_v32, 264  ;;  %v9081_v32 = vpack.c.bf16 %v12800_v31, %v12799_v30  ;;  %v12815_v30 = vld [vmem:[#allocation15_spill] sm:$0xff] }
 0x147   : > { %470 = vbcast.lane.b32.xlu0 %v12791_v27, 264 }
 0x148   : > { %12801 = vst [vmem:[#allocation76_spill] sm:$0xff] %v9081_v32  ;;  %v12835_v32 = vld [vmem:[#allocation29_spill] sm:$0xff] }
 0x14a   : > { %481 = vbcast.lane.b32.xlu1 %v12792_v12, 264 }
 0x181   : > { %v1266_v48 = vpop.permute.xlu0 %1265 }
 0x182   : > { %v1344_v43 = vsel %vm1335_vm2, %v12805_v23, %v1266_v48  ;;  %v12816_v48 = vld [vmem:[#allocation6_spill] sm:$0xff]  ;;  %v12818_v23 = vld [vmem:[#allocation8_spill] sm:$0xff] }
 0x187   : > { %v1242_v57 = vpop.permute.xlu1 %1241  ;;  %v1274_v19 = vpop.permute.xlu0 %1273 }
 0x188   : > { %v1346_v47 = vsel %vm1338_vm3, %v1344_v43, %v1274_v19  ;;  %v1336_v36 = vsel %vm1335_vm2, %v12809_v3, %v1242_v57  ;;  %v12817_v57 = vld [vmem:[#allocation7_spill] sm:$0xff]  ;;  %v12819_v43 = vld [vmem:[#allocation9_spill] sm:$0xff]  ;;  %v7472_v3 = vpack.c.bf16 %v12823_v58, %v12822_v33 }
 0x189   : > { %v7466_v19 = vpack.c.bf16 %v12817_v57, %v12816_v48  ;;  %v12851_v56 = vand.u32 4294901760, %v12819_v43 }
 0x18b   : > { %v1250_v62 = vpop.permute.xlu1 %1249 }
 0x18c   : > { %v1282_v21 = vpop.permute.xlu0 %1281  ;;  %v1339_v2 = vsel %vm1338_vm3, %v1336_v36, %v1250_v62  ;;  %v12820_v62 = vld [vmem:[#allocation10_spill] sm:$0xff]  ;;  %v12824_v36 = vld [vmem:[#allocation47_spill] sm:$0xff] }
 0x18d   : > { %v1348_v51 = vsel %vm1341_vm4, %v1346_v47, %v1282_v21  ;;  %v7468_v47 = vpack.c.bf16 %v12819_v43, %v12818_v23  ;;  %v12821_v21 = vld [vmem:[#allocation11_spill] sm:$0xff]  ;;  %v12853_v49 = vand.u32 4294901760, %v12820_v62  ;;  %v12862_v43 = vand.u32 4294901760, %v12828_v15 }
 0x18e   : > { %v9097_v24 = vand.u32 4294901760, %v1348_v51  ;;  %v12854_v50 = vand.u32 4294901760, %v12821_v21 }
 0x18f   : > { %v1258_v42 = vpop.permute.xlu1 %1257 }
 0x190   : > { %12806 = vst [vmem:[#allocation79_spill] sm:$0xff] %v9097_v24  ;;  %v9105_v6 = vsub.f32 %v1348_v51, %v9097_v24  ;;  %v9107_v45 = vpop.permute.xlu0 %316  ;;  %1778 = vmatprep.mubr.f32.mxu0 %v9097_v24  ;;  %v1342_v35 = vsel %vm1341_vm4, %v1339_v2, %v1258_v42  ;;  %v7470_v51 = vpack.c.bf16 %v12821_v21, %v12820_v62  ;;  %v12839_v24 = vld [vmem:[#allocation46_spill] sm:$0xff]  ;;  %v12864_v21 = vand.u32 4294901760, %v12829_v4 }
 0x191   : > { %12810 = vst [vmem:[#allocation67_spill] sm:$0xff] %v9107_v45  ;;  %v9111_v41 = vand.u32 4294901760, %v1342_v35  ;;  %v664_v60 = vmul.f32 %v12839_v24, %v9107_v45  ;;  %v12847_v24 = vand.u32 4294901760, %v12816_v48  ;;  %v12848_v45 = vand.u32 4294901760, %v12817_v57 }
 0x192   : > { %v12394_v27 = vand.u32 4294901760, %v9105_v6  ;;  %v12859_v57 = vand.u32 4294901760, %v12823_v58 }
 0x193   : > { %12811 = vst [vmem:[#allocation68_spill] sm:$0xff] %v9111_v41  ;;  %v9115_v12 = vsub.f32 %v1342_v35, %v9111_v41  ;;  %v9117_v13 = vpop.permute.xlu1 %327  ;;  %1780 = vmatmul.mubr.f32.vlgmr.msra.gmra.mrb[2].mxu0 %v9111_v41  ;;  %v9167_v41 = vpack.c.bf16 %v12844_v8, %v12843_v34  ;;  %v9187_v8 = vpack.c.bf16 %v12854_v50, %v12853_v49  ;;  %v9215_v49 = vld [vmem:[%s8269_s24 + $0x188] sm:$0xff] }
 0x194   : > { %12812 = vst [vmem:[#allocation80_spill] sm:$0xff] %v9117_v13  ;;  %v9120_v52 = vpop.permute.xlu0 %338  ;;  %v1525_v28 = vsub.f32 %v9105_v6, %v12394_v27  ;;  %7499 = vmatpush3.bf16.msra.mxu0 %v12814_v29  ;;  %v12830_v27 = vld [vmem:[#allocation21_spill] sm:$0xff]  ;;  %12868 = vst [vmem:[#allocation18_spill] sm:$0xff] %v9215_v49 }
 0x195   : > { %12813 = vst [vmem:[#allocation81_spill] sm:$0xff] %v9120_v52  ;;  %7501 = vmatprep.subr.bf16.mxu0 %v12815_v30  ;;  %v12398_v14 = vand.u32 4294901760, %v9115_v12  ;;  %v668_v2 = vmul.f32 %v12824_v36, %v9120_v52  ;;  %v12833_v36 = vld [vmem:[#allocation23_spill] sm:$0xff]  ;;  %v12834_v52 = vld [vmem:[#allocation24_spill] sm:$0xff]  ;;  %12845 = vst [vmem:[#allocation7_spill] sm:$0xff] %v9167_v41 }
 0x196   : > { %v1526_v31 = vand.u32 4294901760, %v1525_v28  ;;  %12855 = vst [vmem:[#allocation10_spill] sm:$0xff] %v9187_v8 }
 0x197   : > { %v9138_v42 = vpop.permute.xlu1 %349  ;;  %v1531_v28 = vsub.f32 %v9115_v12, %v12398_v14  ;;  %v12846_v14 = vld [vmem:[#allocation45_spill] sm:$0xff]  ;;  %v968_v34 = vcombine.high %v664_v60, %v668_v2  ;;  %v967_v58 = vcombine.low %v664_v60, %v668_v2  ;;  %v12877_v2 = vld [vmem:[#allocation32_spill] sm:$0xff] }
 0x198   : > { %12825 = vst [vmem:[#allocation13_spill] sm:$0xff] %v9138_v42  ;;  %v9140_v35 = vpop.permute.xlu0 %360  ;;  %1527 = vmatprep.mubr.f32.mxu1 %v1526_v31  ;;  %v670_v54 = vmul.f32 %v12831_v5, %v9138_v42  ;;  %7503 = vmatpush3.bf16.msra.mxu0 %v12832_v11  ;;  %v12836_v31 = vld [vmem:[#allocation30_spill] sm:$0xff]  ;;  %v12842_v42 = vld [vmem:[#allocation36_spill] sm:$0xff]  ;;  %v666_v30 = vmul.f32 %v12846_v14, %v9117_v13 }
 0x199   : > { %12826 = vst [vmem:[#allocation6_spill] sm:$0xff] %v9140_v35  ;;  %7505 = vmatprep.subr.bf16.mxu0 %v12840_v16  ;;  %v1532_v25 = vand.u32 4294901760, %v1531_v28  ;;  %v12841_v5 = vld [vmem:[#allocation34_spill] sm:$0xff]  ;;  %v9175_v16 = vpack.c.bf16 %v12848_v45, %v12847_v24  ;;  %v12850_v28 = vand.u32 4294901760, %v12818_v23  ;;  %v12858_v45 = vand.u32 4294901760, %v12822_v33  ;;  %v12875_v13 = vld [vmem:[#allocation48_spill] sm:$0xff] }
 0x19a   : > { %v12865_v24 = vand.u32 4294901760, %v12830_v27  ;;  %v9218_v33 = vld [vmem:[%s8269_s24 + $0x100] sm:$0xff]  ;;  %v984_v50 = vcombine.high %v666_v30, %v670_v54 }
 0x19b   : > { %12849 = vst [vmem:[#allocation8_spill] sm:$0xff] %v9175_v16  ;;  %v9181_v11 = vpack.c.bf16 %v12851_v56, %v12850_v28  ;;  %1533 = vmatmul.mubr.f32.vlgmr.msra.gmra.mrb[0].mxu1 %v1532_v25  ;;  %v9197_v23 = vpack.c.bf16 %v12859_v57, %v12858_v45  ;;  %v12861_v56 = vand.u32 4294901760, %v12827_v44  ;;  %v9212_v25 = vld [vmem:[%s8269_s24 + $0x180] sm:$0xff]  ;;  %12869 = vst [vmem:[#allocation21_spill] sm:$0xff] %v9218_v33  ;;  %v12870_v45 = vld [vmem:[#allocation28_spill] sm:$0xff]  ;;  %v12871_v57 = vand.u32 4294901760, %v12833_v36 }
 0x19c   : > { %v9189_v14 = vpop.permute.xlu1 %371  ;;  %v9209_v28 = vpack.c.bf16 %v12865_v24, %v12864_v21  ;;  %12867 = vst [vmem:[#allocation17_spill] sm:$0xff] %v9212_v25  ;;  %7467 = vmatpush3.bf16.msra.mxu1 %v7466_v19  ;;  %7507 = vmatpush3.bf16.msra.mxu0 %v12870_v45  ;;  %v9228_v21 = vld [vmem:[%s8269_s24 + $0x108] sm:$0xff]  ;;  %v983_v24 = vcombine.low %v666_v30, %v670_v54  ;;  %v12878_v19 = vand.u32 4294901760, %v12835_v32  ;;  %v9245_v30 = vld [vmem:[%s8269_s24 + $0x190] sm:$0xff] }
 0x19d   : > { %12852 = vst [vmem:[#allocation9_spill] sm:$0xff] %v9181_v11  ;;  %12856 = vst [vmem:[#allocation11_spill] sm:$0xff] %v9189_v14  ;;  %v9191_v48 = vpop.permute.xlu0 %382  ;;  %v9203_v62 = vpack.c.bf16 %v12862_v43, %v12861_v56  ;;  %v12872_v56 = vand.u32 4294901760, %v12834_v52  ;;  %7469 = vmatprep.subr.bf16.mxu1 %v7468_v47  ;;  %7509 = vmatprep.subr.bf16.mxu0 %v12877_v2  ;;  %v12884_v54 = vld [vmem:[#allocation51_spill] sm:$0xff] }
 0x19e   : > { %12857 = vst [vmem:[#allocation12_spill] sm:$0xff] %v9191_v48  ;;  %12860 = vst [vmem:[#allocation14_spill] sm:$0xff] %v9197_v23  ;;  %v12879_v23 = vand.u32 4294901760, %v12836_v31 }
 0x19f   : > { %12863 = vst [vmem:[#allocation47_spill] sm:$0xff] %v9203_v62  ;;  %12866 = vst [vmem:[#allocation16_spill] sm:$0xff] %v9209_v28  ;;  %v9225_v43 = vpack.c.bf16 %v12872_v56, %v12871_v57  ;;  %v672_v28 = vmul.f32 %v12875_v13, %v9140_v35  ;;  %v12876_v62 = vld [vmem:[#allocation50_spill] sm:$0xff]  ;;  %v9248_v13 = vld [vmem:[%s8269_s24 + $0x198] sm:$0xff]  ;;  %v674_v56 = vmul.f32 %v12884_v54, %v9189_v14 }
 0x1a0   : > { %12874 = vst [vmem:[#allocation23_spill] sm:$0xff] %v9228_v21  ;;  %v676_v60 = vmul.f32 %v12876_v62, %v9191_v48  ;;  %v9239_v8 = vpack.c.bf16 %v12879_v23, %v12878_v19  ;;  %12881 = vst [vmem:[#allocation29_spill] sm:$0xff] %v9245_v30  ;;  %v12882_v62 = vld [vmem:[#allocation55_spill] sm:$0xff]  ;;  %v12885_v57 = vld [vmem:[#allocation52_spill] sm:$0xff]  ;;  %7471 = vmatpush3.bf16.msra.mxu1 %v7470_v51 }
 0x1a1   : > { %12873 = vst [vmem:[#allocation49_spill] sm:$0xff] %v9225_v43  ;;  %v9251_v47 = vrot.slane %v968_v34, %v12882_v62  ;;  %v9253_v43 = vpop.permute.xlu1 %393  ;;  %v1268_v2 = vpop.permute.xlu0 %1267  ;;  %v9257_v19 = vrot.slane %v984_v50, %v12882_v62  ;;  %v12886_v34 = vld [vmem:[#allocation69_spill] sm:$0xff]  ;;  %7473 = vmatprep.subr.bf16.mxu1 %v7472_v3  ;;  %v12887_v23 = vld [vmem:[#allocation70_spill] sm:$0xff]  ;;  %v9276_v14 = vld [vmem:[%s8269_s24 + $0x110] sm:$0xff]  ;;  %v12890_v50 = vand.u32 4294901760, %v9215_v49 }
 0x1a2   : > { %12880 = vst [vmem:[#allocation24_spill] sm:$0xff] %v9239_v8  ;;  %v999_v48 = vcombine.low %v672_v28, %v676_v60  ;;  %v1000_v35 = vcombine.high %v672_v28, %v676_v60  ;;  %12883 = vst [vmem:[#allocation30_spill] sm:$0xff] %v9253_v43  ;;  %v678_v8 = vmul.f32 %v12885_v57, %v9253_v43  ;;  %7511 = vmatpush3.bf16.msra.mxu0 %v12886_v34 }
 0x1a3   : > { %v9265_v28 = vrot.slane %v967_v58, %v12882_v62  ;;  %v9268_v60 = vrot.slane %v983_v24, %v12882_v62  ;;  %7513 = vmatprep.subr.bf16.mxu0 %v12887_v23  ;;  %v12888_v24 = vand.u32 4294901760, %v9212_v25  ;;  %v9286_v11 = vsub.f32 %v9215_v49, %v12890_v50  ;;  %v12897_v49 = vld [vmem:[#allocation71_spill] sm:$0xff] }
 0x1a4   : > { %v1007_v54 = vrot.slane %v999_v48, %v12882_v62  ;;  %v1014_v51 = vrot.slane %v1000_v35, %v12882_v62  ;;  %v1015_v57 = vcombine.low %v674_v56, %v678_v8  ;;  %v1016_v43 = vcombine.high %v674_v56, %v678_v8 }
 0x1a5   : > { %v1244_v58 = vpop.permute.xlu1 %1243  ;;  %v1276_v34 = vpop.permute.xlu0 %1275  ;;  %v9281_v3 = vsub.f32 %v9212_v25, %v12888_v24  ;;  %12891 = vst [vmem:[#allocation33_spill] sm:$0xff] %v9286_v11  ;;  %v12892_v48 = vand.u32 4294901760, %v9218_v33  ;;  %v12894_v8 = vand.u32 4294901760, %v9228_v21  ;;  %v1047_v23 = vcombine.low %v9251_v47, %v9257_v19 }
 0x1a6   : > { %v1023_v24 = vrot.slane %v1015_v57, %v12882_v62  ;;  %v1030_v25 = vrot.slane %v1016_v43, %v12882_v62  ;;  %v12896_v50 = vpack.c.bf16 %v12828_v15, %v12827_v44  ;;  %7515 = vmatpush3.bf16.msra.mxu0 %v12897_v49  ;;  %v12900_v57 = vand.u32 4294901760, %v9245_v30 }
 0x1a7   : > { %12889 = vst [vmem:[#allocation31_spill] sm:$0xff] %v9281_v3  ;;  %v9291_v35 = vsub.f32 %v9218_v33, %v12892_v48  ;;  %v9296_v56 = vsub.f32 %v9228_v21, %v12894_v8  ;;  %v9307_v48 = vld [vmem:[%s8269_s24 + $0x118] sm:$0xff]  ;;  %v1031_v33 = vcombine.low %v9265_v28, %v9268_v60  ;;  %v12898_v8 = vpack.c.bf16 %v12830_v27, %v12829_v4  ;;  %v12899_v21 = vld [vmem:[#allocation72_spill] sm:$0xff] }
 0x1a8   : > { %7475 = vmatpush3.bf16.msra.mxu1 %v12896_v50  ;;  %7517 = vmatprep.subr.bf16.mxu0 %v12899_v21  ;;  %v9318_v43 = vsub.f32 %v9245_v30, %v12900_v57  ;;  %v12902_v15 = vand.u32 4294901760, %v9248_v13  ;;  %v1063_v49 = vcombine.low %v1007_v54, %v1023_v24  ;;  %v1079_v45 = vcombine.low %v1014_v51, %v1030_v25 }
 0x1a9   : > { %12893 = vst [vmem:[#allocation46_spill] sm:$0xff] %v9291_v35  ;;  %12895 = vst [vmem:[#allocation34_spill] sm:$0xff] %v9296_v56  ;;  %7477 = vmatprep.subr.bf16.mxu1 %v12898_v8  ;;  %v1080_v16 = vcombine.high %v1014_v51, %v1030_v25  ;;  %v12904_v4 = vcombine.low %v8991_v59, %v8850_v53  ;;  %v1048_v8 = vcombine.high %v9251_v47, %v9257_v19  ;;  %v1252_v21 = vpop.permute.xlu1 %1251  ;;  %v1284_v41 = vpop.permute.xlu0 %1283 }
 0x1aa   : > { %12901 = vst [vmem:[#allocation36_spill] sm:$0xff] %v9318_v43  ;;  %v9323_v44 = vsub.f32 %v9248_v13, %v12902_v15  ;;  %v1064_v57 = vcombine.high %v1007_v54, %v1023_v24  ;;  %v12421_v15 = vand.u32 4294901760, %v9307_v48  ;;  %v12905_v50 = vpack.c.bf16 %v12834_v52, %v12833_v36  ;;  %7519 = vmatpush3.bf16.msra.mxu0 %v8973_v63 }
 0x1ab   : > { %v1345_v27 = vsel %vm1335_vm2, %v12904_v4, %v1268_v2  ;;  %v9340_v59 = vrot.slane %v1047_v23, %v8725_v22  ;;  %v9343_v25 = vrot.slane %v1079_v45, %v8725_v22  ;;  %v12418_v2 = vand.u32 4294901760, %v9281_v3  ;;  %7521 = vmatprep.subr.bf16.mxu0 %v8983_v7 }
 0x1ac   : > { %12903 = vst [vmem:[#allocation45_spill] sm:$0xff] %v9323_v44  ;;  %v1347_v30 = vsel %vm1338_vm3, %v1345_v27, %v1276_v34  ;;  %7479 = vmatpush3.bf16.msra.mxu1 %v12905_v50  ;;  %v1032_v47 = vcombine.high %v9265_v28, %v9268_v60  ;;  %v12908_v52 = vpack.c.bf16 %v12836_v31, %v12835_v32  ;;  %v12416_v54 = vand.u32 4294901760, %v9286_v11  ;;  %v12933_v32 = vld [vmem:[#allocation59_spill] sm:$0xff] }
 0x1ad   : > { %v1349_v53 = vsel %vm1341_vm4, %v1347_v30, %v1284_v41  ;;  %12906 = vst [vmem:[#allocation48_spill] sm:$0xff] %v9340_v59  ;;  %12907 = vst [vmem:[#allocation50_spill] sm:$0xff] %v9343_v25  ;;  %v9355_v41 = vrot.slane %v1031_v33, %v8725_v22  ;;  %v9358_v36 = vrot.slane %v1063_v49, %v8725_v22  ;;  %v1260_v49 = vpop.permute.xlu1 %1259  ;;  %v12417_v51 = vand.u32 4294901760, %v9291_v35 }
 0x1ae   : > { %v9348_v19 = vand.u32 4294901760, %v1349_v53  ;;  %7481 = vmatprep.subr.bf16.mxu1 %v12908_v52  ;;  %v12911_v45 = vcombine.low %v9003_v39, %v8956_v55  ;;  %v1100_v23 = vcombine.high %v9340_v59, %v9343_v25  ;;  %v9367_v34 = vrot.slane %v1080_v16, %v8725_v22  ;;  %v9377_v39 = vpop.permute.xlu0 %404  ;;  %7523 = vmatpush3.bf16.msra.mxu0 %v8985_v0  ;;  %v12978_v25 = vld [vmem:[#allocation69_spill] sm:$0xff] }
 0x1af   : > { %12909 = vst [vmem:[#allocation51_spill] sm:$0xff] %v9355_v41  ;;  %12910 = vst [vmem:[#allocation52_spill] sm:$0xff] %v9358_v36  ;;  %v1096_v55 = vcombine.high %v9355_v41, %v9358_v36  ;;  %v1078_v28 = vrot.slane %v1064_v57, %v8725_v22  ;;  %v1062_v60 = vrot.slane %v1048_v8, %v8725_v22  ;;  %7525 = vmatprep.subr.bf16.mxu0 %v8995_v18  ;;  %v12975_v36 = vld [vmem:[#allocation10_spill] sm:$0xff]  ;;  %v9723_v59 = vld [vmem:[%s8269_s24 + $0x178] sm:$0xff] }
 0x1b0   : > { %v1337_v30 = vsel %vm1335_vm2, %v12911_v45, %v1244_v58  ;;  %v9373_v33 = vsub.f32 %v1349_v53, %v9348_v19  ;;  %12912 = vst [vmem:[#allocation82_spill] sm:$0xff] %v9377_v39  ;;  %1785 = vmatprep.mubr.f32.mxu0 %v9348_v19  ;;  %1313 = vrot.lane.b32.xlu0 %v1100_v23, %s8225_s21  ;;  %v12915_v57 = vand.u32 4294901760, %v12837_v20  ;;  %v12916_v53 = vand.u32 4294901760, %v12838_v17  ;;  %v9665_v41 = vld [vmem:[%s8269_s24 + $0x1e0] sm:$0xff] }
 0x1b1   : > { %v1340_v31 = vsel %vm1338_vm3, %v1337_v30, %v1252_v21  ;;  %v12913_v21 = vpack.c.bf16 %v12838_v17, %v12837_v20  ;;  %1289 = vrot.lane.b32.xlu1 %v1096_v55, %s8225_s21  ;;  %v1046_v24 = vrot.slane %v1032_v47, %v8725_v22  ;;  %v12914_v27 = vpack.c.bf16 %v12842_v42, %v12841_v5 }
 0x1b2   : > { %v1343_v16 = vsel %vm1341_vm4, %v1340_v31, %v1260_v49  ;;  %v1539_v50 = vand.u32 4294901760, %v9373_v33  ;;  %v1101_v8 = vcombine.low %v1062_v60, %v9367_v34  ;;  %v9406_v52 = vpack.c.bf16 %v12916_v53, %v12915_v57  ;;  %v9417_v31 = vpop.permute.xlu1 %415  ;;  %v9420_v20 = vpop.permute.xlu0 %426  ;;  %7527 = vmatpush3.bf16.msra.mxu0 %v9014_v26  ;;  %12987 = vst [vmem:[#allocation69_spill] sm:$0xff] %v9723_v59 }
 0x1b3   : > { %7483 = vmatpush3.bf16.msra.mxu1 %v12913_v21  ;;  %v9389_v58 = vand.u32 4294901760, %v1343_v16  ;;  %v12420_v47 = vand.u32 4294901760, %v9296_v56  ;;  %v12917_v45 = vand.u32 4294901760, %v9276_v14  ;;  %12919 = vst [vmem:[#allocation84_spill] sm:$0xff] %v9417_v31  ;;  %v1097_v49 = vcombine.low %v1046_v24, %v1078_v28  ;;  %12920 = vst [vmem:[#allocation85_spill] sm:$0xff] %v9420_v20  ;;  %7561 = vmatprep.subr.bf16.mxu0 %v8455_v1 }
 0x1b4   : > { %7485 = vmatprep.subr.bf16.mxu1 %v12914_v27  ;;  %v1540_v17 = vsub.f32 %v9373_v33, %v1539_v50  ;;  %v12419_v55 = vand.u32 4294901760, %v9318_v43  ;;  %1321 = vrot.lane.b32.xlu0 %v1101_v8, %s8226_s22  ;;  %v12921_v21 = vpack.c.bf16 %v8890_v9, %v8882_v37  ;;  %v12923_v27 = vand.u32 4294901760, %v12842_v42 }
 0x1b5   : > { %v9412_v30 = vsub.f32 %v9276_v14, %v12917_v45  ;;  %v9415_v23 = vsub.f32 %v1343_v16, %v9389_v58  ;;  %1787 = vmatmul.mubr.f32.gmra.mrb[4].mxu0 %v9389_v58  ;;  %v12922_v16 = vand.u32 4294901760, %v12841_v5  ;;  %v9437_v53 = vsub.f32 %v9281_v3, %v12418_v2  ;;  %1297 = vrot.lane.b32.xlu1 %v1097_v49, %s8226_s22  ;;  %v12926_v49 = vld [vmem:[#allocation62_spill] sm:$0xff]  ;;  %v12989_v3 = vld [vmem:[#allocation16_spill] sm:$0xff] }
 0x1b6   : > { %v12422_v45 = vand.u32 4294901760, %v9323_v44  ;;  %v9443_v8 = vsub.f32 %v9307_v48, %v12421_v15  ;;  %v1541_v37 = vand.u32 4294901760, %v1540_v17  ;;  %v9451_v42 = vsub.f32 %v9286_v11, %v12416_v54  ;;  %v9474_v2 = vpop.permute.xlu1 %437  ;;  %v9477_v4 = vpop.permute.xlu0 %448  ;;  %v12988_v11 = vld [vmem:[#allocation71_spill] sm:$0xff] }
 0x1b7   : > { %12918 = vst [vmem:[#allocation83_spill] sm:$0xff] %v9412_v30  ;;  %7487 = vmatpush3.bf16.msra.mxu1 %v12921_v21  ;;  %v9432_v57 = vpack.c.bf16 %v12923_v27, %v12922_v16  ;;  %v1545_v9 = vand.u32 4294901760, %v9415_v23  ;;  %v9456_v5 = vsub.f32 %v9291_v35, %v12417_v51  ;;  %v12925_v21 = vand.u32 4294901760, %v9105_v6  ;;  %v9472_v51 = vld [vmem:[%s8269_s24 + $0x1a0] sm:$0xff]  ;;  %12928 = vst [vmem:[#allocation62_spill] sm:$0xff] %v9474_v2 }
 0x1b8   : > { %12924 = vst [vmem:[#allocation86_spill] sm:$0xff] %v9443_v8  ;;  %v684_v17 = vmul.f32 %v12926_v49, %v9420_v20  ;;  %v12927_v16 = vpack.c.bf16 %v8913_v46, %v8905_v38  ;;  %v1102_v27 = vcombine.high %v1062_v60, %v9367_v34  ;;  %v9469_v54 = vsub.f32 %v9296_v56, %v12420_v47  ;;  %v9487_v60 = vld [vmem:[%s8269_s24 + $0x1a8] sm:$0xff]  ;;  %v9490_v49 = vld [vmem:[%s8269_s24 + $0x120] sm:$0xff] }
 0x1b9   : > { %2038 = vmatprep.mubr.f32.mxu0 %v12925_v21  ;;  %v1098_v21 = vcombine.high %v1046_v24, %v1078_v28  ;;  %12929 = vst [vmem:[#allocation87_spill] sm:$0xff] %v9477_v4  ;;  %1542 = vmatprep.mubr.f32.mxu1 %v1541_v37  ;;  %v1546_v38 = vsub.f32 %v9415_v23, %v1545_v9  ;;  %v12931_v28 = vld [vmem:[#allocation58_spill] sm:$0xff]  ;;  %v2588_v15 = vand.u32 4294901760, %v9437_v53  ;;  %v9516_v47 = vld [vmem:[%s8269_s24 + $0x128] sm:$0xff] }
 0x1ba   : > { %7489 = vmatprep.subr.bf16.mxu1 %v12927_v16  ;;  %v9483_v46 = vsub.f32 %v9318_v43, %v12419_v55  ;;  %v12930_v16 = vld [vmem:[#allocation57_spill] sm:$0xff]  ;;  %v686_v24 = vmul.f32 %v12931_v28, %v9474_v2  ;;  %1329 = vrot.lane.b32.xlu0 %v1102_v27, %s8227_s23  ;;  %v12932_v37 = vpack.c.bf16 %v8930_v40, %v8927_v61  ;;  %v12934_v28 = vand.u32 4294901760, %v9115_v12  ;;  %v9519_v34 = vpop.permute.xlu1 %459  ;;  %v12945_v2 = vld [vmem:[#allocation75_spill] sm:$0xff]  ;;  %v12946_v20 = vld [vmem:[#allocation74_spill] sm:$0xff] }
 0x1bb   : > { %v680_v1 = vmul.f32 %v12930_v16, %v9377_v39  ;;  %v9503_v55 = vsub.f32 %v9323_v44, %v12422_v45  ;;  %v682_v16 = vmul.f32 %v12933_v32, %v9417_v31  ;;  %1305 = vrot.lane.b32.xlu1 %v1098_v21, %s8227_s23  ;;  %v1547_v27 = vand.u32 4294901760, %v1546_v38  ;;  %12935 = vst [vmem:[#allocation57_spill] sm:$0xff] %v9516_v47  ;;  %v12937_v38 = vld [vmem:[#allocation73_spill] sm:$0xff]  ;;  %v12959_v39 = vld [vmem:[#allocation66_spill] sm:$0xff]  ;;  %v9644_v43 = vld [vmem:[%s8269_s24 + $0x150] sm:$0xff] }
 0x1bc   : > { %7491 = vmatpush3.bf16.msra.mxu1 %v12932_v37  ;;  %2042 = vmatmul.mubr.f32.vlgmr.msra.gmra.mrb[6].mxu0 %v12934_v28  ;;  %12936 = vst [vmem:[#allocation58_spill] sm:$0xff] %v9519_v34  ;;  %v12938_v53 = vpack.c.bf16 %v8952_v10, %v12937_v38  ;;  %v12939_v28 = vld [vmem:[#allocation15_spill] sm:$0xff]  ;;  %v12942_v61 = vld [vmem:[#allocation65_spill] sm:$0xff]  ;;  %v12947_v31 = vpack.c.bf16 %v12945_v2, %v12946_v20  ;;  %12972 = vst [vmem:[#allocation66_spill] sm:$0xff] %v9644_v43 }
 0x1bd   : > { %v1103_v40 = vcombine.low %v680_v1, %v684_v17  ;;  %v1104_v37 = vcombine.high %v680_v1, %v684_v17  ;;  %7563 = vmatpush3.bf16.msra.mxu0 %v12814_v29  ;;  %2049 = vmatprep.mubr.f32.mxu0 %v1539_v50  ;;  %v1120_v21 = vcombine.high %v682_v16, %v686_v24  ;;  %v9525_v17 = vpop.permute.xlu0 %470  ;;  %v2595_v29 = vand.u32 4294901760, %v9451_v42  ;;  %v12944_v42 = vld [vmem:[#allocation60_spill] sm:$0xff]  ;;  %v12951_v2 = vld [vmem:[#allocation19_spill] sm:$0xff] }
 0x1be   : > { %7493 = vmatprep.subr.bf16.mxu1 %v12938_v53  ;;  %7565 = vmatprep.subr.bf16.mxu0 %v12939_v28  ;;  %12940 = vst [vmem:[#allocation59_spill] sm:$0xff] %v9525_v17  ;;  %v12941_v1 = vand.u32 4294901760, %v9412_v30  ;;  %v1119_v32 = vcombine.low %v682_v16, %v686_v24  ;;  %v692_v10 = vmul.f32 %v12942_v61, %v9525_v17  ;;  %v9539_v28 = vld [vmem:[%s8269_s24 + $0x1b0] sm:$0xff]  ;;  %v12948_v24 = vand.u32 4294901760, %v9443_v8 }
 0x1bf   : > { %1548 = vmatmul.mubr.f32.gmra.mrb[2].mxu1 %v1547_v27  ;;  %12943 = vst [vmem:[#allocation73_spill] sm:$0xff] %v9539_v28  ;;  %v688_v50 = vmul.f32 %v12944_v42, %v9477_v4  ;;  %v12949_v27 = vand.u32 4294901760, %v9472_v51  ;;  %v9558_v53 = vrot.slane %v1103_v40, %v12882_v62  ;;  %v9561_v42 = vrot.slane %v1104_v37, %v12882_v62  ;;  %v12956_v37 = vld [vmem:[#allocation79_spill] sm:$0xff] }
 0x1c0   : > { %v9532_v45 = vsub.f32 %v9412_v30, %v12941_v1  ;;  %7495 = vmatpush3.bf16.msra.mxu1 %v12947_v31  ;;  %2053 = vmatmul.mubr.f32.gmra.mrb[8].mxu0 %v1545_v9  ;;  %v9549_v16 = vsub.f32 %v9443_v8, %v12948_v24  ;;  %v12952_v31 = vand.u32 4294901760, %v9487_v60  ;;  %v12953_v9 = vand.u32 4294901760, %v9490_v49  ;;  %v9582_v1 = vpop.permute.xlu1 %481  ;;  %v12960_v8 = vld [vmem:[#allocation7_spill] sm:$0xff] }
 0x1c1   : > { %v9554_v61 = vsub.f32 %v9472_v51, %v12949_v27  ;;  %7567 = vmatpush3.bf16.msra.mxu0 %v12951_v2  ;;  %v9575_v27 = vld [vmem:[%s8269_s24 + $0x1b8] sm:$0xff]  ;;  %v9578_v40 = vrot.slane %v1120_v21, %v12882_v62  ;;  %1922 = vmatprep.mubr.f32.mxu1 %v9105_v6  ;;  %v1135_v2 = vcombine.low %v688_v50, %v692_v10 }
 0x1c2   : > { %v9567_v20 = vsub.f32 %v9487_v60, %v12952_v31  ;;  %v9572_v24 = vsub.f32 %v9490_v49, %v12953_v9  ;;  %12955 = vst [vmem:[#allocation60_spill] sm:$0xff] %v9575_v27  ;;  %2330 = vmatprep.mubr.f32.mxu0 %v12956_v37  ;;  %v1136_v38 = vcombine.high %v688_v50, %v692_v10  ;;  %12957 = vst [vmem:[#allocation75_spill] sm:$0xff] %v9582_v1  ;;  %v12958_v9 = vld [vmem:[#allocation61_spill] sm:$0xff]  ;;  %v9596_v10 = vld [vmem:[%s8269_s24 + $0x130] sm:$0xff] }
 0x1c3   : > { %12950 = vst [vmem:[#allocation15_spill] sm:$0xff] %v9554_v61  ;;  %v9586_v17 = vrot.slane %v1119_v32, %v12882_v62  ;;  %v690_v4 = vmul.f32 %v12958_v9, %v9519_v34  ;;  %v694_v21 = vmul.f32 %v12959_v39, %v9582_v1  ;;  %7529 = vmatprep.subr.bf16.mxu1 %v12960_v8  ;;  %v12961_v6 = vld [vmem:[#allocation25_spill] sm:$0xff]  ;;  %v12962_v39 = vand.u32 4294901760, %v9516_v47  ;;  %v12964_v34 = vld [vmem:[#allocation8_spill] sm:$0xff] }
 0x1c4   : > { %12954 = vst [vmem:[#allocation65_spill] sm:$0xff] %v9572_v24  ;;  %7569 = vmatprep.subr.bf16.mxu0 %v12961_v6  ;;  %v9599_v32 = vrot.slane %v1135_v2, %v12882_v62  ;;  %1925 = vmatmul.mubr.f32.vlgmr.msra.gmra.mrb[4].mxu1 %v9115_v12  ;;  %v9602_v9 = vpack.c.bf16 %v2595_v29, %v2588_v15  ;;  %v12965_v2 = vld [vmem:[#allocation28_spill] sm:$0xff]  ;;  %v9615_v15 = vld [vmem:[%s8269_s24 + $0x138] sm:$0xff]  ;;  %v9618_v29 = vld [vmem:[%s8269_s24 + $0x1c0] sm:$0xff] }
 0x1c5   : > { %v9607_v31 = vsub.f32 %v9516_v47, %v12962_v39  ;;  %v1150_v6 = vrot.slane %v1136_v38, %v12882_v62  ;;  %v1151_v50 = vcombine.low %v690_v4, %v694_v21  ;;  %v1152_v1 = vcombine.high %v690_v4, %v694_v21  ;;  %7531 = vmatpush3.bf16.msra.mxu1 %v12964_v34  ;;  %v9621_v39 = vld [vmem:[%s8269_s24 + $0x1d0] sm:$0xff]  ;;  %v12967_v4 = vld [vmem:[#allocation9_spill] sm:$0xff] }
 0x1c6   : > { %7571 = vmatpush3.bf16.msra.mxu0 %v12965_v2  ;;  %12966 = vst [vmem:[#allocation19_spill] sm:$0xff] %v9621_v39  ;;  %v1183_v8 = vcombine.low %v9561_v42, %v9578_v40  ;;  %1931 = vmatprep.mubr.f32.mxu1 %v9373_v33  ;;  %v12968_v38 = vand.u32 4294901760, %v9539_v28  ;;  %v9635_v12 = vld [vmem:[%s8269_s24 + $0x1d8] sm:$0xff]  ;;  %v1167_v30 = vcombine.low %v9558_v53, %v9586_v17  ;;  %12977 = vst [vmem:[#allocation8_spill] sm:$0xff] %v9665_v41  ;;  %v12992_v47 = vld [vmem:[#allocation72_spill] sm:$0xff] }
 0x1c7   : > { %12963 = vst [vmem:[#allocation74_spill] sm:$0xff] %v9607_v31  ;;  %7533 = vmatprep.subr.bf16.mxu1 %v12967_v4  ;;  %12970 = vst [vmem:[#allocation61_spill] sm:$0xff] %v9635_v12  ;;  %v1159_v44 = vrot.slane %v1151_v50, %v12882_v62  ;;  %v1166_v33 = vrot.slane %v1152_v1, %v12882_v62  ;;  %v12971_v4 = vld [vmem:[#allocation32_spill] sm:$0xff]  ;;  %v9654_v50 = vld [vmem:[%s8269_s24 + $0x1c8] sm:$0xff]  ;;  %v1184_v56 = vcombine.high %v9561_v42, %v9578_v40 }
 0x1c8   : > { %v9631_v21 = vsub.f32 %v9539_v28, %v12968_v38  ;;  %7573 = vmatprep.subr.bf16.mxu0 %v12971_v4  ;;  %1934 = vmatmul.mubr.f32.gmra.mrb[6].mxu1 %v9415_v23  ;;  %v12973_v38 = vand.u32 4294901760, %v9575_v27  ;;  %v12980_v23 = vld [vmem:[#allocation14_spill] sm:$0xff]  ;;  %v12986_v40 = vld [vmem:[#allocation47_spill] sm:$0xff] }
 0x1c9   : > { %v1199_v34 = vcombine.low %v9599_v32, %v1159_v44  ;;  %v1215_v62 = vcombine.low %v1150_v6, %v1166_v33  ;;  %v1216_v35 = vcombine.high %v1150_v6, %v1166_v33  ;;  %7535 = vmatpush3.bf16.msra.mxu1 %v12975_v36  ;;  %v1200_v1 = vcombine.high %v9599_v32, %v1159_v44  ;;  %v9677_v33 = vld [vmem:[%s8269_s24 + $0x1e8] sm:$0xff]  ;;  %v12981_v4 = vld [vmem:[#allocation70_spill] sm:$0xff]  ;;  %v9710_v6 = vld [vmem:[%s8269_s24 + $0x1f8] sm:$0xff] }
 0x1ca   : > { %12969 = vst [vmem:[#allocation79_spill] sm:$0xff] %v9631_v21  ;;  %v9650_v2 = vsub.f32 %v9575_v27, %v12973_v38  ;;  %v9662_v38 = vld [vmem:[%s8269_s24 + $0x158] sm:$0xff]  ;;  %7575 = vmatpush3.bf16.msra.mxu0 %v12978_v25  ;;  %2219 = vmatprep.mubr.f32.mxu1 %v12956_v37  ;;  %v9673_v36 = vrot.slane %v1183_v8, %v8725_v22  ;;  %v9692_v37 = vld [vmem:[%s8269_s24 + $0x160] sm:$0xff]  ;;  %v12985_v8 = vand.u32 4294901760, %v9621_v39 }
 0x1cb   : > { %12976 = vst [vmem:[#allocation25_spill] sm:$0xff] %v9662_v38  ;;  %7537 = vmatprep.subr.bf16.mxu1 %v12980_v23  ;;  %7577 = vmatprep.subr.bf16.mxu0 %v12981_v4  ;;  %v9682_v44 = vrot.slane %v1215_v62, %v8725_v22  ;;  %v9685_v25 = vrot.slane %v1167_v30, %v8725_v22  ;;  %v9704_v23 = vld [vmem:[%s8269_s24 + $0x168] sm:$0xff]  ;;  %v9720_v4 = vld [vmem:[%s8269_s24 + $0x170] sm:$0xff] }
 0x1cc   : > { %12974 = vst [vmem:[#allocation7_spill] sm:$0xff] %v9650_v2  ;;  %12979 = vst [vmem:[#allocation28_spill] sm:$0xff] %v9673_v36  ;;  %v9688_v42 = vrot.slane %v1199_v34, %v8725_v22  ;;  %v1168_v32 = vcombine.high %v9558_v53, %v9586_v17  ;;  %v9699_v62 = vsub.f32 %v9621_v39, %v12985_v8  ;;  %v9707_v34 = vld [vmem:[%s8269_s24 + $0x1f0] sm:$0xff]  ;;  %v12990_v39 = vand.u32 4294901760, %v9635_v12 }
 0x1cd   : > { %12982 = vst [vmem:[#allocation9_spill] sm:$0xff] %v9682_v44  ;;  %12983 = vst [vmem:[#allocation32_spill] sm:$0xff] %v9685_v25  ;;  %7539 = vmatpush3.bf16.msra.mxu1 %v12986_v40  ;;  %v1236_v17 = vcombine.high %v9673_v36, %v9682_v44  ;;  %v1230_v8 = vrot.slane %v1216_v35, %v8725_v22  ;;  %v1214_v40 = vrot.slane %v1200_v1, %v8725_v22  ;;  %v12994_v1 = vld [vmem:[#allocation49_spill] sm:$0xff]  ;;  %v13019_v36 = vld [vmem:[#allocation18_spill] sm:$0xff] }
 0x1ce   : > { %12984 = vst [vmem:[#allocation10_spill] sm:$0xff] %v9688_v42  ;;  %v1232_v53 = vcombine.high %v9685_v25, %v9688_v42  ;;  %7579 = vmatpush3.bf16.msra.mxu0 %v12988_v11  ;;  %7541 = vmatprep.subr.bf16.mxu1 %v12989_v3  ;;  %v9731_v27 = vsub.f32 %v9635_v12, %v12990_v39  ;;  %v12991_v35 = vand.u32 4294901760, %v9644_v43  ;;  %v9743_v3 = vld [vmem:[%s8269_s24 + $0x140] sm:$0xff]  ;;  %v12995_v12 = vand.u32 4294901760, %v9665_v41 }
 0x1cf   : > { %7581 = vmatprep.subr.bf16.mxu0 %v12992_v47  ;;  %1315 = vrot.lane.b32.xlu0 %v1236_v17, %s8225_s21  ;;  %v1198_v11 = vrot.slane %v1184_v56, %v8725_v22  ;;  %v12993_v47 = vand.u32 4294901760, %v9662_v38  ;;  %v12999_v56 = vld [vmem:[#allocation24_spill] sm:$0xff]  ;;  %v13006_v42 = vand.u32 4294901760, %v9596_v10  ;;  %v12473_v25 = vand.u32 4294901760, %v9631_v21 }
 0x1d0   : > { %v9736_v30 = vsub.f32 %v9644_v43, %v12991_v35  ;;  %1291 = vrot.lane.b32.xlu1 %v1232_v53, %s8225_s21  ;;  %v1182_v35 = vrot.slane %v1168_v32, %v8725_v22  ;;  %v9751_v43 = vld [vmem:[%s8269_s24 + $0x148] sm:$0xff]  ;;  %v9764_v53 = vsub.f32 %v9665_v41, %v12995_v12  ;;  %v12997_v32 = vand.u32 4294901760, %v9677_v33 }
 0x1d1   : > { %v9756_v17 = vsub.f32 %v9662_v38, %v12993_v47  ;;  %7543 = vmatpush3.bf16.msra.mxu1 %v12994_v1  ;;  %v1237_v39 = vcombine.low %v1198_v11, %v1230_v8  ;;  %v13000_v38 = vand.u32 4294901760, %v9692_v37  ;;  %v13002_v47 = vand.u32 4294901760, %v9707_v34 }
 0x1d2   : > { %12996 = vst [vmem:[#allocation14_spill] sm:$0xff] %v9764_v53  ;;  %v9769_v22 = vsub.f32 %v9677_v33, %v12997_v32  ;;  %7583 = vmatpush3.bf16.msra.mxu0 %v8973_v63  ;;  %7545 = vmatprep.subr.bf16.mxu1 %v12999_v56  ;;  %v1233_v28 = vcombine.low %v1182_v35, %v1214_v40  ;;  %v13001_v63 = vand.u32 4294901760, %v9704_v23 }
 0x1d3   : > { %v9779_v12 = vsub.f32 %v9692_v37, %v13000_v38  ;;  %7585 = vmatprep.subr.bf16.mxu0 %v8983_v7  ;;  %1323 = vrot.lane.b32.xlu0 %v1237_v39, %s8226_s22  ;;  %v9794_v1 = vsub.f32 %v9707_v34, %v13002_v47  ;;  %v13003_v38 = vand.u32 4294901760, %v9710_v6  ;;  %v13004_v7 = vand.u32 4294901760, %v9720_v4 }
 0x1d4   : > { %12998 = vst [vmem:[#allocation70_spill] sm:$0xff] %v9769_v22  ;;  %v9789_v56 = vsub.f32 %v9704_v23, %v13001_v63  ;;  %1299 = vrot.lane.b32.xlu1 %v1233_v28, %s8226_s22  ;;  %v13005_v63 = vand.u32 4294901760, %v9723_v59  ;;  %v13015_v28 = vand.u32 4294901760, %v9456_v5  ;;  %v13026_v5 = vand.u32 4294901760, %v9483_v46 }
 0x1d5   : > { %v9799_v41 = vsub.f32 %v9710_v6, %v13003_v38  ;;  %v9805_v39 = vsub.f32 %v9720_v4, %v13004_v7  ;;  %7547 = vmatpush3.bf16.msra.mxu1 %v9406_v52  ;;  %v1238_v38 = vcombine.high %v1198_v11, %v1230_v8  ;;  %v9829_v52 = vsub.f32 %v9596_v10, %v13006_v42  ;;  %v13014_v7 = vld [vmem:[#allocation4_spill] sm:$0xff] }
 0x1d6   : > { %v9810_v32 = vsub.f32 %v9723_v59, %v13005_v63  ;;  %7587 = vmatpush3.bf16.msra.mxu0 %v8985_v0  ;;  %7549 = vmatprep.subr.bf16.mxu1 %v9432_v57  ;;  %v1234_v63 = vcombine.high %v1182_v35, %v1214_v40  ;;  %v2490_v11 = vand.u32 4294901760, %v9532_v45  ;;  %v13007_v0 = vand.u32 4294901760, %v9615_v15 }
 0x1d7   : > { %7589 = vmatprep.subr.bf16.mxu0 %v8995_v18  ;;  %1331 = vrot.lane.b32.xlu0 %v1238_v38, %s8227_s23  ;;  %v13008_v40 = vand.u32 4294901760, %v9618_v29  ;;  %v13010_v42 = vand.u32 4294901760, %v9654_v50  ;;  %v13012_v18 = vand.u32 4294901760, %v9554_v61  ;;  %v13013_v38 = vand.u32 4294901760, %v9567_v20 }
 0x1d8   : > { %v9839_v57 = vsub.f32 %v9615_v15, %v13007_v0  ;;  %1307 = vrot.lane.b32.xlu1 %v1234_v63, %s8227_s23  ;;  %v13017_v63 = vld [vmem:[#allocation17_spill] sm:$0xff]  ;;  %v13020_v59 = vand.u32 4294901760, %v13019_v36  ;;  %v13027_v36 = vand.u32 4294901760, %v9503_v55 }
 0x1d9   : > { %v9844_v35 = vsub.f32 %v9618_v29, %v13008_v40  ;;  %v9849_v8 = vsub.f32 %v9654_v50, %v13010_v42  ;;  %v2615_v45 = vsub.f32 %v9554_v61, %v13012_v18  ;;  %v2622_v0 = vsub.f32 %v9567_v20, %v13013_v38  ;;  %7551 = vmatpush3.bf16.msra.mxu1 %v13014_v7  ;;  %v13037_v55 = vld [vmem:[#allocation77_spill] sm:$0xff] }
 0x1da   : > { %v13016_v42 = vand.u32 4294901760, %v9469_v54  ;;  %v13018_v44 = vand.u32 4294901760, %v13017_v63  ;;  %v13021_v61 = vand.u32 4294901760, %v9743_v3  ;;  %v13023_v40 = vand.u32 4294901760, %v9751_v43  ;;  %7591 = vmatpush3.bf16.msra.mxu0 %v9014_v26  ;;  %v13025_v54 = vld [vmem:[#allocation5_spill] sm:$0xff] }
 0x1db   : > { %13009 = vst [vmem:[#allocation47_spill] sm:$0xff] %v9844_v35  ;;  %13011 = vst [vmem:[#allocation71_spill] sm:$0xff] %v9849_v8  ;;  %7553 = vmatprep.subr.bf16.mxu1 %v13025_v54  ;;  %7625 = vmatprep.subr.bf16.mxu0 %v9602_v9  ;;  %v2616_v54 = vand.u32 4294901760, %v2615_v45  ;;  %v13032_v9 = vld [vmem:[#allocation76_spill] sm:$0xff]  ;;  %v13033_v26 = vld [vmem:[#allocation21_spill] sm:$0xff] }
 0x1dc   : > { %v7626_v47 = vpack.c.bf16 %v13016_v42, %v13015_v28  ;;  %v9869_v18 = vpack.c.bf16 %v13020_v59, %v13018_v44  ;;  %v9874_v38 = vsub.f32 %v9743_v3, %v13021_v61  ;;  %v9879_v7 = vsub.f32 %v9751_v43, %v13023_v40 }
 0x1dd   : > { %v7628_v59 = vpack.c.bf16 %v13027_v36, %v13026_v5  ;;  %v2497_v44 = vand.u32 4294901760, %v9549_v16  ;;  %v13028_v28 = vand.u32 4294901760, %v9572_v24  ;;  %v13029_v42 = vand.u32 4294901760, %v9607_v31  ;;  %7555 = vmatpush3.bf16.msra.mxu1 %v13032_v9 }
 0x1de   : > { %13022 = vst [vmem:[#allocation16_spill] sm:$0xff] %v9874_v38  ;;  %13024 = vst [vmem:[#allocation72_spill] sm:$0xff] %v9879_v7  ;;  %v2623_v16 = vand.u32 4294901760, %v2622_v0  ;;  %v2629_v5 = vsub.f32 %v9631_v21, %v12473_v25  ;;  %v13030_v36 = vand.u32 4294901760, %v9650_v2  ;;  %v13034_v63 = vand.u32 4294901760, %v13033_v26  ;;  %7557 = vmatprep.subr.bf16.mxu1 %v13037_v55 }
 0x1df   : > { %v2503_v61 = vsub.f32 %v9572_v24, %v13028_v28  ;;  %v2510_v40 = vsub.f32 %v9607_v31, %v13029_v42  ;;  %v13031_v42 = vld [vmem:[#allocation68_spill] sm:$0xff]  ;;  %v13035_v31 = vld [vmem:[#allocation23_spill] sm:$0xff]  ;;  %v13040_v25 = vand.u32 4294901760, %v9844_v35  ;;  %v13041_v55 = vand.u32 4294901760, %v9849_v8 }
 0x1e0   : > { %v2636_v28 = vsub.f32 %v9650_v2, %v13030_v36  ;;  %2332 = vmatmul.mubr.f32.vlgmr.msra.gmra.mrb[10].mxu0 %v13031_v42  ;;  %v13036_v46 = vand.u32 4294901760, %v13035_v31  ;;  %v7630_v36 = vpack.c.bf16 %v2497_v44, %v2490_v11  ;;  %v13038_v31 = vand.u32 4294901760, %v9829_v52 }
 0x1e1   : > { %2337 = vmatprep.mubr.f32.mxu0 %v9348_v19  ;;  %v2504_v2 = vand.u32 4294901760, %v2503_v61  ;;  %v2511_v21 = vand.u32 4294901760, %v2510_v40  ;;  %7627 = vmatpush3.bf16.msra.mxu0 %v7626_v47  ;;  %v2643_v0 = vsub.f32 %v9844_v35, %v13040_v25  ;;  %v2650_v11 = vsub.f32 %v9849_v8, %v13041_v55  ;;  %v13042_v61 = vld [vmem:[#allocation29_spill] sm:$0xff] }
 0x1e2   : > { %v9911_v24 = vpack.c.bf16 %v13036_v46, %v13034_v63  ;;  %v2517_v26 = vsub.f32 %v9829_v52, %v13038_v31  ;;  %v13039_v63 = vand.u32 4294901760, %v9839_v57  ;;  %7629 = vmatprep.subr.bf16.mxu0 %v7628_v59  ;;  %v7632_v44 = vpack.c.bf16 %v2623_v16, %v2616_v54 }
 0x1e3   : > { %v13043_v47 = vand.u32 4294901760, %v13042_v61  ;;  %v13044_v40 = vand.u32 4294901760, %v9248_v13  ;;  %v2630_v31 = vand.u32 4294901760, %v2629_v5  ;;  %v2637_v45 = vand.u32 4294901760, %v2636_v28 }
 0x1e4   : > { %v2524_v46 = vsub.f32 %v9839_v57, %v13039_v63  ;;  %2339 = vmatmul.mubr.f32.gmra.mrb[12].mxu0 %v9389_v58  ;;  %v13045_v63 = vld [vmem:[#allocation78_spill] sm:$0xff]  ;;  %v13046_v25 = vand.u32 4294901760, %v9874_v38  ;;  %v13047_v55 = vand.u32 4294901760, %v9879_v7  ;;  %v13048_v54 = vand.u32 4294901760, %v9699_v62 }
 0x1e5   : > { %v9935_v9 = vpack.c.bf16 %v13044_v40, %v13043_v47  ;;  %7559 = vmatpush3.bf16.msra.mxu1 %v13045_v63  ;;  %v7634_v16 = vpack.c.bf16 %v2511_v21, %v2504_v2  ;;  %v13049_v5 = vand.u32 4294901760, %v9731_v27  ;;  %v2544_v61 = vand.u32 4294901760, %v9736_v30  ;;  %7631 = vmatpush3.bf16.msra.mxu0 %v7630_v36 }
 0x1e6   : > { %v2531_v35 = vsub.f32 %v9874_v38, %v13046_v25  ;;  %v2538_v59 = vsub.f32 %v9879_v7, %v13047_v55  ;;  %v2657_v13 = vsub.f32 %v9699_v62, %v13048_v54  ;;  %7593 = vmatprep.subr.bf16.mxu1 %v9869_v18  ;;  %v2551_v47 = vand.u32 4294901760, %v9756_v17  ;;  %7633 = vmatprep.subr.bf16.mxu0 %v7632_v44 }
 0x1e7   : > { %v2664_v28 = vsub.f32 %v9731_v27, %v13049_v5  ;;  %v2518_v40 = vand.u32 4294901760, %v2517_v26  ;;  %v2525_v63 = vand.u32 4294901760, %v2524_v46  ;;  %v2644_v25 = vand.u32 4294901760, %v2643_v0 }
 0x1e8   : > { %v2651_v55 = vand.u32 4294901760, %v2650_v11  ;;  %2221 = vmatmul.mubr.f32.vlgmr.msra.gmra.mrb[8].mxu1 %v13031_v42  ;;  %v7636_v54 = vpack.c.bf16 %v2637_v45, %v2630_v31  ;;  %v13050_v7 = vand.u32 4294901760, %v9276_v14  ;;  %v13051_v21 = vand.u32 4294901760, %v9307_v48 }
 0x1e9   : > { %v2670_v5 = vand.u32 4294901760, %v9764_v53  ;;  %v2677_v38 = vand.u32 4294901760, %v9769_v22  ;;  %2226 = vmatprep.mubr.f32.mxu1 %v9348_v19  ;;  %7595 = vmatpush3.bf16.msra.mxu1 %v9911_v24  ;;  %v13052_v0 = vand.u32 4294901760, %v9472_v51  ;;  %v13053_v42 = vand.u32 4294901760, %v9487_v60 }
 0x1ea   : > { %v9959_v2 = vpack.c.bf16 %v13051_v21, %v13050_v7  ;;  %v2532_v45 = vand.u32 4294901760, %v2531_v35  ;;  %v2539_v14 = vand.u32 4294901760, %v2538_v59  ;;  %v2658_v26 = vand.u32 4294901760, %v2657_v13  ;;  %7597 = vmatprep.subr.bf16.mxu1 %v9935_v9  ;;  %7635 = vmatpush3.bf16.msra.mxu0 %v7634_v16  ;;  %v13055_v16 = vld [vmem:[#allocation57_spill] sm:$0xff] }
 0x1eb   : > { %v9969_v36 = vpack.c.bf16 %v13053_v42, %v13052_v0  ;;  %v2665_v48 = vand.u32 4294901760, %v2664_v28  ;;  %v2545_v7 = vsub.f32 %v9736_v30, %v2544_v61  ;;  %v2552_v46 = vsub.f32 %v9756_v17, %v2551_v47  ;;  %7637 = vmatprep.subr.bf16.mxu0 %v7636_v54 }
 0x1ec   : > { %v2558_v19 = vand.u32 4294901760, %v9779_v12  ;;  %v7638_v11 = vpack.c.bf16 %v2525_v63, %v2518_v40  ;;  %v7640_v44 = vpack.c.bf16 %v2651_v55, %v2644_v25  ;;  %v2565_v51 = vand.u32 4294901760, %v9789_v56  ;;  %2228 = vmatmul.mubr.f32.gmra.mrb[10].mxu1 %v9389_v58  ;;  %v13057_v25 = vld [vmem:[#allocation73_spill] sm:$0xff]  ;;  %v13059_v55 = vld [vmem:[#allocation60_spill] sm:$0xff] }
 0x1ed   : > { %v2671_v60 = vsub.f32 %v9764_v53, %v2670_v5  ;;  %v2678_v35 = vsub.f32 %v9769_v22, %v2677_v38  ;;  %v2684_v31 = vand.u32 4294901760, %v9794_v1  ;;  %v2691_v59 = vand.u32 4294901760, %v9799_v41  ;;  %7599 = vmatpush3.bf16.msra.mxu1 %v9959_v2 }
 0x1ee   : > { %v13054_v13 = vand.u32 4294901760, %v9490_v49  ;;  %v13056_v28 = vand.u32 4294901760, %v13055_v16  ;;  %v7642_v63 = vpack.c.bf16 %v2539_v14, %v2532_v45  ;;  %v13058_v58 = vand.u32 4294901760, %v13057_v25  ;;  %7601 = vmatprep.subr.bf16.mxu1 %v9969_v36  ;;  %7639 = vmatpush3.bf16.msra.mxu0 %v7638_v11 }
 0x1ef   : > { %v13060_v54 = vand.u32 4294901760, %v13059_v55  ;;  %v7644_v0 = vpack.c.bf16 %v2665_v48, %v2658_v26  ;;  %v2546_v42 = vand.u32 4294901760, %v2545_v7  ;;  %v2553_v53 = vand.u32 4294901760, %v2552_v46  ;;  %7641 = vmatprep.subr.bf16.mxu0 %v7640_v44 }
 0x1f0   : > { %v9986_v40 = vpack.c.bf16 %v13056_v28, %v13054_v13  ;;  %v2559_v22 = vsub.f32 %v9779_v12, %v2558_v19  ;;  %v2566_v49 = vsub.f32 %v9789_v56, %v2565_v51  ;;  %v2572_v13 = vand.u32 4294901760, %v9805_v39 }
 0x1f1   : > { %v9992_v21 = vpack.c.bf16 %v13060_v54, %v13058_v58  ;;  %v2579_v45 = vand.u32 4294901760, %v9810_v32  ;;  %v13061_v14 = vand.u32 4294901760, %v9699_v62  ;;  %v13062_v16 = vand.u32 4294901760, %v9731_v27 }
 0x1f2   : > { %v2672_v25 = vand.u32 4294901760, %v2671_v60  ;;  %v2679_v26 = vand.u32 4294901760, %v2678_v35  ;;  %v2685_v48 = vsub.f32 %v9794_v1, %v2684_v31  ;;  %v2692_v7 = vsub.f32 %v9799_v41, %v2691_v59  ;;  %7603 = vmatpush3.bf16.msra.mxu1 %v9986_v40  ;;  %7643 = vmatpush3.bf16.msra.mxu0 %v7642_v63 }
 0x1f3   : > { %v10003_v28 = vpack.c.bf16 %v13062_v16, %v13061_v14  ;;  %v13064_v46 = vand.u32 4294901760, %v9596_v10  ;;  %v13065_v11 = vand.u32 4294901760, %v9615_v15  ;;  %v10014_v55 = vpack.c.bf16 %v2551_v47, %v2544_v61  ;;  %7605 = vmatprep.subr.bf16.mxu1 %v9992_v21  ;;  %7645 = vmatprep.subr.bf16.mxu0 %v7644_v0 }
 0x1f4   : > { %v7646_v54 = vpack.c.bf16 %v2553_v53, %v2546_v42  ;;  %v13067_v44 = vand.u32 4294901760, %v9618_v29  ;;  %v13068_v60 = vand.u32 4294901760, %v9654_v50  ;;  %v2560_v14 = vand.u32 4294901760, %v2559_v22  ;;  %v13072_v22 = vld [vmem:[#allocation19_spill] sm:$0xff]  ;;  %v13074_v42 = vld [vmem:[#allocation61_spill] sm:$0xff] }
 0x1f5   : > { %13063 = vst [vmem:[#allocation49_spill] sm:$0xff] %v10003_v28  ;;  %v10012_v58 = vpack.c.bf16 %v13065_v11, %v13064_v46  ;;  %13066 = vst [vmem:[#allocation24_spill] sm:$0xff] %v10014_v55  ;;  %v2567_v16 = vand.u32 4294901760, %v2566_v49  ;;  %v2573_v10 = vsub.f32 %v9805_v39, %v2572_v13  ;;  %v2580_v15 = vsub.f32 %v9810_v32, %v2579_v45  ;;  %v13122_v55 = vld [vmem:[#allocation10_spill] sm:$0xff] }
 0x1f6   : > { %v10021_v35 = vpack.c.bf16 %v13068_v60, %v13067_v44  ;;  %v10025_v46 = vpack.c.bf16 %v2677_v38, %v2670_v5  ;;  %v7648_v61 = vpack.c.bf16 %v2679_v26, %v2672_v25  ;;  %v2686_v47 = vand.u32 4294901760, %v2685_v48  ;;  %7647 = vmatpush3.bf16.msra.mxu0 %v7646_v54  ;;  %v13081_v44 = vld [vmem:[#allocation25_spill] sm:$0xff] }
 0x1f7   : > { %v2693_v11 = vand.u32 4294901760, %v2692_v7  ;;  %7607 = vmatpush3.bf16.msra.mxu1 %v10012_v58  ;;  %v13070_v29 = vand.u32 4294901760, %v9743_v3  ;;  %v13071_v50 = vand.u32 4294901760, %v9751_v43  ;;  %v13073_v63 = vand.u32 4294901760, %v13072_v22  ;;  %v13079_v3 = vld [vmem:[#allocation66_spill] sm:$0xff] }
 0x1f8   : > { %13069 = vst [vmem:[#allocation4_spill] sm:$0xff] %v10025_v46  ;;  %7609 = vmatprep.subr.bf16.mxu1 %v10021_v35  ;;  %v13075_v49 = vand.u32 4294901760, %v13074_v42  ;;  %v10041_v5 = vpack.c.bf16 %v2565_v51, %v2558_v19  ;;  %v7650_v0 = vpack.c.bf16 %v2567_v16, %v2560_v14  ;;  %v2574_v25 = vand.u32 4294901760, %v2573_v10  ;;  %7649 = vmatprep.subr.bf16.mxu0 %v7648_v61  ;;  %v13084_v19 = vld [vmem:[#allocation8_spill] sm:$0xff] }
 0x1f9   : > { %v10032_v53 = vpack.c.bf16 %v13071_v50, %v13070_v29  ;;  %v2581_v26 = vand.u32 4294901760, %v2580_v15  ;;  %v10043_v48 = vpack.c.bf16 %v2691_v59, %v2684_v31  ;;  %v7652_v43 = vpack.c.bf16 %v2693_v11, %v2686_v47  ;;  %v13095_v11 = vld [vmem:[#allocation31_spill] sm:$0xff]  ;;  %v13096_v50 = vld [vmem:[#allocation33_spill] sm:$0xff] }
 0x1fa   : > { %v10039_v38 = vpack.c.bf16 %v13075_v49, %v13073_v63  ;;  %13077 = vst [vmem:[#allocation18_spill] sm:$0xff] %v10041_v5  ;;  %v13080_v7 = vand.u32 4294901760, %v13079_v3  ;;  %v13082_v60 = vand.u32 4294901760, %v13081_v44  ;;  %v13085_v51 = vand.u32 4294901760, %v13084_v19  ;;  %7651 = vmatpush3.bf16.msra.mxu0 %v7650_v0  ;;  %v13097_v49 = vld [vmem:[#allocation48_spill] sm:$0xff]  ;;  %v13098_v0 = vld [vmem:[#allocation50_spill] sm:$0xff] }
 0x1fb   : > { %13078 = vst [vmem:[#allocation5_spill] sm:$0xff] %v10043_v48  ;;  %7611 = vmatpush3.bf16.msra.mxu1 %v10032_v53  ;;  %v13086_v54 = vand.u32 4294901760, %v9677_v33  ;;  %v10059_v31 = vpack.c.bf16 %v2579_v45, %v2572_v13  ;;  %v7654_v59 = vpack.c.bf16 %v2581_v26, %v2574_v25  ;;  %7653 = vmatprep.subr.bf16.mxu0 %v7652_v43  ;;  %v13088_v16 = vand.u32 4294901760, %v9692_v37  ;;  %v13093_v37 = vld [vmem:[#allocation69_spill] sm:$0xff]  ;;  %v13100_v26 = vld [vmem:[#allocation51_spill] sm:$0xff]  ;;  %v13101_v43 = vld [vmem:[#allocation52_spill] sm:$0xff] }
 0x1fc   : > { %13076 = vst [vmem:[#allocation17_spill] sm:$0xff] %v10039_v38  ;;  %v10050_v29 = vpack.c.bf16 %v13082_v60, %v13080_v7  ;;  %7613 = vmatprep.subr.bf16.mxu1 %v10039_v38  ;;  %v13089_v10 = vand.u32 4294901760, %v9704_v23  ;;  %v13090_v61 = vand.u32 4294901760, %v9707_v34  ;;  %v13091_v33 = vand.u32 4294901760, %v9710_v6  ;;  %v13119_v5 = vld [vmem:[#allocation9_spill] sm:$0xff] }
 0x1fd   : > { %v10057_v14 = vpack.c.bf16 %v13086_v54, %v13085_v51  ;;  %13087 = vst [vmem:[#allocation76_spill] sm:$0xff] %v10059_v31  ;;  %v13092_v13 = vand.u32 4294901760, %v9720_v4  ;;  %v13094_v45 = vand.u32 4294901760, %v13093_v37  ;;  %v7656_v34 = vpack.c.bf16 %v13096_v50, %v13095_v11  ;;  %v13117_v31 = vld [vmem:[#allocation72_spill] sm:$0xff] }
 0x1fe   : > { %13083 = vst [vmem:[#allocation68_spill] sm:$0xff] %v10050_v29  ;;  %v10066_v15 = vpack.c.bf16 %v13089_v10, %v13088_v16  ;;  %v10073_v47 = vpack.c.bf16 %v13091_v33, %v13090_v61  ;;  %7655 = vmatpush3.bf16.msra.mxu0 %v7654_v59  ;;  %v13099_v25 = vcombine.low %v13097_v49, %v13098_v0  ;;  %v13106_v0 = vld [vmem:[#allocation36_spill] sm:$0xff] }
 0x1ff   : > { %7615 = vmatpush3.bf16.msra.mxu1 %v10050_v29  ;;  %7689 = vmatprep.subr.bf16.mxu0 %v9869_v18  ;;  %v10081_v23 = vpack.c.bf16 %v13094_v45, %v13092_v13  ;;  %v13102_v3 = vcombine.low %v13100_v26, %v13101_v43  ;;  %v13108_v26 = vld [vmem:[#allocation83_spill] sm:$0xff]  ;;  %v13109_v43 = vld [vmem:[#allocation86_spill] sm:$0xff] }
 0x200   : > { %7617 = vmatprep.subr.bf16.mxu1 %v10057_v14 }
 0x203   : > { %7619 = vmatpush3.bf16.msra.mxu1 %v10066_v15 }
 0x204   : > { %7621 = vmatprep.subr.bf16.mxu1 %v10073_v47 }
 0x207   : > { %7623 = vmatpush3.bf16.msra.mxu1 %v10081_v23 }
 0x208   : > { %7657 = vmatprep.subr.bf16.mxu1 %v7656_v34 }
 0x222   : > { %v1314_v6 = vpop.permute.xlu0 %1313 }
 0x223   : > { %v1290_v22 = vpop.permute.xlu1 %1289  ;;  %v1356_v4 = vsel %vm1335_vm2, %v13099_v25, %v1314_v6  ;;  %v13107_v25 = vld [vmem:[#allocation45_spill] sm:$0xff] }
 0x224   : > { %v1350_v7 = vsel %vm1335_vm2, %v13102_v3, %v1290_v22  ;;  %v13104_v22 = vld [vmem:[#allocation46_spill] sm:$0xff]  ;;  %v7662_v3 = vpack.c.bf16 %v13109_v43, %v13108_v26 }
 0x226   : > { %v1322_v63 = vpop.permute.xlu0 %1321 }
 0x227   : > { %v1298_v42 = vpop.permute.xlu1 %1297  ;;  %v1358_v44 = vsel %vm1338_vm3, %v1356_v4, %v1322_v63  ;;  %v13105_v63 = vld [vmem:[#allocation34_spill] sm:$0xff]  ;;  %v7660_v4 = vpack.c.bf16 %v13107_v25, %v13106_v0 }
 0x228   : > { %v1352_v19 = vsel %vm1338_vm3, %v1350_v7, %v1298_v42  ;;  %v7658_v42 = vpack.c.bf16 %v13105_v63, %v13104_v22  ;;  %v13110_v7 = vld [vmem:[#allocation15_spill] sm:$0xff] }
 0x22c   : > { %v1330_v60 = vpop.permute.xlu0 %1329 }
 0x22d   : > { %v1360_v51 = vsel %vm1341_vm4, %v1358_v44, %v1330_v60  ;;  %v1306_v54 = vpop.permute.xlu1 %1305  ;;  %v7664_v44 = vpack.c.bf16 %v9567_v20, %v13110_v7  ;;  %v13111_v60 = vld [vmem:[#allocation65_spill] sm:$0xff] }
 0x22e   : > { %v10098_v59 = vand.u32 4294901760, %v1360_v51  ;;  %v1354_v16 = vsel %vm1341_vm4, %v1352_v19, %v1306_v54  ;;  %v13112_v19 = vld [vmem:[#allocation74_spill] sm:$0xff]  ;;  %v13113_v54 = vld [vmem:[#allocation79_spill] sm:$0xff] }
 0x22f   : > { %v10101_v10 = vand.u32 4294901760, %v1354_v16 }
 0x230   : > { %v10104_v61 = vsub.f32 %v1360_v51, %v10098_v59  ;;  %2696 = vmatprep.mubr.f32.mxu0 %v10098_v59  ;;  %v7666_v51 = vpack.c.bf16 %v13112_v19, %v13111_v60 }
 0x231   : > { %13103 = vst [vmem:[#allocation21_spill] sm:$0xff] %v10101_v10  ;;  %v10108_v33 = vsub.f32 %v1354_v16, %v10101_v10  ;;  %2698 = vmatmul.mubr.f32.vlgmr.msra.gmra.mrb[14].mxu0 %v10101_v10  ;;  %v13114_v16 = vld [vmem:[#allocation7_spill] sm:$0xff] }
 0x232   : > { %7691 = vmatpush3.bf16.msra.mxu0 %v9911_v24  ;;  %v2442_v13 = vand.u32 4294901760, %v10104_v61 }
 0x233   : > { %v12486_v37 = vand.u32 4294901760, %v10108_v33  ;;  %7693 = vmatprep.subr.bf16.mxu0 %v9935_v9 }
 0x234   : > { %v2443_v45 = vsub.f32 %v10104_v61, %v2442_v13 }
 0x235   : > { %v2449_v34 = vsub.f32 %v10108_v33, %v12486_v37  ;;  %v13116_v37 = vld [vmem:[#allocation16_spill] sm:$0xff] }
 0x236   : > { %7695 = vmatpush3.bf16.msra.mxu0 %v9959_v2  ;;  %v2444_v6 = vand.u32 4294901760, %v2443_v45  ;;  %v7668_v45 = vpack.c.bf16 %v13114_v16, %v13113_v54  ;;  %v7674_v48 = vpack.c.bf16 %v13117_v31, %v13116_v37 }
 0x237   : > { %v2450_v49 = vand.u32 4294901760, %v2449_v34  ;;  %7697 = vmatprep.subr.bf16.mxu0 %v9969_v36 }
 0x238   : > { %2445 = vmatprep.mubr.f32.mxu1 %v2444_v6 }
 0x239   : > { %2451 = vmatmul.mubr.f32.vlgmr.msra.gmra.mrb[12].mxu1 %v2450_v49  ;;  %v13115_v49 = vld [vmem:[#allocation47_spill] sm:$0xff] }
 0x23a   : > { %7659 = vmatpush3.bf16.msra.mxu1 %v7658_v42  ;;  %7699 = vmatpush3.bf16.msra.mxu0 %v9986_v40  ;;  %v7670_v42 = vpack.c.bf16 %v9839_v57, %v9829_v52 }
 0x23b   : > { %7661 = vmatprep.subr.bf16.mxu1 %v7660_v4  ;;  %7701 = vmatprep.subr.bf16.mxu0 %v9992_v21  ;;  %v7672_v4 = vpack.c.bf16 %v9849_v8, %v13115_v49 }
 0x23e   : > { %7663 = vmatpush3.bf16.msra.mxu1 %v7662_v3  ;;  %7703 = vmatpush3.bf16.msra.mxu0 %v10012_v58 }
 0x23f   : > { %7665 = vmatprep.subr.bf16.mxu1 %v7664_v44  ;;  %7705 = vmatprep.subr.bf16.mxu0 %v10021_v35 }
 0x241   : > { %v1316_v34 = vpop.permute.xlu0 %1315 }
 0x242   : > { %v1292_v6 = vpop.permute.xlu1 %1291  ;;  %7667 = vmatpush3.bf16.msra.mxu1 %v7666_v51  ;;  %7707 = vmatpush3.bf16.msra.mxu0 %v10032_v53  ;;  %v13118_v51 = vld [vmem:[#allocation28_spill] sm:$0xff] }
 0x243   : > { %7669 = vmatprep.subr.bf16.mxu1 %v7668_v45  ;;  %7709 = vmatprep.subr.bf16.mxu0 %v10039_v38  ;;  %v13120_v10 = vcombine.low %v13118_v51, %v13119_v5  ;;  %v13121_v45 = vld [vmem:[#allocation32_spill] sm:$0xff] }
 0x244   : > { %v13123_v28 = vcombine.low %v13121_v45, %v13122_v55 }
 0x245   : > { %v1324_v3 = vpop.permute.xlu0 %1323  ;;  %v1357_v46 = vsel %vm1335_vm2, %v13120_v10, %v1316_v34  ;;  %v13129_v34 = vand.u32 4294901760, %v10108_v33 }
 0x246   : > { %v1300_v44 = vpop.permute.xlu1 %1299  ;;  %7671 = vmatpush3.bf16.msra.mxu1 %v7670_v42  ;;  %7711 = vmatpush3.bf16.msra.mxu0 %v10050_v29  ;;  %v1351_v8 = vsel %vm1335_vm2, %v13123_v28, %v1292_v6  ;;  %v1359_v42 = vsel %vm1338_vm3, %v1357_v46, %v1324_v3  ;;  %v13124_v28 = vpack.c.bf16 %v9731_v27, %v9699_v62  ;;  %v13126_v27 = vld [vmem:[#allocation70_spill] sm:$0xff] }
 0x247   : > { %7673 = vmatprep.subr.bf16.mxu1 %v7672_v4  ;;  %7713 = vmatprep.subr.bf16.mxu0 %v10057_v14  ;;  %v1353_v29 = vsel %vm1338_vm3, %v1351_v8, %v1300_v44  ;;  %v13125_v46 = vpack.c.bf16 %v9756_v17, %v9736_v30  ;;  %v13127_v62 = vld [vmem:[#allocation14_spill] sm:$0xff]  ;;  %v13130_v30 = vpack.c.bf16 %v9789_v56, %v9779_v12  ;;  %v13133_v4 = vand.u32 4294901760, %v13096_v50  ;;  %v13157_v44 = vld [vmem:[#allocation72_spill] sm:$0xff] }
 0x248   : > { %v13137_v56 = vand.u32 4294901760, %v13106_v0  ;;  %v13141_v50 = vand.u32 4294901760, %v13110_v7  ;;  %v13146_v0 = vand.u32 4294901760, %v13114_v16  ;;  %v13152_v7 = vld [vmem:[#allocation71_spill] sm:$0xff] }
 0x249   : > { %v1332_v49 = vpop.permute.xlu0 %1331 }
 0x24a   : > { %v1361_v31 = vsel %vm1341_vm4, %v1359_v42, %v1332_v49  ;;  %v1308_v37 = vpop.permute.xlu1 %1307  ;;  %7675 = vmatpush3.bf16.msra.mxu1 %v7674_v48  ;;  %7715 = vmatpush3.bf16.msra.mxu0 %v10066_v15  ;;  %v13160_v42 = vld [vmem:[#allocation24_spill] sm:$0xff] }
 0x24b   : > { %v10158_v38 = vand.u32 4294901760, %v1361_v31  ;;  %v1355_v5 = vsel %vm1341_vm4, %v1353_v29, %v1308_v37  ;;  %7677 = vmatprep.subr.bf16.mxu1 %v13124_v28  ;;  %7717 = vmatprep.subr.bf16.mxu0 %v10073_v47  ;;  %v13128_v29 = vpack.c.bf16 %v13126_v27, %v13127_v62  ;;  %v13161_v28 = vld [vmem:[#allocation4_spill] sm:$0xff]  ;;  %v13166_v27 = vld [vmem:[#allocation2_spill] sm:$0xff] }
 0x24c   : > { %v10162_v10 = vand.u32 4294901760, %v1355_v5  ;;  %v6361_v62 = vld [vmem:[%s12252_s2 + $0x10] sm:$0xff] }
 0x24d   : > { %v2456_v8 = vsub.f32 %v1361_v31, %v10158_v38  ;;  %2703 = vmatprep.mubr.f32.mxu0 %v10158_v38 }
 0x24e   : > { %v2462_v55 = vsub.f32 %v1355_v5, %v10162_v10  ;;  %2705 = vmatmul.mubr.f32.gmra.mrb[16].mxu0 %v10162_v10  ;;  %7679 = vmatpush3.bf16.msra.mxu1 %v13125_v46  ;;  %v13165_v46 = vld [vmem:[#allocation76_spill] sm:$0xff] }
 0x24f   : > { %7719 = vmatpush3.bf16.msra.mxu0 %v10081_v23  ;;  %v2457_v48 = vand.u32 4294901760, %v2456_v8  ;;  %2956 = vmatprep.mubr.f32.mxu0 %v2442_v13  ;;  %v13131_v13 = vpack.c.bf16 %v9799_v41, %v9794_v1  ;;  %v13135_v41 = vand.u32 4294901760, %v13104_v22  ;;  %v13136_v1 = vand.u32 4294901760, %v13105_v63 }
 0x250   : > { %7681 = vmatprep.subr.bf16.mxu1 %v13128_v29  ;;  %v2463_v37 = vand.u32 4294901760, %v2462_v55  ;;  %7753 = vmatprep.subr.bf16.mxu0 %v9869_v18  ;;  %v13132_v18 = vand.u32 4294901760, %v13095_v11  ;;  %v13145_v63 = vand.u32 4294901760, %v13113_v54  ;;  %v13154_v54 = vld [vmem:[#allocation68_spill] sm:$0xff]  ;;  %v6362_v29 = vld [vmem:[%s12252_s2 + $0x18] sm:$0xff] }
 0x251   : > { %v2458_v31 = vsub.f32 %v2456_v8, %v2457_v48  ;;  %v7722_v12 = vpack.c.bf16 %v13136_v1, %v13135_v41 }
 0x252   : > { %2960 = vmatmul.mubr.f32.vlgmr.msra.gmra.mrb[18].mxu0 %v13129_v34  ;;  %v2464_v6 = vsub.f32 %v2462_v55, %v2463_v37  ;;  %7683 = vmatpush3.bf16.msra.mxu1 %v13130_v30  ;;  %v7720_v3 = vpack.c.bf16 %v13133_v4, %v13132_v18 }
 0x253   : > { %7755 = vmatpush3.bf16.msra.mxu0 %v9911_v24  ;;  %v2459_v17 = vand.u32 4294901760, %v2458_v31  ;;  %2967 = vmatprep.mubr.f32.mxu0 %v2457_v48  ;;  %v13134_v24 = vpack.c.bf16 %v9810_v32, %v9805_v39  ;;  %v13139_v32 = vand.u32 4294901760, %v13108_v26  ;;  %v13140_v39 = vand.u32 4294901760, %v13109_v43  ;;  %v13149_v26 = vld [vmem:[#allocation17_spill] sm:$0xff] }
 0x254   : > { %7685 = vmatprep.subr.bf16.mxu1 %v13131_v13  ;;  %v2465_v49 = vand.u32 4294901760, %v2464_v6  ;;  %7757 = vmatprep.subr.bf16.mxu0 %v9935_v9  ;;  %v13138_v9 = vand.u32 4294901760, %v13107_v25 }
 0x255   : > { %2460 = vmatprep.mubr.f32.mxu1 %v2459_v17 }
 0x256   : > { %2466 = vmatmul.mubr.f32.gmra.mrb[14].mxu1 %v2465_v49  ;;  %2971 = vmatmul.mubr.f32.gmra.mrb[20].mxu0 %v2463_v37  ;;  %v7724_v11 = vpack.c.bf16 %v13138_v9, %v13137_v56 }
 0x257   : > { %7687 = vmatpush3.bf16.msra.mxu1 %v13134_v24  ;;  %7759 = vmatpush3.bf16.msra.mxu0 %v9959_v2  ;;  %v7726_v2 = vpack.c.bf16 %v13140_v39, %v13139_v32 }
 0x258   : > { %2840 = vmatprep.mubr.f32.mxu1 %v10104_v61  ;;  %3248 = vmatprep.mubr.f32.mxu0 %v10098_v59  ;;  %v13142_v61 = vand.u32 4294901760, %v9567_v20  ;;  %v7732_v20 = vpack.c.bf16 %v13146_v0, %v13145_v63 }
 0x259   : > { %7721 = vmatprep.subr.bf16.mxu1 %v7720_v3  ;;  %7761 = vmatprep.subr.bf16.mxu0 %v9969_v36  ;;  %v13143_v36 = vand.u32 4294901760, %v13111_v60  ;;  %v13153_v60 = vand.u32 4294901760, %v13152_v7 }
 0x25a   : > { %2843 = vmatmul.mubr.f32.vlgmr.msra.gmra.mrb[16].mxu1 %v10108_v33  ;;  %v7728_v22 = vpack.c.bf16 %v13142_v61, %v13141_v50 }
 0x25b   : > { %7723 = vmatpush3.bf16.msra.mxu1 %v7722_v12  ;;  %7763 = vmatpush3.bf16.msra.mxu0 %v9986_v40  ;;  %v13144_v40 = vand.u32 4294901760, %v13112_v19 }
 0x25c   : > { %2849 = vmatprep.mubr.f32.mxu1 %v2456_v8  ;;  %7725 = vmatprep.subr.bf16.mxu1 %v7724_v11  ;;  %v13162_v8 = vld [vmem:[#allocation21_spill] sm:$0xff] }
 0x25d   : > { %7765 = vmatprep.subr.bf16.mxu0 %v9992_v21  ;;  %v7730_v33 = vpack.c.bf16 %v13144_v40, %v13143_v36  ;;  %v13147_v21 = vand.u32 4294901760, %v9829_v52  ;;  %v13159_v52 = vld [vmem:[#allocation49_spill] sm:$0xff] }
 0x25e   : > { %2852 = vmatmul.mubr.f32.gmra.mrb[18].mxu1 %v2462_v55  ;;  %v13163_v55 = vld [vmem:[#allocation18_spill] sm:$0xff] }
 0x25f   : > { %7727 = vmatpush3.bf16.msra.mxu1 %v7726_v2  ;;  %7767 = vmatpush3.bf16.msra.mxu0 %v10012_v58  ;;  %v13148_v58 = vand.u32 4294901760, %v9839_v57 }
 0x260   : > { %3137 = vmatprep.mubr.f32.mxu1 %v10098_v59  ;;  %7729 = vmatprep.subr.bf16.mxu1 %v7728_v22  ;;  %v13150_v59 = vld [vmem:[#allocation47_spill] sm:$0xff] }
 0x261   : > { %7769 = vmatprep.subr.bf16.mxu0 %v10021_v35  ;;  %v7734_v25 = vpack.c.bf16 %v13148_v58, %v13147_v21  ;;  %v13151_v43 = vand.u32 4294901760, %v13150_v59  ;;  %v13155_v35 = vld [vmem:[#allocation16_spill] sm:$0xff] }
 0x262   : > { %v13156_v16 = vand.u32 4294901760, %v13155_v35 }
 0x263   : > { %7731 = vmatpush3.bf16.msra.mxu1 %v7730_v33  ;;  %7771 = vmatpush3.bf16.msra.mxu0 %v10032_v53  ;;  %v7736_v19 = vpack.c.bf16 %v13153_v60, %v13151_v43  ;;  %v13158_v53 = vand.u32 4294901760, %v13157_v44 }
 0x264   : > { %7733 = vmatprep.subr.bf16.mxu1 %v7732_v20  ;;  %7773 = vmatprep.subr.bf16.mxu0 %v13149_v26 }
 0x265   : > { %v7738_v51 = vpack.c.bf16 %v13158_v53, %v13156_v16 }
 0x266   : > { %v6514_v57 = vpop.f32.mrb[2].mxu0 }
 0x267   : > { %7735 = vmatpush3.bf16.msra.mxu1 %v7734_v25  ;;  %7775 = vmatpush3.bf16.msra.mxu0 %v13154_v54  ;;  %v6515_v45 = vpop.f32.mrb[3].mxu0 }
 0x268   : > { %7737 = vmatprep.subr.bf16.mxu1 %v7736_v19  ;;  %7777 = vmatprep.subr.bf16.mxu0 %v10057_v14  ;;  %v6516_v5 = vadd.f32 %v6515_v45, %v6514_v57  ;;  %v13164_v14 = vld [vmem:[#allocation5_spill] sm:$0xff] }
 0x26b   : > { %7739 = vmatpush3.bf16.msra.mxu1 %v7738_v51  ;;  %7779 = vmatpush3.bf16.msra.mxu0 %v10066_v15 }
 0x26c   : > { %7741 = vmatprep.subr.bf16.mxu1 %v13159_v52  ;;  %7781 = vmatprep.subr.bf16.mxu0 %v10073_v47 }
 0x26e   : > { %v6476_v15 = vpop.f32.mrb[0].mxu1 }
 0x26f   : > { %7743 = vmatpush3.bf16.msra.mxu1 %v13160_v42  ;;  %7783 = vmatpush3.bf16.msra.mxu0 %v10081_v23  ;;  %v6477_v47 = vpop.f32.mrb[1].mxu1 }
 0x270   : > { %7745 = vmatprep.subr.bf16.mxu1 %v13161_v28  ;;  %v6478_v48 = vadd.f32 %v6477_v47, %v6476_v15  ;;  %v6382_v15 = vld [vmem:[%s8269_s24 + $0x288] sm:$0xff]  ;;  %v10277_v47 = vld [vmem:[%s8269_s24 + $0x200] sm:$0xff] }
 0x272   : > { %3250 = vmatmul.mubr.f32.vlgmr.msra.gmra.mrb[22].mxu0 %v13162_v8  ;;  %v1782_v23 = vadd.f32 %v6516_v5, %v6478_v48 }
 0x273   : > { %7747 = vmatpush3.bf16.msra.mxu1 %v13163_v55  ;;  %3255 = vmatprep.mubr.f32.mxu0 %v10158_v38 }
 0x274   : > { %7749 = vmatprep.subr.bf16.mxu1 %v13164_v14  ;;  %v10273_v14 = vld [vmem:[%s8269_s24 + $0x280] sm:$0xff] }
 0x276   : > { %3257 = vmatmul.mubr.f32.gmra.mrb[24].mxu0 %v10162_v10 }
 0x277   : > { %7751 = vmatpush3.bf16.msra.mxu1 %v13165_v46 }
 0x278   : > { %7785 = vmatprep.subr.bf16.mxu1 %v13166_v27 }
 0x27a   : > { %3139 = vmatmul.mubr.f32.vlgmr.msra.gmra.mrb[20].mxu1 %v13162_v8 }
 0x27b   : > { %3144 = vmatprep.mubr.f32.mxu1 %v10158_v38  ;;  %7787 = vmatpush3.bf16.msra.mxu1 %v13166_v27  ;;  %v4352_v27 = vand.u32 4294901760, %v10273_v14 }
 0x27e   : > { %3146 = vmatmul.mubr.f32.gmra.mrb[22].mxu1 %v10162_v10 }
 0x27f   : > { %7379 = vmatprep.mubr.msk.f32.mxu1 %vm225_vm1, %v6361_v62  ;;  %v10281_v62 = vld [vmem:[%s8269_s24 + $0x208] sm:$0xff] }
 0x282   : > { %7380 = vmatmul.mubr.msk.f32.vlgmr.msra.gmra.mrb[24].mxu1 %vm225_vm1, %v6362_v29  ;;  %v4304_v29 = vand.u32 4294901760, %v10277_v47 }
 0x288   : > { %v6517_v37 = vpop.f32.mrb[4].mxu0 }
 0x289   : > { %v6518_v31 = vpop.f32.mrb[5].mxu0 }
 0x28a   : > { %v6519_v34 = vadd.f32 %v6518_v31, %v6517_v37 }
 0x28f   : > { %v6590_v38 = vpop.f32.mrb[6].mxu0 }
 0x290   : > { %v6591_v6 = vpop.f32.mrb[7].mxu0 }
 0x291   : > { %v6592_v30 = vadd.f32 %v6591_v6, %v6590_v38  ;;  %v10286_v38 = vld [vmem:[%s8269_s24 + $0x290] sm:$0xff]  ;;  %v10289_v6 = vld [vmem:[%s8269_s24 + $0x298] sm:$0xff] }
 0x292   : > { %v6479_v17 = vpop.f32.mrb[2].mxu1 }
 0x293   : > { %v6593_v13 = vpop.f32.mrb[8].mxu0  ;;  %v6480_v49 = vpop.f32.mrb[3].mxu1 }
 0x294   : > { %v6481_v18 = vadd.f32 %v6480_v49, %v6479_v17  ;;  %v6594_v4 = vpop.f32.mrb[9].mxu0  ;;  %v10295_v17 = vsub.f32 %v10273_v14, %v4352_v27  ;;  %v10302_v49 = vsub.f32 %v10277_v47, %v4304_v29  ;;  %v10404_v47 = vld [vmem:[%s8269_s24 + $0x2b8] sm:$0xff] }
 0x295   : > { %v6595_v10 = vadd.f32 %v6594_v4, %v6593_v13 }
 0x296   : > { %v1789_v3 = vadd.f32 %v6519_v34, %v6481_v18  ;;  %v4307_v34 = vand.u32 4294901760, %v10281_v62  ;;  %13167 = vst [vmem:[#allocation23_spill] sm:$0xff] %v10295_v17  ;;  %13169 = vst [vmem:[#allocation29_spill] sm:$0xff] %v10302_v49  ;;  %v4358_v18 = vand.u32 4294901760, %v10286_v38 }
 0x297   : > { %v6552_v24 = vpop.f32.mrb[4].mxu1 }
 0x298   : > { %v6553_v41 = vpop.f32.mrb[5].mxu1 }
 0x299   : > { %v6554_v1 = vadd.f32 %v6553_v41, %v6552_v24  ;;  %v4361_v24 = vand.u32 4294901760, %v10289_v6 }
 0x29b   : > { %v1927_v12 = vadd.f32 %v6554_v1, %v1782_v23  ;;  %v6555_v56 = vpop.f32.mrb[6].mxu1  ;;  %v4355_v23 = vand.u32 4294901760, %v6382_v15 }
 0x29c   : > { %v6556_v9 = vpop.f32.mrb[7].mxu1 }
 0x29d   : > { %v6557_v11 = vadd.f32 %v6556_v9, %v6555_v56  ;;  %v2044_v32 = vadd.f32 %v6592_v30, %v1927_v12  ;;  %v10292_v30 = vld [vmem:[%s8269_s24 + $0x210] sm:$0xff]  ;;  %v10297_v13 = vsub.f32 %v6382_v15, %v4355_v23  ;;  %v12510_v12 = vand.u32 4294901760, %v10295_v17 }
 0x29e   : > { %v4310_v41 = vand.u32 4294901760, %v10292_v30  ;;  %v12508_v9 = vand.u32 4294901760, %v10302_v49 }
 0x29f   : > { %v1936_v39 = vadd.f32 %v6557_v11, %v1789_v3  ;;  %13168 = vst [vmem:[#allocation77_spill] sm:$0xff] %v10297_v13  ;;  %v10308_v3 = vsub.f32 %v10281_v62, %v4307_v34  ;;  %v12509_v56 = vand.u32 4294901760, %v10297_v13  ;;  %v10318_v11 = vsub.f32 %v10286_v38, %v4358_v18 }
 0x2a0   : > { %v4373_v38 = vand.u32 4294901760, %v10404_v47 }
 0x2a1   : > { %v2055_v2 = vadd.f32 %v6595_v10, %v1936_v39  ;;  %13170 = vst [vmem:[#allocation78_spill] sm:$0xff] %v10308_v3  ;;  %13171 = vst [vmem:[#allocation57_spill] sm:$0xff] %v10318_v11 }
 0x2b3   : > { %v6666_v50 = vpop.f32.mrb[10].mxu0 }
 0x2b4   : > { %v6667_v61 = vpop.f32.mrb[11].mxu0 }
 0x2b5   : > { %v6668_v22 = vadd.f32 %v6667_v61, %v6666_v50  ;;  %v12507_v50 = vand.u32 4294901760, %v10308_v3  ;;  %v10327_v61 = vsub.f32 %v10289_v6, %v4361_v24 }
 0x2b7   : > { %v6669_v36 = vpop.f32.mrb[12].mxu0  ;;  %13172 = vst [vmem:[#allocation73_spill] sm:$0xff] %v10327_v61 }
 0x2b8   : > { %v6670_v40 = vpop.f32.mrb[13].mxu0 }
 0x2b9   : > { %v6671_v33 = vadd.f32 %v6670_v40, %v6669_v36  ;;  %v4553_v36 = vsub.f32 %v10297_v13, %v12509_v56  ;;  %v4434_v40 = vsub.f32 %v10302_v49, %v12508_v9 }
 0x2bb   : > { %v6628_v63 = vpop.f32.mrb[8].mxu1 }
 0x2bc   : > { %v6629_v0 = vpop.f32.mrb[9].mxu1 }
 0x2bd   : > { %v6630_v20 = vadd.f32 %v6629_v0, %v6628_v63 }
 0x2bf   : > { %v2223_v21 = vadd.f32 %v6630_v20, %v2044_v32  ;;  %v6631_v58 = vpop.f32.mrb[10].mxu1  ;;  %v10321_v32 = vld [vmem:[%s8269_s24 + $0x218] sm:$0xff]  ;;  %v4441_v20 = vsub.f32 %v10308_v3, %v12507_v50 }
 0x2c0   : > { %v6632_v25 = vpop.f32.mrb[11].mxu1 }
 0x2c1   : > { %v6633_v26 = vadd.f32 %v6632_v25, %v6631_v58  ;;  %v2334_v59 = vadd.f32 %v6668_v22, %v2223_v21  ;;  %v4546_v22 = vsub.f32 %v10295_v17, %v12510_v12  ;;  %v12504_v21 = vand.u32 4294901760, %v10327_v61 }
 0x2c2   : > { %v4313_v58 = vand.u32 4294901760, %v10321_v32 }
 0x2c3   : > { %v2230_v43 = vadd.f32 %v6633_v26, %v2055_v2  ;;  %v4547_v26 = vand.u32 4294901760, %v4546_v22 }
 0x2c5   : > { %v2341_v7 = vadd.f32 %v6671_v33, %v2230_v43  ;;  %v12505_v33 = vand.u32 4294901760, %v10318_v11  ;;  %v4435_v43 = vand.u32 4294901760, %v4434_v40 }
 0x304   : > { %v6742_v60 = vpop.f32.mrb[14].mxu0 }
 0x305   : > { %v6743_v19 = vpop.f32.mrb[15].mxu0 }
 0x306   : > { %v6744_v54 = vadd.f32 %v6743_v19, %v6742_v60 }
 0x30c   : > { %v6704_v35 = vpop.f32.mrb[12].mxu1 }
 0x30d   : > { %v6705_v16 = vpop.f32.mrb[13].mxu1 }
 0x30e   : > { %v6706_v44 = vadd.f32 %v6705_v16, %v6704_v35  ;;  %v4567_v35 = vsub.f32 %v10327_v61, %v12504_v21  ;;  %v10353_v16 = vld [vmem:[%s8269_s24 + $0x2a0] sm:$0xff] }
 0x30f   : > { %v4364_v15 = vand.u32 4294901760, %v10353_v16 }
 0x310   : > { %v2453_v53 = vadd.f32 %v6706_v44, %v2334_v59  ;;  %v4554_v59 = vand.u32 4294901760, %v4553_v36  ;;  %v10356_v44 = vld [vmem:[%s8269_s24 + $0x2a8] sm:$0xff] }
 0x312   : > { %v2700_v51 = vadd.f32 %v6744_v54, %v2453_v53  ;;  %v4442_v54 = vand.u32 4294901760, %v4441_v20  ;;  %v7820_v53 = vpack.c.bf16 %v4554_v59, %v4547_v26 }
 0x314   : > { %7821 = vmatprep.subr.bf16.mxu1 %v7820_v53 }
 0x321   : > { %v6745_v52 = vpop.f32.mrb[16].mxu0 }
 0x322   : > { %v6746_v57 = vpop.f32.mrb[17].mxu0 }
 0x323   : > { %v6747_v45 = vadd.f32 %v6746_v57, %v6745_v52  ;;  %v10361_v52 = vsub.f32 %v10292_v30, %v4310_v41  ;;  %v10364_v57 = vsub.f32 %v10321_v32, %v4313_v58  ;;  %v10398_v32 = vsub.f32 %v10353_v16, %v4364_v15 }
 0x325   : > { %v6818_v42 = vpop.f32.mrb[18].mxu0  ;;  %13173 = vst [vmem:[#allocation60_spill] sm:$0xff] %v10361_v52  ;;  %13174 = vst [vmem:[#allocation19_spill] sm:$0xff] %v10364_v57  ;;  %v12500_v14 = vand.u32 4294901760, %v10364_v57  ;;  %v12499_v40 = vand.u32 4294901760, %v10398_v32 }
 0x326   : > { %v6819_v5 = vpop.f32.mrb[19].mxu0  ;;  %13177 = vst [vmem:[#allocation25_spill] sm:$0xff] %v10398_v32 }
 0x327   : > { %v6820_v28 = vadd.f32 %v6819_v5, %v6818_v42  ;;  %v7822_v5 = vpack.c.bf16 %v4442_v54, %v4435_v43  ;;  %v4574_v26 = vsub.f32 %v10398_v32, %v12499_v40  ;;  %v10445_v43 = vpack.c.bf16 %v4313_v58, %v4310_v41  ;;  %v10459_v58 = vld [vmem:[%s8269_s24 + $0x2c0] sm:$0xff] }
 0x329   : > { %v6707_v8 = vpop.f32.mrb[14].mxu1  ;;  %v6821_v55 = vpop.f32.mrb[20].mxu0  ;;  %7823 = vmatpush3.bf16.msra.mxu1 %v7822_v5  ;;  %13183 = vst [vmem:[#allocation50_spill] sm:$0xff] %v10445_v43  ;;  %v4575_v16 = vand.u32 4294901760, %v4574_v26  ;;  %v10469_v5 = vld [vmem:[%s8269_s24 + $0x2c8] sm:$0xff] }
 0x32a   : > { %v6708_v46 = vpop.f32.mrb[15].mxu1  ;;  %v6822_v48 = vpop.f32.mrb[21].mxu0  ;;  %v10491_v26 = vld [vmem:[%s8269_s24 + $0x248] sm:$0xff] }
 0x32b   : > { %v6709_v37 = vadd.f32 %v6708_v46, %v6707_v8  ;;  %v6823_v31 = vadd.f32 %v6822_v48, %v6821_v55  ;;  %v10369_v8 = vpack.c.bf16 %v4355_v23, %v4352_v27  ;;  %v12502_v55 = vand.u32 4294901760, %v10361_v52  ;;  %v10376_v48 = vld [vmem:[%s8269_s24 + $0x228] sm:$0xff] }
 0x32c   : > { %v4367_v46 = vand.u32 4294901760, %v10356_v44  ;;  %v10388_v27 = vpack.c.bf16 %v4307_v34, %v4304_v29  ;;  %v4319_v62 = vand.u32 4294901760, %v10376_v48  ;;  %v10415_v34 = vpack.c.bf16 %v4361_v24, %v4358_v18  ;;  %v10432_v18 = vld [vmem:[%s8269_s24 + $0x230] sm:$0xff]  ;;  %v10435_v24 = vld [vmem:[%s8269_s24 + $0x238] sm:$0xff] }
 0x32d   : > { %v2468_v4 = vadd.f32 %v6709_v37, %v2341_v7  ;;  %v6780_v10 = vpop.f32.mrb[16].mxu1  ;;  %v4560_v7 = vsub.f32 %v10318_v11, %v12505_v33  ;;  %13175 = vst [vmem:[#allocation61_spill] sm:$0xff] %v10369_v8  ;;  %v10379_v37 = vld [vmem:[%s8269_s24 + $0x2b0] sm:$0xff]  ;;  %7789 = vmatprep.subr.bf16.mxu0 %v10369_v8  ;;  %v12521_v30 = vand.u32 4294901760, %v10432_v18  ;;  %v12520_v41 = vand.u32 4294901760, %v10435_v24 }
 0x32e   : > { %v6781_v1 = vpop.f32.mrb[17].mxu1  ;;  %13176 = vst [vmem:[#allocation66_spill] sm:$0xff] %v10388_v27  ;;  %7791 = vmatpush3.bf16.msra.mxu0 %v10388_v27  ;;  %13180 = vst [vmem:[#allocation31_spill] sm:$0xff] %v10415_v34  ;;  %v10422_v20 = vsub.f32 %v10376_v48, %v4319_v62 }
 0x32f   : > { %v6782_v39 = vadd.f32 %v6781_v1, %v6780_v10  ;;  %v2707_v2 = vadd.f32 %v6747_v45, %v2468_v4  ;;  %v10367_v45 = vld [vmem:[%s8269_s24 + $0x220] sm:$0xff]  ;;  %v4448_v1 = vsub.f32 %v10361_v52, %v12502_v55  ;;  %7793 = vmatprep.subr.bf16.mxu0 %v10415_v34  ;;  %v10474_v48 = vsub.f32 %v10432_v18, %v12521_v30 }
 0x330   : > { %v4316_v23 = vand.u32 4294901760, %v10367_v45  ;;  %13181 = vst [vmem:[#allocation33_spill] sm:$0xff] %v10422_v20 }
 0x331   : > { %v2845_v63 = vadd.f32 %v6782_v39, %v2700_v51  ;;  %v6783_v0 = vpop.f32.mrb[18].mxu1  ;;  %v4561_v51 = vand.u32 4294901760, %v4560_v7  ;;  %v10401_v39 = vsub.f32 %v10356_v44, %v4367_v46  ;;  %v4449_v22 = vand.u32 4294901760, %v4448_v1  ;;  %13185 = vst [vmem:[#allocation52_spill] sm:$0xff] %v10474_v48 }
 0x332   : > { %v6784_v25 = vpop.f32.mrb[19].mxu1  ;;  %v10409_v29 = vsub.f32 %v10367_v45, %v4316_v23  ;;  %7795 = vmatpush3.bf16.msra.mxu0 %v10445_v43  ;;  %v10481_v1 = vpack.c.bf16 %v4367_v46, %v4364_v15  ;;  %v12518_v15 = vand.u32 4294901760, %v10469_v5  ;;  %v10497_v46 = vpack.c.bf16 %v4319_v62, %v4316_v23 }
 0x333   : > { %v6785_v60 = vadd.f32 %v6784_v25, %v6783_v0  ;;  %v10347_v19 = vadd.f32 %v6820_v28, %v2845_v63  ;;  %v4568_v28 = vand.u32 4294901760, %v4567_v35  ;;  %13178 = vst [vmem:[#allocation8_spill] sm:$0xff] %v10401_v39  ;;  %v12498_v63 = vand.u32 4294901760, %v10401_v39 }
 0x334   : > { %13179 = vst [vmem:[#allocation69_spill] sm:$0xff] %v10409_v29  ;;  %v12497_v0 = vand.u32 4294901760, %v10409_v29  ;;  %v10453_v35 = vsub.f32 %v10404_v47, %v4373_v38  ;;  %13187 = vst [vmem:[#allocation34_spill] sm:$0xff] %v10481_v1  ;;  %7797 = vmatprep.subr.bf16.mxu0 %v10481_v1  ;;  %v10514_v23 = vsub.f32 %v10469_v5, %v12518_v15  ;;  %v12514_v62 = vand.u32 4294901760, %v10491_v26  ;;  %v13200_v15 = vld [vmem:[#allocation41_spill] sm:$0xff] }
 0x335   : > { %v2854_v42 = vadd.f32 %v6785_v60, %v2707_v2  ;;  %v7824_v10 = vpack.c.bf16 %v4568_v28, %v4561_v51  ;;  %v4370_v2 = vand.u32 4294901760, %v10379_v37  ;;  %v4581_v59 = vsub.f32 %v10401_v39, %v12498_v63  ;;  %13188 = vst [vmem:[#allocation36_spill] sm:$0xff] %v10497_v46 }
 0x336   : > { %v4462_v7 = vsub.f32 %v10409_v29, %v12497_v0  ;;  %v12496_v60 = vand.u32 4294901760, %v10422_v20  ;;  %13184 = vst [vmem:[#allocation51_spill] sm:$0xff] %v10453_v35  ;;  %13190 = vst [vmem:[#allocation83_spill] sm:$0xff] %v10514_v23  ;;  %7799 = vmatpush3.bf16.msra.mxu0 %v10497_v46  ;;  %v13226_v29 = vld [vmem:[#allocation6_spill] sm:$0xff] }
 0x337   : > { %v10381_v4 = vadd.f32 %v6823_v31, %v2854_v42  ;;  %v4455_v31 = vsub.f32 %v10364_v57, %v12500_v14  ;;  %7825 = vmatprep.subr.bf16.mxu1 %v7824_v10  ;;  %v10429_v6 = vsub.f32 %v10379_v37, %v4370_v2  ;;  %v4582_v44 = vand.u32 4294901760, %v4581_v59  ;;  %v13231_v57 = vld [vmem:[#allocation11_spill] sm:$0xff] }
 0x338   : > { %v4463_v53 = vand.u32 4294901760, %v4462_v7  ;;  %v4469_v51 = vsub.f32 %v10422_v20, %v12496_v60  ;;  %v12492_v42 = vand.u32 4294901760, %v10453_v35  ;;  %v10479_v10 = vsub.f32 %v10435_v24, %v12520_v41  ;;  %v10532_v60 = vld [vmem:[%s8269_s24 + $0x2d8] sm:$0xff]  ;;  %v13201_v41 = vld [vmem:[#allocation82_spill] sm:$0xff] }
 0x339   : > { %v4456_v36 = vand.u32 4294901760, %v4455_v31  ;;  %13182 = vst [vmem:[#allocation48_spill] sm:$0xff] %v10429_v6  ;;  %v12495_v54 = vand.u32 4294901760, %v10429_v6  ;;  %v7828_v28 = vpack.c.bf16 %v4582_v44, %v4575_v16  ;;  %v10484_v31 = vld [vmem:[%s8269_s24 + $0x240] sm:$0xff]  ;;  %v12493_v59 = vand.u32 4294901760, %v10474_v48 }
 0x33a   : > { %13186 = vst [vmem:[#allocation46_spill] sm:$0xff] %v10479_v10  ;;  %v4470_v47 = vand.u32 4294901760, %v4469_v51  ;;  %v12494_v7 = vand.u32 4294901760, %v10479_v10  ;;  %v12503_v14 = vand.u32 4294901760, %v10514_v23 }
 0x33b   : > { %v7826_v25 = vpack.c.bf16 %v4456_v36, %v4449_v22  ;;  %v4588_v45 = vsub.f32 %v10429_v6, %v12495_v54  ;;  %v4595_v36 = vsub.f32 %v10453_v35, %v12492_v42  ;;  %v10529_v54 = vpack.c.bf16 %v4373_v38, %v4370_v2 }
 0x33c   : > { %v7830_v16 = vpack.c.bf16 %v4470_v47, %v4463_v53  ;;  %v4483_v42 = vsub.f32 %v10479_v10, %v12494_v7  ;;  %v10519_v53 = vld [vmem:[%s8269_s24 + $0x2d0] sm:$0xff] }
 0x33d   : > { %7827 = vmatpush3.bf16.msra.mxu1 %v7826_v25  ;;  %v4589_v22 = vand.u32 4294901760, %v4588_v45  ;;  %v12519_v25 = vand.u32 4294901760, %v10459_v58  ;;  %v4596_v44 = vand.u32 4294901760, %v4595_v36  ;;  %v12515_v45 = vand.u32 4294901760, %v10484_v31  ;;  %13192 = vst [vmem:[#allocation15_spill] sm:$0xff] %v10529_v54  ;;  %7801 = vmatprep.subr.bf16.mxu0 %v10529_v54  ;;  %v13210_v54 = vld [vmem:[#allocation87_spill] sm:$0xff] }
 0x33e   : > { %7829 = vmatprep.subr.bf16.mxu1 %v7828_v28  ;;  %v4476_v28 = vsub.f32 %v10474_v48, %v12493_v59  ;;  %v4484_v40 = vand.u32 4294901760, %v4483_v42  ;;  %v12513_v38 = vand.u32 4294901760, %v10519_v53 }
 0x33f   : > { %v10502_v51 = vsub.f32 %v10459_v58, %v12519_v25  ;;  %v7832_v36 = vpack.c.bf16 %v4596_v44, %v4589_v22  ;;  %v10525_v7 = vsub.f32 %v10484_v31, %v12515_v45  ;;  %v10538_v22 = vsub.f32 %v10491_v26, %v12514_v62 }
 0x340   : > { %v4477_v63 = vand.u32 4294901760, %v4476_v28  ;;  %v4609_v44 = vsub.f32 %v10514_v23, %v12503_v14  ;;  %v10557_v55 = vsub.f32 %v10519_v53, %v12513_v38 }
 0x341   : > { %13189 = vst [vmem:[#allocation45_spill] sm:$0xff] %v10502_v51  ;;  %7831 = vmatpush3.bf16.msra.mxu1 %v7830_v16  ;;  %v12501_v59 = vand.u32 4294901760, %v10502_v51  ;;  %13191 = vst [vmem:[#allocation86_spill] sm:$0xff] %v10525_v7  ;;  %v12506_v2 = vand.u32 4294901760, %v10525_v7  ;;  %v12511_v28 = vand.u32 4294901760, %v10538_v22 }
 0x342   : > { %13193 = vst [vmem:[#allocation65_spill] sm:$0xff] %v10538_v22  ;;  %7833 = vmatprep.subr.bf16.mxu1 %v7832_v36  ;;  %v7834_v42 = vpack.c.bf16 %v4484_v40, %v4477_v63  ;;  %13194 = vst [vmem:[#allocation74_spill] sm:$0xff] %v10557_v55  ;;  %v4610_v63 = vand.u32 4294901760, %v4609_v44 }
 0x343   : > { %v4602_v37 = vsub.f32 %v10502_v51, %v12501_v59  ;;  %v4490_v59 = vsub.f32 %v10525_v7, %v12506_v2  ;;  %v4497_v14 = vsub.f32 %v10538_v22, %v12511_v28  ;;  %v12516_v2 = vand.u32 4294901760, %v10557_v55  ;;  %v13206_v7 = vld [vmem:[#allocation85_spill] sm:$0xff] }
 0x344   : > { %v13209_v51 = vld [vmem:[#allocation53_spill] sm:$0xff] }
 0x345   : > { %v6894_v47 = vpop.f32.mrb[22].mxu0  ;;  %v4603_v36 = vand.u32 4294901760, %v4602_v37  ;;  %7835 = vmatpush3.bf16.msra.mxu1 %v7834_v42  ;;  %v4491_v33 = vand.u32 4294901760, %v4490_v59  ;;  %v4498_v9 = vand.u32 4294901760, %v4497_v14  ;;  %v4616_v42 = vsub.f32 %v10557_v55, %v12516_v2  ;;  %v13204_v55 = vld [vmem:[#allocation42_spill] sm:$0xff] }
 0x346   : > { %v6895_v0 = vpop.f32.mrb[23].mxu0 }
 0x347   : > { %v6896_v16 = vadd.f32 %v6895_v0, %v6894_v47  ;;  %v12512_v0 = vand.u32 4294901760, %v10532_v60  ;;  %v7836_v50 = vpack.c.bf16 %v4610_v63, %v4603_v36  ;;  %v7838_v28 = vpack.c.bf16 %v4498_v9, %v4491_v33 }
 0x348   : > { %v4617_v59 = vand.u32 4294901760, %v4616_v42 }
 0x349   : > { %v6897_v47 = vpop.f32.mrb[24].mxu0  ;;  %v10565_v37 = vsub.f32 %v10532_v60, %v12512_v0  ;;  %7837 = vmatprep.subr.bf16.mxu1 %v7836_v50 }
 0x34a   : > { %v6898_v40 = vpop.f32.mrb[25].mxu0  ;;  %7839 = vmatpush3.bf16.msra.mxu1 %v7838_v28 }
 0x34b   : > { %13195 = vst [vmem:[#allocation79_spill] sm:$0xff] %v10565_v37  ;;  %v6899_v21 = vadd.f32 %v6898_v40, %v6897_v47  ;;  %v12517_v56 = vand.u32 4294901760, %v10565_v37 }
 0x34d   : > { %v6856_v12 = vpop.f32.mrb[20].mxu1  ;;  %v4623_v0 = vsub.f32 %v10565_v37, %v12517_v56  ;;  %v13197_v56 = vld [vmem:[#allocation40_spill] sm:$0xff] }
 0x34e   : > { %v6857_v44 = vpop.f32.mrb[21].mxu1 }
 0x34f   : > { %v6858_v47 = vadd.f32 %v6857_v44, %v6856_v12  ;;  %v4624_v40 = vand.u32 4294901760, %v4623_v0 }
 0x351   : > { %v3141_v14 = vadd.f32 %v6858_v47, %v10347_v19  ;;  %v6859_v36 = vpop.f32.mrb[22].mxu1  ;;  %v7840_v38 = vpack.c.bf16 %v4624_v40, %v4617_v59 }
 0x352   : > { %v6860_v63 = vpop.f32.mrb[23].mxu1 }
 0x353   : > { %v10576_v62 = vadd.f32 %v6896_v16, %v3141_v14  ;;  %v6861_v45 = vadd.f32 %v6860_v63, %v6859_v36  ;;  %7841 = vmatprep.subr.bf16.mxu1 %v7840_v38  ;;  %v13199_v14 = vld [vmem:[#allocation3_spill] sm:$0xff] }
 0x355   : > { %13196 = vst [vmem:[#allocation7_spill] sm:$0xff] %v10576_v62  ;;  %v6359_v50 = vmul.f32 -1.442695, %v10576_v62  ;;  %v3148_v9 = vadd.f32 %v6861_v45, %v10381_v4  ;;  %v7381_v33 = vpop.f32.mrb[24].mxu1 }
 0x356   : > { %v3413_v2 = vcombine.high %v7381_v33, %v7381_v33  ;;  %v3420_v12 = vrot.slane %v7381_v33, %v13197_v56  ;;  %v3353_v42 = vpop.f32.mrb[25].mxu1 }
 0x357   : > { %8196 = vpow2.f32 %v6359_v50  ;;  %v10581_v28 = vadd.f32 %v6899_v21, %v3148_v9  ;;  %v3364_v19 = vcombine.high %v3353_v42, %v3353_v42  ;;  %v3371_v47 = vrot.slane %v3353_v42, %v13197_v56 }
 0x358   : > { %v3427_v0 = vrot.slane %v3413_v2, %v13197_v56  ;;  %v3428_v44 = vcombine.high %v3420_v12, %v3420_v12  ;;  %v3436_v16 = vrot.slane %v3420_v12, %v13197_v56 }
 0x359   : > { %13198 = vst [vmem:[#allocation28_spill] sm:$0xff] %v10581_v28  ;;  %v6360_v38 = vmul.f32 -1.442695, %v10581_v28  ;;  %v3378_v36 = vrot.slane %v3364_v19, %v13197_v56  ;;  %v3379_v12 = vcombine.high %v3371_v47, %v3371_v47  ;;  %v3387_v42 = vrot.slane %v3371_v47, %v13197_v56  ;;  %v13202_v47 = vld [vmem:[#allocation43_spill] sm:$0xff] }
 0x35a   : > { %v3429_v59 = vcombine.high %v3427_v0, %v3427_v0  ;;  %v3443_v4 = vrot.slane %v3427_v0, %v13197_v56  ;;  %v3450_v45 = vrot.slane %v3428_v44, %v13197_v56  ;;  %v3458_v40 = vcombine.high %v3436_v16, %v3436_v16 }
 0x35b   : > { %8198 = vpow2.f32 %v6360_v38  ;;  %v3497_v21 = vrot.slane %v3436_v16, %v13199_v14  ;;  %v3380_v25 = vcombine.high %v3378_v36, %v3378_v36 }
 0x35c   : > { %v3457_v2 = vrot.slane %v3429_v59, %v13197_v56  ;;  %v3459_v63 = vcombine.high %v3443_v4, %v3443_v4  ;;  %v3460_v50 = vcombine.high %v3450_v45, %v3450_v45  ;;  %v3501_v9 = vrot.slane %v3450_v45, %v13199_v14 }
 0x35d   : > { %v3505_v33 = vrot.slane %v3458_v40, %v13199_v14  ;;  %v3513_v38 = vrot.slane %v3443_v4, %v13199_v14  ;;  %v10600_v59 = vmul.f32 %v3497_v21, %v13200_v15  ;;  %v3394_v45 = vrot.slane %v3378_v36, %v13197_v56  ;;  %v13205_v15 = vld [vmem:[#allocation84_spill] sm:$0xff] }
 0x35e   : > { %v3461_v0 = vcombine.high %v3457_v2, %v3457_v2  ;;  %v3509_v44 = vrot.slane %v3460_v50, %v13199_v14  ;;  %v3521_v16 = vrot.slane %v3459_v63, %v13199_v14  ;;  %v3517_v19 = vrot.slane %v3457_v2, %v13199_v14  ;;  %v13203_v50 = vld [vmem:[#allocation44_spill] sm:$0xff] }
 0x35f   : > { %v10605_v30 = vmul.f32 %v3497_v21, %v13201_v41  ;;  %v10608_v37 = vmul.f32 %v3505_v33, %v13202_v47  ;;  %v10614_v2 = vmul.f32 %v3501_v9, %v13204_v55  ;;  %v10617_v22 = vmul.f32 %v3501_v9, %v13205_v15  ;;  %v13208_v21 = vld [vmem:[#allocation62_spill] sm:$0xff] }
 0x360   : > { %v3525_v40 = vrot.slane %v3461_v0, %v13199_v14  ;;  %v10611_v4 = vmul.f32 %v3509_v44, %v13203_v50  ;;  %v10620_v36 = vmul.f32 %v3505_v33, %v13206_v7  ;;  %v13207_v0 = vld [vmem:[#allocation63_spill] sm:$0xff]  ;;  %v10626_v47 = vmul.f32 %v3509_v44, %v13208_v21  ;;  %v13211_v55 = vld [vmem:[#allocation54_spill] sm:$0xff] }
 0x361   : > { %v8197_v63 = vpop.eup %8196  ;;  %v10623_v23 = vmul.f32 %v3521_v16, %v13207_v0  ;;  %v10629_v50 = vmul.f32 %v3513_v38, %v13209_v51  ;;  %v10632_v46 = vmul.f32 %v3513_v38, %v13210_v54  ;;  %v10635_v1 = vmul.f32 %v3517_v19, %v13211_v55  ;;  %v13212_v9 = vld [vmem:[#allocation58_spill] sm:$0xff]  ;;  %v13213_v7 = vld [vmem:[#allocation59_spill] sm:$0xff]  ;;  %v13214_v0 = vld [vmem:[#allocation64_spill] sm:$0xff] }
 0x362   : > { %v3268_v41 = vadd.f32 1.0, %v8197_v63  ;;  %v10638_v15 = vmul.f32 %v3517_v19, %v13212_v9  ;;  %v10641_v33 = vmul.f32 %v3521_v16, %v13213_v7  ;;  %v10644_v63 = vmul.f32 %v3525_v40, %v13214_v0  ;;  %v13215_v44 = vld [vmem:[#allocation75_spill] sm:$0xff]  ;;  %v13216_v9 = vld [vmem:[#allocation20_spill] sm:$0xff] }
 0x363   : > { %v10647_v21 = vmul.f32 %v3525_v40, %v13215_v44  ;;  %v3401_v0 = vrot.slane %v3379_v12, %v13197_v56  ;;  %v3408_v44 = vrot.slane %v3380_v25, %v13197_v56  ;;  %v3409_v51 = vcombine.high %v3387_v42, %v3387_v42  ;;  %v13220_v25 = vld [vmem:[#allocation80_spill] sm:$0xff] }
 0x364   : > { %8200 = vrcp.f32 %v3268_v41  ;;  %v3410_v38 = vcombine.high %v3394_v45, %v3394_v45  ;;  %v3465_v54 = vrot.slane %v3387_v42, %v13199_v14  ;;  %v3481_v12 = vrot.slane %v3394_v45, %v13199_v14  ;;  %v13218_v45 = vld [vmem:[#allocation67_spill] sm:$0xff] }
 0x365   : > { %v8199_v19 = vpop.eup %8198  ;;  %v3411_v16 = vcombine.high %v3401_v0, %v3401_v0  ;;  %v3412_v40 = vcombine.high %v3408_v44, %v3408_v44  ;;  %v3469_v43 = vrot.slane %v3401_v0, %v13199_v14  ;;  %v3473_v7 = vrot.slane %v3409_v51, %v13199_v14  ;;  %v13217_v51 = vld [vmem:[#allocation22_spill] sm:$0xff]  ;;  %v13221_v42 = vld [vmem:[#allocation27_spill] sm:$0xff] }
 0x366   : > { %v3269_v41 = vadd.f32 1.0, %v8199_v19  ;;  %v3489_v56 = vrot.slane %v3410_v38, %v13199_v14  ;;  %v3485_v0 = vrot.slane %v3408_v44, %v13199_v14  ;;  %v3542_v34 = vmul.f32 %v3465_v54, %v13216_v9  ;;  %v13219_v38 = vld [vmem:[#allocation26_spill] sm:$0xff] }
 0x367   : > { %v3477_v19 = vrot.slane %v3411_v16, %v13199_v14  ;;  %v3493_v55 = vrot.slane %v3412_v40, %v13199_v14  ;;  %v3546_v27 = vmul.f32 %v3473_v7, %v13217_v51  ;;  %v10686_v10 = vmul.f32 %v3465_v54, %v13218_v45  ;;  %v13222_v16 = vld [vmem:[#allocation81_spill] sm:$0xff]  ;;  %v13224_v14 = vld [vmem:[#allocation35_spill] sm:$0xff]  ;;  %v13225_v44 = vld [vmem:[#allocation38_spill] sm:$0xff] }
 0x368   : > { %8202 = vrcp.f32 %v3269_v41  ;;  %v3544_v48 = vmul.f32 %v3469_v43, %v13219_v38  ;;  %v10690_v35 = vmul.f32 %v3469_v43, %v13220_v25  ;;  %v10694_v20 = vmul.f32 %v3473_v7, %v13222_v16  ;;  %v13223_v40 = vld [vmem:[#allocation13_spill] sm:$0xff]  ;;  %v13227_v45 = vld [vmem:[#allocation39_spill] sm:$0xff]  ;;  %v13230_v7 = vld [vmem:[#allocation12_spill] sm:$0xff] }
 0x369   : > { %v3548_v6 = vmul.f32 %v3477_v19, %v13221_v42  ;;  %v10697_v41 = vmul.f32 %v3477_v19, %v13223_v40  ;;  %v3550_v9 = vmul.f32 %v3481_v12, %v13224_v14  ;;  %v3554_v51 = vmul.f32 %v3489_v56, %v13225_v44  ;;  %v13229_v42 = vld [vmem:[#allocation37_spill] sm:$0xff]  ;;  %v13232_v44 = vld [vmem:[#allocation30_spill] sm:$0xff] }
 0x36a   : > { %v10702_v54 = vmul.f32 %v3481_v12, %v13226_v29  ;;  %v3556_v38 = vmul.f32 %v3493_v55, %v13227_v45  ;;  %v3575_v39 = vcombine.high %v3542_v34, %v3546_v27  ;;  %v3552_v32 = vmul.f32 %v3485_v0, %v13229_v42  ;;  %v13233_v42 = vld [vmem:[#allocation55_spill] sm:$0xff] }
 0x36b   : > { %v3590_v43 = vcombine.low %v3544_v48, %v3548_v6  ;;  %v10709_v16 = vmul.f32 %v3489_v56, %v13230_v7  ;;  %v3574_v19 = vcombine.low %v3542_v34, %v3546_v27  ;;  %v3591_v40 = vcombine.high %v3544_v48, %v3548_v6 }
 0x36c   : > { %v10712_v14 = vmul.f32 %v3485_v0, %v13231_v57  ;;  %v10715_v52 = vmul.f32 %v3493_v55, %v13232_v44  ;;  %v3606_v29 = vcombine.low %v3550_v9, %v3554_v51  ;;  %v3607_v12 = vcombine.high %v3550_v9, %v3554_v51 }
 0x36d   : > { %v3847_v61 = vcombine.high %v10686_v10, %v10694_v20  ;;  %v3605_v27 = vrot.slane %v3591_v40, %v13233_v42  ;;  %v3863_v57 = vcombine.high %v10690_v35, %v10697_v41  ;;  %v3589_v34 = vrot.slane %v3575_v39, %v13233_v42 }
 0x36e   : > { %v10705_v25 = vpop.eup %8200  ;;  %v3623_v6 = vcombine.high %v3552_v32, %v3556_v38  ;;  %v3598_v48 = vrot.slane %v3590_v43, %v13233_v42  ;;  %v3879_v0 = vcombine.high %v10702_v54, %v10709_v16  ;;  %v3582_v9 = vrot.slane %v3574_v19, %v13233_v42 }
 0x36f   : > { %13228 = vst [vmem:[#allocation9_spill] sm:$0xff] %v10705_v25  ;;  %v3622_v51 = vcombine.low %v3552_v32, %v3556_v38  ;;  %v3621_v7 = vrot.slane %v3607_v12, %v13233_v42  ;;  %v3654_v44 = vcombine.low %v3589_v34, %v3605_v27  ;;  %v13234_v39 = vcombine.high %v10614_v2, %v10611_v4  ;;  %v13237_v25 = vld [vmem:[#allocation56_spill] sm:$0xff] }
 0x370   : > { %v3637_v40 = vrot.slane %v3623_v6, %v13233_v42  ;;  %v3614_v55 = vrot.slane %v3606_v29, %v13233_v42  ;;  %v3638_v11 = vcombine.low %v3582_v9, %v3598_v48  ;;  %v13236_v32 = vcombine.high %v10600_v59, %v10608_v37 }
 0x371   : > { %v3741_v45 = vrot.slane %v13234_v39, %v13233_v42  ;;  %v3630_v56 = vrot.slane %v3622_v51, %v13233_v42  ;;  %v3655_v12 = vcombine.high %v3589_v34, %v3605_v27  ;;  %v3639_v3 = vcombine.high %v3582_v9, %v3598_v48 }
 0x372   : > { %v10739_v43 = vpop.eup %8202  ;;  %v3725_v38 = vrot.slane %v13236_v32, %v13233_v42  ;;  %v3686_v19 = vcombine.low %v3621_v7, %v3637_v40  ;;  %v3687_v6 = vcombine.high %v3621_v7, %v3637_v40  ;;  %v3759_v39 = vcombine.high %v10635_v1, %v10644_v63 }
 0x373   : > { %13235 = vst [vmem:[#allocation32_spill] sm:$0xff] %v10739_v43  ;;  %v3670_v49 = vcombine.low %v3614_v55, %v3630_v56  ;;  %v3671_v28 = vcombine.high %v3614_v55, %v3630_v56  ;;  %v10750_v29 = vrot.slane %v3654_v44, %v13237_v25  ;;  %v13238_v32 = vcombine.high %v10629_v50, %v10623_v23 }
 0x374   : > { %v3790_v43 = vcombine.low %v3725_v38, %v3741_v45  ;;  %v10753_v51 = vrot.slane %v3686_v19, %v13237_v25  ;;  %v13239_v27 = vcombine.low %v10614_v2, %v10611_v4  ;;  %v10764_v34 = vrot.slane %v3638_v11, %v13237_v25 }
 0x375   : > { %v3757_v62 = vrot.slane %v13238_v32, %v13233_v42  ;;  %v10767_v48 = vrot.slane %v3670_v49, %v13237_v25  ;;  %v3701_v55 = vrot.slane %v3687_v6, %v13237_v25  ;;  %v3773_v9 = vrot.slane %v3759_v39, %v13233_v42 }
 0x376   : > { %v3734_v56 = vrot.slane %v13239_v27, %v13233_v42  ;;  %v3707_v7 = vcombine.high %v10750_v29, %v10753_v51  ;;  %v3669_v40 = vrot.slane %v3655_v12, %v13237_v25  ;;  %v3685_v44 = vrot.slane %v3671_v28, %v13237_v25 }
 0x377   : > { %v13240_v4 = vcombine.low %v10600_v59, %v10608_v37  ;;  %v3703_v49 = vcombine.high %v10764_v34, %v10767_v48  ;;  %v3653_v2 = vrot.slane %v3639_v3, %v13237_v25  ;;  %v10783_v19 = vrot.slane %v3790_v43, %v13237_v25 }
 0x378   : > { %v3822_v6 = vcombine.low %v3757_v62, %v3773_v9  ;;  %4144 = vrot.lane.b32.xlu0 %v3707_v7, %s8225_s21  ;;  %v3758_v12 = vcombine.low %v10635_v1, %v10644_v63  ;;  %v3791_v39 = vcombine.high %v3725_v38, %v3741_v45  ;;  %v3823_v32 = vcombine.high %v3757_v62, %v3773_v9 }
 0x379   : > { %v3718_v11 = vrot.slane %v13240_v4, %v13233_v42  ;;  %4120 = vrot.lane.b32.xlu1 %v3703_v49, %s8225_s21  ;;  %v3708_v37 = vcombine.low %v3669_v40, %v3701_v55  ;;  %v3709_v59 = vcombine.high %v3669_v40, %v3701_v55  ;;  %v13241_v3 = vcombine.low %v10629_v50, %v10623_v23 }
 0x37a   : > { %v3877_v43 = vrot.slane %v3863_v57, %v13233_v42  ;;  %v3704_v4 = vcombine.low %v3653_v2, %v3685_v44  ;;  %v3705_v8 = vcombine.high %v3653_v2, %v3685_v44  ;;  %v10795_v7 = vrot.slane %v3822_v6, %v13237_v25 }
 0x37b   : > { %v3774_v28 = vcombine.low %v3718_v11, %v3734_v56  ;;  %v3750_v27 = vrot.slane %v13241_v3, %v13233_v42  ;;  %v3766_v1 = vrot.slane %v3758_v12, %v13233_v42  ;;  %v10799_v62 = vrot.slane %v3823_v32, %v13237_v25 }
 0x37c   : > { %v3775_v63 = vcombine.high %v3718_v11, %v3734_v56  ;;  %v3861_v45 = vrot.slane %v3847_v61, %v13233_v42  ;;  %v3895_v38 = vcombine.high %v10712_v14, %v10715_v52  ;;  %4152 = vrot.lane.b32.xlu0 %v3708_v37, %s8226_s22  ;;  %v10809_v57 = vrot.slane %v3791_v39, %v13237_v25 }
 0x37d   : > { %v10806_v23 = vrot.slane %v3774_v28, %v13237_v25  ;;  %v3806_v50 = vcombine.low %v3750_v27, %v3766_v1  ;;  %v3807_v55 = vcombine.high %v3750_v27, %v3766_v1  ;;  %4128 = vrot.lane.b32.xlu1 %v3704_v4, %s8226_s22  ;;  %v3893_v9 = vrot.slane %v3879_v0, %v13233_v42 }
 0x37e   : > { %v3909_v56 = vrot.slane %v3895_v38, %v13233_v42  ;;  %v3926_v61 = vcombine.low %v3861_v45, %v3877_v43  ;;  %v13242_v40 = vcombine.low %v10690_v35, %v10697_v41  ;;  %v3843_v11 = vcombine.high %v10783_v19, %v10795_v7 }
 0x37f   : > { %v10821_v49 = vrot.slane %v3806_v50, %v13237_v25  ;;  %v13243_v2 = vcombine.low %v10686_v10, %v10694_v20  ;;  %v3894_v0 = vcombine.low %v10712_v14, %v10715_v52  ;;  %v3844_v12 = vcombine.low %v10809_v57, %v10799_v62 }
 0x380   : > { %v3870_v44 = vrot.slane %v13242_v40, %v13233_v42  ;;  %v10832_v35 = vrot.slane %v3775_v63, %v13237_v25  ;;  %v10835_v41 = vrot.slane %v3807_v55, %v13237_v25  ;;  %v3958_v28 = vcombine.low %v3893_v9, %v3909_v56  ;;  %4160 = vrot.lane.b32.xlu0 %v3709_v59, %s8227_s23 }
 0x381   : > { %v3854_v6 = vrot.slane %v13243_v2, %v13233_v42  ;;  %v13244_v20 = vcombine.low %v10702_v54, %v10709_v16  ;;  %v3902_v39 = vrot.slane %v3894_v0, %v13233_v42  ;;  %v3927_v14 = vcombine.high %v3861_v45, %v3877_v43  ;;  %4136 = vrot.lane.b32.xlu1 %v3705_v8, %s8227_s23 }
 0x382   : > { %v3845_v32 = vcombine.high %v10809_v57, %v10799_v62  ;;  %v10847_v37 = vrot.slane %v3926_v61, %v13237_v25  ;;  %v10850_v3 = vrot.slane %v3958_v28, %v13237_v25  ;;  %v3959_v59 = vcombine.high %v3893_v9, %v3909_v56 }
 0x383   : > { %v3886_v10 = vrot.slane %v13244_v20, %v13233_v42  ;;  %v3910_v52 = vcombine.low %v3854_v6, %v3870_v44  ;;  %v3839_v54 = vcombine.high %v10806_v23, %v10821_v49  ;;  %v3911_v27 = vcombine.high %v3854_v6, %v3870_v44 }
 0x384   : > { %13245 = vst [vmem:[#allocation10_spill] sm:$0xff] %v10847_v37  ;;  %13246 = vst [vmem:[#allocation70_spill] sm:$0xff] %v10850_v3  ;;  %v3840_v43 = vcombine.low %v10832_v35, %v10835_v41  ;;  %v3841_v8 = vcombine.high %v10832_v35, %v10835_v41  ;;  %v10859_v1 = vrot.slane %v3959_v59, %v13237_v25  ;;  %4146 = vrot.lane.b32.xlu0 %v3843_v11, %s8225_s21 }
 0x385   : > { %v3942_v16 = vcombine.low %v3886_v10, %v3902_v39  ;;  %v3943_v4 = vcombine.high %v3886_v10, %v3902_v39  ;;  %v13247_v62 = vcombine.high %v10617_v22, %v10626_v47  ;;  %v10867_v45 = vrot.slane %v3910_v52, %v13237_v25  ;;  %4122 = vrot.lane.b32.xlu1 %v3839_v54, %s8225_s21 }
 0x386   : > { %v10870_v38 = vrot.slane %v3927_v14, %v13237_v25  ;;  %v13249_v50 = vcombine.high %v10605_v30, %v10620_v36  ;;  %v4031_v55 = vcombine.high %v10638_v15, %v10647_v21  ;;  %v3979_v9 = vcombine.high %v10847_v37, %v10850_v3 }
 0x387   : > { %v4013_v63 = vrot.slane %v13247_v62, %v13233_v42  ;;  %13248 = vst [vmem:[#allocation14_spill] sm:$0xff] %v10867_v45  ;;  %v10882_v56 = vrot.slane %v3942_v16, %v13237_v25  ;;  %v10885_v61 = vrot.slane %v3911_v27, %v13237_v25  ;;  %v13251_v40 = vcombine.high %v10632_v46, %v10641_v33 }
 0x388   : > { %v3997_v57 = vrot.slane %v13249_v50, %v13233_v42  ;;  %v3980_v11 = vcombine.low %v10870_v38, %v10859_v1  ;;  %v10894_v2 = vrot.slane %v3943_v4, %v13237_v25  ;;  %v4045_v0 = vrot.slane %v4031_v55, %v13233_v42  ;;  %4154 = vrot.lane.b32.xlu0 %v3844_v12, %s8226_s22  ;;  %v10927_v12 = vld [vmem:[%s8269_s24 + $0x250] sm:$0xff]  ;;  %v10942_v4 = vld [vmem:[%s8269_s24 + $0x258] sm:$0xff]  ;;  %v10954_v55 = vld [vmem:[%s8269_s24 + $0x2e8] sm:$0xff] }
 0x389   : > { %13250 = vst [vmem:[#allocation17_spill] sm:$0xff] %v10882_v56  ;;  %v4029_v44 = vrot.slane %v13251_v40, %v13233_v42  ;;  %v13252_v41 = vcombine.low %v10605_v30, %v10620_v36  ;;  %v13253_v20 = vcombine.low %v10617_v22, %v10626_v47  ;;  %v4030_v39 = vcombine.low %v10638_v15, %v10647_v21 }
 0x38a   : > { %v4062_v35 = vcombine.low %v3997_v57, %v4013_v63  ;;  %v4063_v14 = vcombine.high %v3997_v57, %v4013_v63  ;;  %4130 = vrot.lane.b32.xlu1 %v3840_v43, %s8226_s22  ;;  %v13254_v22 = vcombine.low %v10632_v46, %v10641_v33  ;;  %v3975_v54 = vcombine.high %v10867_v45, %v10882_v56  ;;  %v10951_v57 = vld [vmem:[%s8269_s24 + $0x2e0] sm:$0xff]  ;;  %v13315_v56 = vld [vmem:[#allocation51_spill] sm:$0xff] }
 0x38b   : > { %v10903_v28 = vrot.slane %v13252_v41, %v13233_v42  ;;  %v10909_v10 = vrot.slane %v13253_v20, %v13233_v42  ;;  %v4094_v52 = vcombine.low %v4029_v44, %v4045_v0  ;;  %v4095_v59 = vcombine.high %v4029_v44, %v4045_v0 }
 0x38c   : > { %v4022_v36 = vrot.slane %v13254_v22, %v13233_v42  ;;  %v4038_v47 = vrot.slane %v4030_v39, %v13233_v42  ;;  %v3976_v16 = vcombine.low %v10885_v61, %v10894_v2  ;;  %v13255_v33 = vand.u32 4294901760, %v10432_v18  ;;  %4162 = vrot.lane.b32.xlu0 %v3845_v32, %s8227_s23 }
 0x38d   : > { %v4046_v15 = vcombine.low %v10903_v28, %v10909_v10  ;;  %v13256_v42 = vand.u32 4294901760, %v10435_v24  ;;  %v10945_v43 = vrot.slane %v4062_v35, %v13237_v25  ;;  %v10948_v62 = vrot.slane %v4094_v52, %v13237_v25  ;;  %v10982_v52 = vld [vmem:[%s8269_s24 + $0x260] sm:$0xff] }
 0x38e   : > { %v4078_v63 = vcombine.low %v4022_v36, %v4038_v47  ;;  %v4079_v50 = vcombine.high %v4022_v36, %v4038_v47  ;;  %v10958_v18 = vrot.slane %v4063_v14, %v13237_v25  ;;  %v10961_v24 = vrot.slane %v4095_v59, %v13237_v25  ;;  %4138 = vrot.lane.b32.xlu1 %v3841_v8, %s8227_s23 }
 0x38f   : > { %v10939_v27 = vpack.c.bf16 %v13256_v42, %v13255_v33  ;;  %13257 = vst [vmem:[#allocation47_spill] sm:$0xff] %v10945_v43  ;;  %13258 = vst [vmem:[#allocation71_spill] sm:$0xff] %v10948_v62  ;;  %v4334_v44 = vand.u32 4294901760, %v10927_v12  ;;  %v10969_v0 = vrot.slane %v4046_v15, %v13237_v25  ;;  %v4337_v35 = vand.u32 4294901760, %v10942_v4 }
 0x390   : > { %v10972_v32 = vrot.slane %v4078_v63, %v13237_v25  ;;  %v13261_v41 = vand.u32 4294901760, %v10459_v58  ;;  %v13262_v20 = vand.u32 4294901760, %v10469_v5  ;;  %v4388_v8 = vand.u32 4294901760, %v10951_v57  ;;  %v10996_v58 = vld [vmem:[%s8269_s24 + $0x268] sm:$0xff]  ;;  %v10999_v5 = vld [vmem:[%s8269_s24 + $0x2f0] sm:$0xff]  ;;  %4192 = vrot.lane.b32.xlu0 %v3979_v9, %s8225_s21 }
 0x391   : > { %7803 = vmatpush3.bf16.msra.mxu0 %v10939_v27  ;;  %13259 = vst [vmem:[#allocation68_spill] sm:$0xff] %v10969_v0  ;;  %v10985_v14 = vsub.f32 %v10927_v12, %v4334_v44  ;;  %v4391_v59 = vand.u32 4294901760, %v10954_v55  ;;  %v13263_v22 = vand.u32 4294901760, %v10484_v31  ;;  %v13264_v36 = vand.u32 4294901760, %v10491_v26 }
 0x392   : > { %13260 = vst [vmem:[#allocation16_spill] sm:$0xff] %v10972_v32  ;;  %v10979_v39 = vpack.c.bf16 %v13262_v20, %v13261_v41  ;;  %v11006_v33 = vrot.slane %v4079_v50, %v13237_v25  ;;  %v11009_v42 = vsub.f32 %v10942_v4, %v4337_v35  ;;  %v11015_v26 = vsub.f32 %v10951_v57, %v4388_v8  ;;  %v6396_v41 = vld [vmem:[%s8269_s24 + $0x2f8] sm:$0xff] }
 0x393   : > { %v10993_v47 = vpack.c.bf16 %v13264_v36, %v13263_v22  ;;  %v12579_v31 = vand.u32 4294901760, %v10985_v14  ;;  %v11018_v63 = vsub.f32 %v10954_v55, %v4391_v59  ;;  %v4340_v50 = vand.u32 4294901760, %v10982_v52  ;;  %4168 = vrot.lane.b32.xlu1 %v3975_v54, %s8225_s21 }
 0x394   : > { %7805 = vmatprep.subr.bf16.mxu0 %v10979_v39  ;;  %v12578_v4 = vand.u32 4294901760, %v11009_v42  ;;  %v4343_v20 = vand.u32 4294901760, %v10996_v58  ;;  %v13265_v9 = vand.u32 4294901760, %v10519_v53  ;;  %v13266_v22 = vand.u32 4294901760, %v10532_v60  ;;  %4200 = vrot.lane.b32.xlu0 %v3980_v11, %s8226_s22  ;;  %v6379_v11 = vld [vmem:[%s8269_s24 + $0x270] sm:$0xff] }
 0x395   : > { %7807 = vmatpush3.bf16.msra.mxu0 %v10993_v47  ;;  %v4394_v55 = vand.u32 4294901760, %v10999_v5  ;;  %v4504_v36 = vsub.f32 %v10985_v14, %v12579_v31  ;;  %v12580_v21 = vand.u32 4294901760, %v11015_v26  ;;  %v12581_v54 = vand.u32 4294901760, %v11018_v63 }
 0x396   : > { %v11030_v57 = vpack.c.bf16 %v13266_v22, %v13265_v9  ;;  %v11039_v30 = vsub.f32 %v10982_v52, %v4340_v50  ;;  %v4511_v60 = vsub.f32 %v11009_v42, %v12578_v4  ;;  %v11045_v53 = vsub.f32 %v10996_v58, %v4343_v20 }
 0x397   : > { %v4397_v9 = vand.u32 4294901760, %v6396_v41  ;;  %v11049_v22 = vsub.f32 %v10999_v5, %v4394_v55  ;;  %v4505_v52 = vand.u32 4294901760, %v4504_v36  ;;  %v4630_v4 = vsub.f32 %v11015_v26, %v12580_v21  ;;  %4176 = vrot.lane.b32.xlu1 %v3976_v16, %s8226_s22  ;;  %v6380_v36 = vld [vmem:[%s8269_s24 + $0x278] sm:$0xff] }
 0x398   : > { %13267 = vst [vmem:[#allocation72_spill] sm:$0xff] %v11030_v57  ;;  %13268 = vst [vmem:[#allocation49_spill] sm:$0xff] %v11039_v30  ;;  %7809 = vmatprep.subr.bf16.mxu0 %v11030_v57  ;;  %v4637_v58 = vsub.f32 %v11018_v63, %v12581_v54  ;;  %v12584_v31 = vand.u32 4294901760, %v11039_v30  ;;  %v4512_v5 = vand.u32 4294901760, %v4511_v60  ;;  %v12586_v12 = vand.u32 4294901760, %v11045_v53 }
 0x399   : > { %13269 = vst [vmem:[#allocation24_spill] sm:$0xff] %v11045_v53  ;;  %13270 = vst [vmem:[#allocation4_spill] sm:$0xff] %v11049_v22  ;;  %v12585_v40 = vand.u32 4294901760, %v11049_v22  ;;  %v11065_v15 = vsub.f32 %v6396_v41, %v4397_v9  ;;  %v4631_v46 = vand.u32 4294901760, %v4630_v4  ;;  %v11072_v54 = vpack.c.bf16 %v4337_v35, %v4334_v44 }
 0x39a   : > { %v4638_v6 = vand.u32 4294901760, %v4637_v58  ;;  %v4518_v21 = vsub.f32 %v11039_v30, %v12584_v31  ;;  %v7842_v57 = vpack.c.bf16 %v4512_v5, %v4505_v52  ;;  %v4525_v16 = vsub.f32 %v11045_v53, %v12586_v12 }
 0x39b   : > { %13271 = vst [vmem:[#allocation21_spill] sm:$0xff] %v11065_v15  ;;  %13272 = vst [vmem:[#allocation18_spill] sm:$0xff] %v11072_v54  ;;  %v4644_v41 = vsub.f32 %v11049_v22, %v12585_v40  ;;  %v4650_v60 = vand.u32 4294901760, %v11065_v15  ;;  %v13273_v4 = vcombine.high %v10870_v38, %v10859_v1  ;;  %7811 = vmatpush3.bf16.msra.mxu0 %v11072_v54  ;;  %v4346_v44 = vand.u32 4294901760, %v6379_v11 }
 0x39c   : > { %v7844_v58 = vpack.c.bf16 %v4638_v6, %v4631_v46  ;;  %v4519_v31 = vand.u32 4294901760, %v4518_v21  ;;  %v4349_v35 = vand.u32 4294901760, %v6380_v36  ;;  %v13274_v52 = vcombine.high %v10885_v61, %v10894_v2  ;;  %7843 = vmatpush3.bf16.msra.mxu1 %v7842_v57  ;;  %v11215_v61 = vld [vmem:[%s8269_s24 + $0x398] sm:$0xff] }
 0x39d   : > { %4208 = vrot.lane.b32.xlu0 %v13273_v4, %s8227_s23  ;;  %v4526_v5 = vand.u32 4294901760, %v4525_v16  ;;  %v4645_v40 = vand.u32 4294901760, %v4644_v41  ;;  %v4651_v12 = vsub.f32 %v11065_v15, %v4650_v60  ;;  %v11093_v1 = vpack.c.bf16 %v4391_v59, %v4388_v8  ;;  %13309 = vst [vmem:[#allocation62_spill] sm:$0xff] %v11215_v61  ;;  %v13310_v21 = vld [vmem:[#allocation25_spill] sm:$0xff] }
 0x39e   : > { %4184 = vrot.lane.b32.xlu1 %v13274_v52, %s8227_s23  ;;  %7845 = vmatprep.subr.bf16.mxu1 %v7844_v58  ;;  %v11095_v38 = vsub.f32 %v6379_v11, %v4346_v44  ;;  %v11097_v6 = vsub.f32 %v6380_v36, %v4349_v35  ;;  %v11104_v57 = vpack.c.bf16 %v4343_v20, %v4340_v50 }
 0x39f   : > { %v7846_v2 = vpack.c.bf16 %v4526_v5, %v4519_v31  ;;  %v4652_v46 = vand.u32 4294901760, %v4651_v12  ;;  %7813 = vmatprep.subr.bf16.mxu0 %v11093_v1  ;;  %v11106_v16 = vpack.c.bf16 %v4397_v9, %v4394_v55  ;;  %v13277_v8 = vcombine.high %v10945_v43, %v10948_v62  ;;  %v11206_v9 = vld [vmem:[%s8269_s24 + $0x390] sm:$0xff]  ;;  %v13305_v55 = vld [vmem:[#allocation57_spill] sm:$0xff] }
 0x3a0   : > { %13275 = vst [vmem:[#allocation5_spill] sm:$0xff] %v11095_v38  ;;  %13276 = vst [vmem:[#allocation76_spill] sm:$0xff] %v11097_v6  ;;  %v13278_v59 = vcombine.high %v10903_v28, %v10909_v10  ;;  %v4531_v36 = vand.u32 4294901760, %v11095_v38  ;;  %v4538_v12 = vand.u32 4294901760, %v11097_v6  ;;  %v13279_v31 = vcombine.high %v10969_v0, %v10972_v32  ;;  %7815 = vmatpush3.bf16.msra.mxu0 %v11104_v57  ;;  %v13312_v32 = vld [vmem:[#allocation69_spill] sm:$0xff]  ;;  %v13314_v43 = vld [vmem:[#allocation48_spill] sm:$0xff] }
 0x3a1   : > { %4194 = vrot.lane.b32.xlu0 %v13277_v8, %s8225_s21  ;;  %v4116_v50 = vcombine.low %v10958_v18, %v10961_v24  ;;  %7847 = vmatpush3.bf16.msra.mxu1 %v7846_v2  ;;  %v7848_v20 = vpack.c.bf16 %v4652_v46, %v4645_v40  ;;  %v11129_v10 = vpack.c.bf16 %v4349_v35, %v4346_v44  ;;  %v11203_v44 = vld [vmem:[%s8269_s24 + $0x308] sm:$0xff]  ;;  %v13313_v0 = vld [vmem:[#allocation33_spill] sm:$0xff] }
 0x3a2   : > { %v4061_v11 = vrot.slane %v13278_v59, %v13237_v25  ;;  %4170 = vrot.lane.b32.xlu1 %v13279_v31, %s8225_s21  ;;  %v4532_v28 = vsub.f32 %v11095_v38, %v4531_v36  ;;  %v4539_v25 = vsub.f32 %v11097_v6, %v4538_v12  ;;  %7817 = vmatprep.subr.bf16.mxu0 %v11106_v16  ;;  %v13307_v59 = vld [vmem:[#allocation60_spill] sm:$0xff]  ;;  %v13308_v46 = vld [vmem:[#allocation19_spill] sm:$0xff]  ;;  %v11335_v6 = vld [vmem:[%s8269_s24 + $0x3b8] sm:$0xff] }
 0x3a3   : > { %7849 = vmatprep.subr.bf16.mxu1 %v7848_v20  ;;  %v7852_v40 = vpack.c.bf16 %v10297_v13, %v10295_v17  ;;  %v4117_v52 = vcombine.high %v10958_v18, %v10961_v24  ;;  %v13280_v24 = vld [vmem:[#allocation61_spill] sm:$0xff]  ;;  %v13283_v20 = vld [vmem:[#allocation28_spill] sm:$0xff]  ;;  %13301 = vst [vmem:[#allocation85_spill] sm:$0xff] %v11203_v44  ;;  %13302 = vst [vmem:[#allocation63_spill] sm:$0xff] %v11206_v9  ;;  %v13318_v2 = vcombine.low %v10750_v29, %v10753_v51 }
 0x3a4   : > { %v4112_v41 = vcombine.low %v4061_v11, %v11006_v33  ;;  %v4533_v4 = vand.u32 4294901760, %v4532_v28  ;;  %v4540_v58 = vand.u32 4294901760, %v4539_v25  ;;  %7819 = vmatpush3.bf16.msra.mxu0 %v11129_v10  ;;  %v4113_v8 = vcombine.high %v4061_v11, %v11006_v33  ;;  %v13281_v33 = vld [vmem:[#allocation7_spill] sm:$0xff]  ;;  %v13282_v11 = vld [vmem:[#allocation9_spill] sm:$0xff]  ;;  %v13284_v28 = vld [vmem:[#allocation32_spill] sm:$0xff]  ;;  %13347 = vst [vmem:[#allocation6_spill] sm:$0xff] %v11335_v6 }
 0x3a5   : > { %4202 = vrot.lane.b32.xlu0 %v4116_v50, %s8226_s22  ;;  %7853 = vmatprep.subr.bf16.mxu0 %v7852_v40  ;;  %v3274_v50 = vmul.f32 %v13282_v11, %v13281_v33  ;;  %v3275_v25 = vmul.f32 %v13284_v28, %v13283_v20  ;;  %v13286_v40 = vand.u32 4294901760, %v10985_v14  ;;  %v13292_v33 = vand.u32 4294901760, %v11039_v30  ;;  %v13306_v18 = vld [vmem:[#allocation73_spill] sm:$0xff]  ;;  %v13354_v30 = vld [vmem:[#allocation50_spill] sm:$0xff] }
 0x3a6   : > { %4178 = vrot.lane.b32.xlu1 %v4112_v41, %s8226_s22  ;;  %v7850_v5 = vpack.c.bf16 %v4540_v58, %v4533_v4  ;;  %v13287_v4 = vand.u32 4294901760, %v11009_v42  ;;  %v13293_v11 = vand.u32 4294901760, %v11045_v53  ;;  %v11190_v28 = vpack.c.bf16 %v4538_v12, %v4531_v36  ;;  %v13303_v36 = vld [vmem:[#allocation29_spill] sm:$0xff]  ;;  %v13304_v12 = vld [vmem:[#allocation78_spill] sm:$0xff] }
 0x3a7   : > { %v11164_v41 = vpack.c.bf16 %v3275_v25, %v3274_v50  ;;  %v13295_v50 = vand.u32 4294901760, %v11049_v22  ;;  %v13320_v45 = vcombine.low %v10764_v34, %v10767_v48 }
 0x3a8   : > { %7851 = vmatpush3.bf16.msra.mxu1 %v7850_v5  ;;  %v11170_v58 = vpack.c.bf16 %v13287_v4, %v13286_v40  ;;  %v13290_v5 = vand.u32 4294901760, %v11018_v63  ;;  %v11182_v35 = vpack.c.bf16 %v13293_v11, %v13292_v33  ;;  %13297 = vst [vmem:[#allocation43_spill] sm:$0xff] %v11190_v28  ;;  %v11193_v4 = vld [vmem:[%s8269_s24 + $0x380] sm:$0xff]  ;;  %v13311_v33 = vld [vmem:[#allocation8_spill] sm:$0xff] }
 0x3a9   : > { %4210 = vrot.lane.b32.xlu0 %v4117_v52, %s8227_s23  ;;  %7885 = vmatprep.subr.bf16.mxu1 %v13280_v24  ;;  %13285 = vst [vmem:[#allocation2_spill] sm:$0xff] %v11164_v41  ;;  %v13289_v52 = vand.u32 4294901760, %v11015_v26  ;;  %v11188_v20 = vpack.c.bf16 %v4650_v60, %v13295_v50  ;;  %13298 = vst [vmem:[#allocation44_spill] sm:$0xff] %v11193_v4  ;;  %v11200_v11 = vld [vmem:[%s8269_s24 + $0x300] sm:$0xff]  ;;  %v11225_v50 = vld [vmem:[%s8269_s24 + $0x310] sm:$0xff]  ;;  %v13321_v29 = vand.u32 4294901760, %v11193_v4 }
 0x3aa   : > { %4186 = vrot.lane.b32.xlu1 %v4113_v8, %s8227_s23  ;;  %13288 = vst [vmem:[#allocation40_spill] sm:$0xff] %v11170_v58  ;;  %13294 = vst [vmem:[#allocation41_spill] sm:$0xff] %v11182_v35  ;;  %v12595_v41 = vand.u32 4294901760, %v11200_v11 }
 0x3ab   : > { %v11176_v8 = vpack.c.bf16 %v13290_v5, %v13289_v52  ;;  %13296 = vst [vmem:[#allocation82_spill] sm:$0xff] %v11188_v20  ;;  %v11196_v52 = vld [vmem:[%s8269_s24 + $0x388] sm:$0xff]  ;;  %13300 = vst [vmem:[#allocation84_spill] sm:$0xff] %v11200_v11  ;;  %v11228_v20 = vld [vmem:[%s8269_s24 + $0x318] sm:$0xff]  ;;  %v11248_v51 = vsub.f32 %v11193_v4, %v13321_v29  ;;  %v13337_v4 = vand.u32 4294901760, %v11225_v50 }
 0x3ac   : > { %13299 = vst [vmem:[#allocation42_spill] sm:$0xff] %v11196_v52  ;;  %13316 = vst [vmem:[#allocation53_spill] sm:$0xff] %v11225_v50  ;;  %v13339_v37 = vand.u32 4294901760, %v11228_v20 }
 0x3ad   : > { %13291 = vst [vmem:[#allocation3_spill] sm:$0xff] %v11176_v8  ;;  %13317 = vst [vmem:[#allocation87_spill] sm:$0xff] %v11228_v20  ;;  %v11238_v8 = vld [vmem:[%s8269_s24 + $0x3a0] sm:$0xff] }
 0x3ae   : > { %13319 = vst [vmem:[#allocation54_spill] sm:$0xff] %v11238_v8 }
 0x3ea   : > { %v4145_v25 = vpop.permute.xlu0 %4144 }
 0x3eb   : > { %v4121_v40 = vpop.permute.xlu1 %4120  ;;  %v4220_v31 = vsel %vm1335_vm2, %v13318_v2, %v4145_v25  ;;  %v13334_v2 = vld [vmem:[#allocation46_spill] sm:$0xff] }
 0x3ec   : > { %v4214_v28 = vsel %vm1335_vm2, %v13320_v45, %v4121_v40  ;;  %v11256_v45 = vld [vmem:[%s8269_s24 + $0x3a8] sm:$0xff] }
 0x3ed   : > { %13322 = vst [vmem:[#allocation58_spill] sm:$0xff] %v11256_v45  ;;  %v13349_v17 = vand.u32 4294901760, %v11256_v45 }
 0x3ee   : > { %v4153_v5 = vpop.permute.xlu0 %4152 }
 0x3ef   : > { %v4129_v60 = vpop.permute.xlu1 %4128  ;;  %v4222_v58 = vsel %vm1338_vm3, %v4220_v31, %v4153_v5  ;;  %v13324_v5 = vand.u32 4294901760, %v11196_v52 }
 0x3f0   : > { %v4216_v25 = vsel %vm1338_vm3, %v4214_v28, %v4129_v60 }
 0x3f1   : > { %v11264_v29 = vsub.f32 %v11196_v52, %v13324_v5  ;;  %v11285_v5 = vld [vmem:[%s8269_s24 + $0x320] sm:$0xff] }
 0x3f2   : > { %v4161_v3 = vpop.permute.xlu0 %4160  ;;  %13332 = vst [vmem:[#allocation26_spill] sm:$0xff] %v11285_v5 }
 0x3f3   : > { %v4224_v62 = vsel %vm1341_vm4, %v4222_v58, %v4161_v3  ;;  %v4137_v35 = vpop.permute.xlu1 %4136  ;;  %13325 = vst [vmem:[#allocation64_spill] sm:$0xff] %v11264_v29  ;;  %v11272_v3 = vsub.f32 %v11200_v11, %v12595_v41  ;;  %v13328_v58 = vand.u32 4294901760, %v11203_v44  ;;  %v13333_v41 = vld [vmem:[#allocation52_spill] sm:$0xff]  ;;  %v11307_v11 = vsub.f32 %v11225_v50, %v13337_v4 }
 0x3f4   : > { %v11258_v31 = vand.u32 4294901760, %v4224_v62  ;;  %v4218_v40 = vsel %vm1341_vm4, %v4216_v25, %v4137_v35  ;;  %v13330_v35 = vand.u32 4294901760, %v11206_v9 }
 0x3f5   : > { %v11267_v60 = vand.u32 4294901760, %v4218_v40  ;;  %13327 = vst [vmem:[#allocation20_spill] sm:$0xff] %v11272_v3  ;;  %v11277_v48 = vsub.f32 %v11203_v44, %v13328_v58  ;;  %v13335_v58 = vand.u32 4294901760, %v11215_v61  ;;  %13338 = vst [vmem:[#allocation27_spill] sm:$0xff] %v11307_v11 }
 0x3f6   : > { %13323 = vst [vmem:[#allocation59_spill] sm:$0xff] %v11258_v31  ;;  %v11282_v25 = vsub.f32 %v11206_v9, %v13330_v35  ;;  %v11288_v28 = vsub.f32 %v4224_v62, %v11258_v31  ;;  %v4147_v34 = vpop.permute.xlu0 %4146  ;;  %4655 = vmatprep.mubr.f32.mxu1 %v11258_v31  ;;  %v11315_v35 = vld [vmem:[%s8269_s24 + $0x328] sm:$0xff]  ;;  %v13343_v62 = vand.u32 4294901760, %v11238_v8  ;;  %v11327_v31 = vld [vmem:[%s8269_s24 + $0x3b0] sm:$0xff] }
 0x3f7   : > { %13326 = vst [vmem:[#allocation75_spill] sm:$0xff] %v11267_v60  ;;  %13329 = vst [vmem:[#allocation22_spill] sm:$0xff] %v11277_v48  ;;  %v11296_v44 = vsub.f32 %v11215_v61, %v13335_v58  ;;  %v11300_v9 = vsub.f32 %v4218_v40, %v11267_v60  ;;  %v4123_v52 = vpop.permute.xlu1 %4122  ;;  %4657 = vmatmul.mubr.f32.vlgmr.msra.gmra.mrb[26].mxu1 %v11267_v60  ;;  %v11312_v58 = vsub.f32 %v11228_v20, %v13339_v37  ;;  %v13342_v40 = vld [vmem:[#allocation66_spill] sm:$0xff]  ;;  %v13346_v20 = vld [vmem:[#allocation31_spill] sm:$0xff] }
 0x3f8   : > { %13331 = vst [vmem:[#allocation67_spill] sm:$0xff] %v11282_v25  ;;  %13341 = vst [vmem:[#allocation13_spill] sm:$0xff] %v11315_v35  ;;  %7887 = vmatpush3.bf16.msra.mxu1 %v13342_v40  ;;  %v11323_v4 = vsub.f32 %v11238_v8, %v13343_v62  ;;  %v13348_v62 = vand.u32 4294901760, %v11288_v28  ;;  %v11344_v37 = vsub.f32 %v11256_v45, %v13349_v17  ;;  %v11351_v61 = vld [vmem:[%s8269_s24 + $0x338] sm:$0xff]  ;;  %v13355_v45 = vand.u32 4294901760, %v11285_v5  ;;  %v13358_v40 = vld [vmem:[#allocation34_spill] sm:$0xff] }
 0x3f9   : > { %13336 = vst [vmem:[#allocation80_spill] sm:$0xff] %v11296_v44  ;;  %13340 = vst [vmem:[#allocation81_spill] sm:$0xff] %v11312_v58  ;;  %7889 = vmatprep.subr.bf16.mxu1 %v13346_v20  ;;  %v11348_v20 = vld [vmem:[%s8269_s24 + $0x330] sm:$0xff]  ;;  %v13353_v60 = vand.u32 4294901760, %v11300_v9 }
 0x3fa   : > { %13344 = vst [vmem:[#allocation35_spill] sm:$0xff] %v11323_v4  ;;  %13345 = vst [vmem:[#allocation38_spill] sm:$0xff] %v11327_v31  ;;  %v4155_v13 = vpop.permute.xlu0 %4154  ;;  %v4402_v8 = vsub.f32 %v11288_v28, %v13348_v62  ;;  %v11364_v53 = vsub.f32 %v11285_v5, %v13355_v45  ;;  %v13357_v62 = vcombine.low %v10783_v19, %v10795_v7  ;;  %v13360_v7 = vand.u32 4294901760, %v11315_v35 }
 0x3fb   : > { %13350 = vst [vmem:[#allocation39_spill] sm:$0xff] %v11344_v37  ;;  %13351 = vst [vmem:[#allocation37_spill] sm:$0xff] %v11348_v20  ;;  %v4408_v22 = vsub.f32 %v11300_v9, %v13353_v60  ;;  %v13359_v45 = vcombine.low %v10806_v23, %v10821_v49  ;;  %v13362_v23 = vand.u32 4294901760, %v11327_v31  ;;  %v11393_v49 = vld [vmem:[%s8269_s24 + $0x3c0] sm:$0xff] }
 0x3fc   : > { %13352 = vst [vmem:[#allocation12_spill] sm:$0xff] %v11351_v61  ;;  %v4131_v15 = vpop.permute.xlu1 %4130  ;;  %7891 = vmatpush3.bf16.msra.mxu1 %v13354_v30  ;;  %v4403_v17 = vand.u32 4294901760, %v4402_v8  ;;  %13356 = vst [vmem:[#allocation11_spill] sm:$0xff] %v11364_v53  ;;  %v4221_v50 = vsel %vm1335_vm2, %v13357_v62, %v4147_v34  ;;  %v11383_v34 = vsub.f32 %v11315_v35, %v13360_v7  ;;  %v13391_v35 = vand.u32 4294901760, %v11307_v11  ;;  %v13423_v11 = vld [vmem:[#allocation86_spill] sm:$0xff] }
 0x3fd   : > { %v4409_v60 = vand.u32 4294901760, %v4408_v22  ;;  %7893 = vmatprep.subr.bf16.mxu1 %v13358_v40  ;;  %v4215_v5 = vsel %vm1335_vm2, %v13359_v45, %v4123_v52  ;;  %v4223_v22 = vsel %vm1338_vm3, %v4221_v50, %v4155_v13  ;;  %v11390_v13 = vsub.f32 %v11327_v31, %v13362_v23  ;;  %13364 = vst [vmem:[#allocation56_spill] sm:$0xff] %v11393_v49  ;;  %v11396_v52 = vld [vmem:[%s8269_s24 + $0x3c8] sm:$0xff]  ;;  %v11417_v23 = vld [vmem:[%s8269_s24 + $0x340] sm:$0xff] }
 0x3fe   : > { %v4163_v24 = vpop.permute.xlu0 %4162  ;;  %4404 = vmatprep.mubr.f32.mxu0 %v4403_v17  ;;  %13361 = vst [vmem:[#allocation30_spill] sm:$0xff] %v11383_v34  ;;  %v4217_v62 = vsel %vm1338_vm3, %v4215_v5, %v4131_v15  ;;  %13365 = vst [vmem:[#allocation7_spill] sm:$0xff] %v11396_v52  ;;  %v13366_v50 = vand.u32 4294901760, %v11248_v51  ;;  %v13367_v17 = vand.u32 4294901760, %v11264_v29  ;;  %v13370_v5 = vpack.c.bf16 %v13304_v12, %v13303_v36 }
 0x3ff   : > { %v4225_v38 = vsel %vm1341_vm4, %v4223_v22, %v4163_v24  ;;  %4410 = vmatmul.mubr.f32.vlgmr.msra.gmra.mrb[26].mxu0 %v4409_v60  ;;  %13363 = vst [vmem:[#allocation55_spill] sm:$0xff] %v11390_v13  ;;  %v13371_v60 = vld [vmem:[#allocation36_spill] sm:$0xff]  ;;  %v13372_v22 = vand.u32 4294901760, %v11335_v6  ;;  %13374 = vst [vmem:[#allocation29_spill] sm:$0xff] %v11417_v23 }
 0x400   : > { %v4139_v8 = vpop.permute.xlu1 %4138  ;;  %v11402_v45 = vpack.c.bf16 %v13367_v17, %v13366_v50  ;;  %v11404_v15 = vand.u32 4294901760, %v4225_v38  ;;  %7855 = vmatpush3.bf16.msra.mxu0 %v13370_v5  ;;  %7895 = vmatpush3.bf16.msra.mxu1 %v13371_v60  ;;  %v13375_v50 = vand.u32 4294901760, %v11272_v3  ;;  %v13376_v17 = vand.u32 4294901760, %v11277_v48  ;;  %v13380_v5 = vld [vmem:[#allocation15_spill] sm:$0xff]  ;;  %v13424_v48 = vld [vmem:[#allocation65_spill] sm:$0xff] }
 0x401   : > { %v4219_v24 = vsel %vm1341_vm4, %v4217_v62, %v4139_v8  ;;  %v11414_v7 = vsub.f32 %v11335_v6, %v13372_v22  ;;  %v13379_v62 = vpack.c.bf16 %v13306_v18, %v13305_v55  ;;  %7897 = vmatprep.subr.bf16.mxu1 %v13380_v5  ;;  %v7870_v3 = vpack.c.bf16 %v13424_v48, %v13423_v11 }
 0x402   : > { %13368 = vst [vmem:[#allocation9_spill] sm:$0xff] %v11402_v45  ;;  %13369 = vst [vmem:[#allocation28_spill] sm:$0xff] %v11404_v15  ;;  %v11423_v19 = vpack.c.bf16 %v13376_v17, %v13375_v50  ;;  %v11425_v8 = vand.u32 4294901760, %v4219_v24  ;;  %v13381_v45 = vand.u32 4294901760, %v11348_v20  ;;  %v13383_v50 = vand.u32 4294901760, %v11351_v61  ;;  %4662 = vmatprep.mubr.f32.mxu1 %v11404_v15 }
 0x403   : > { %13373 = vst [vmem:[#allocation32_spill] sm:$0xff] %v11414_v7  ;;  %7857 = vmatprep.subr.bf16.mxu0 %v13379_v62  ;;  %v11446_v31 = vsub.f32 %v4225_v38, %v11404_v15  ;;  %v11461_v38 = vld [vmem:[%s8269_s24 + $0x3d8] sm:$0xff]  ;;  %v13389_v62 = vand.u32 4294901760, %v11296_v44  ;;  %v13399_v44 = vand.u32 4294901760, %v11323_v4  ;;  %v13404_v4 = vand.u32 4294901760, %v11383_v34 }
 0x404   : > { %13377 = vst [vmem:[#allocation78_spill] sm:$0xff] %v11423_v19  ;;  %13378 = vst [vmem:[#allocation57_spill] sm:$0xff] %v11425_v8  ;;  %v11435_v6 = vsub.f32 %v11348_v20, %v13381_v45  ;;  %v11440_v17 = vsub.f32 %v11351_v61, %v13383_v50  ;;  %v11443_v19 = vld [vmem:[%s8269_s24 + $0x348] sm:$0xff]  ;;  %v11453_v45 = vsub.f32 %v4219_v24, %v11425_v8  ;;  %4664 = vmatmul.mubr.f32.gmra.mrb[28].mxu1 %v11425_v8  ;;  %v11458_v61 = vld [vmem:[%s8269_s24 + $0x3d0] sm:$0xff] }
 0x405   : > { %13385 = vst [vmem:[#allocation19_spill] sm:$0xff] %v11443_v19  ;;  %13386 = vst [vmem:[#allocation25_spill] sm:$0xff] %v11458_v61  ;;  %v13388_v20 = vand.u32 4294901760, %v11282_v25  ;;  %v13392_v24 = vand.u32 4294901760, %v11312_v58  ;;  %v13394_v50 = vpack.c.bf16 %v13308_v46, %v13307_v59  ;;  %7899 = vmatpush3.bf16.msra.mxu1 %v10939_v27  ;;  %v11492_v8 = vld [vmem:[%s8269_s24 + $0x350] sm:$0xff]  ;;  %v11495_v25 = vld [vmem:[%s8269_s24 + $0x358] sm:$0xff] }
 0x406   : > { %13382 = vst [vmem:[#allocation73_spill] sm:$0xff] %v11435_v6  ;;  %13384 = vst [vmem:[#allocation60_spill] sm:$0xff] %v11440_v17  ;;  %7901 = vmatprep.subr.bf16.mxu1 %v10979_v39  ;;  %v13425_v29 = vand.u32 4294901760, %v11458_v61 }
 0x407   : > { %13387 = vst [vmem:[#allocation8_spill] sm:$0xff] %v11461_v38  ;;  %v11467_v22 = vpack.c.bf16 %v13389_v62, %v13388_v20  ;;  %v11473_v15 = vpack.c.bf16 %v13392_v24, %v13391_v35  ;;  %7859 = vmatpush3.bf16.msra.mxu0 %v13394_v50  ;;  %v13395_v62 = vand.u32 4294901760, %v11288_v28  ;;  %v13396_v35 = vpack.c.bf16 %v13311_v33, %v13310_v21 }
 0x408   : > { %13397 = vst [vmem:[#allocation48_spill] sm:$0xff] %v11492_v8  ;;  %13398 = vst [vmem:[#allocation51_spill] sm:$0xff] %v11495_v25  ;;  %v13400_v20 = vand.u32 4294901760, %v11344_v37  ;;  %v13403_v24 = vand.u32 4294901760, %v11364_v53  ;;  %v13410_v50 = vand.u32 4294901760, %v11417_v23  ;;  %v13419_v53 = vld [vmem:[#allocation83_spill] sm:$0xff] }
 0x409   : > { %13390 = vst [vmem:[#allocation69_spill] sm:$0xff] %v11467_v22  ;;  %13393 = vst [vmem:[#allocation33_spill] sm:$0xff] %v11473_v15  ;;  %4915 = vmatprep.mubr.f32.mxu1 %v13395_v62  ;;  %7861 = vmatprep.subr.bf16.mxu0 %v13396_v35  ;;  %v13402_v62 = vand.u32 4294901760, %v11446_v31 }
 0x40a   : > { %v11501_v22 = vpack.c.bf16 %v13400_v20, %v13399_v44  ;;  %v11513_v58 = vpack.c.bf16 %v13404_v4, %v13403_v24  ;;  %v13406_v44 = vand.u32 4294901760, %v11453_v45  ;;  %v11531_v34 = vsub.f32 %v11417_v23, %v13410_v50  ;;  %7903 = vmatpush3.bf16.msra.mxu1 %v10993_v47  ;;  %v11548_v50 = vld [vmem:[%s8269_s24 + $0x3e8] sm:$0xff]  ;;  %v13417_v23 = vld [vmem:[#allocation72_spill] sm:$0xff] }
 0x40b   : > { %v4417_v35 = vsub.f32 %v11446_v31, %v13402_v62  ;;  %v13408_v62 = vand.u32 4294901760, %v11396_v52  ;;  %v13411_v4 = vpack.c.bf16 %v13313_v0, %v13312_v32  ;;  %13415 = vst [vmem:[#allocation15_spill] sm:$0xff] %v11548_v50  ;;  %7905 = vmatprep.subr.bf16.mxu1 %v13417_v23 }
 0x40c   : > { %13401 = vst [vmem:[#allocation52_spill] sm:$0xff] %v11501_v22  ;;  %13405 = vst [vmem:[#allocation46_spill] sm:$0xff] %v11513_v58  ;;  %v4423_v20 = vsub.f32 %v11453_v45, %v13406_v44  ;;  %v13407_v22 = vand.u32 4294901760, %v11393_v49 }
 0x40d   : > { %v11526_v15 = vsub.f32 %v11396_v52, %v13408_v62  ;;  %7863 = vmatpush3.bf16.msra.mxu0 %v13411_v4  ;;  %v4418_v24 = vand.u32 4294901760, %v4417_v35  ;;  %v11545_v52 = vld [vmem:[%s8269_s24 + $0x3e0] sm:$0xff]  ;;  %v13416_v4 = vpack.c.bf16 %v13315_v56, %v13314_v43  ;;  %v13421_v62 = vand.u32 4294901760, %v11414_v7 }
 0x40e   : > { %v11521_v37 = vsub.f32 %v11393_v49, %v13407_v22  ;;  %v13412_v22 = vand.u32 4294901760, %v11443_v19  ;;  %13414 = vst [vmem:[#allocation36_spill] sm:$0xff] %v11545_v52  ;;  %v4424_v35 = vand.u32 4294901760, %v4423_v20  ;;  %v13418_v49 = vld [vmem:[#allocation45_spill] sm:$0xff]  ;;  %v13427_v20 = vand.u32 4294901760, %v11461_v38  ;;  %7907 = vmatpush3.bf16.msra.mxu1 %v11072_v54 }
 0x40f   : > { %13409 = vst [vmem:[#allocation50_spill] sm:$0xff] %v11526_v15  ;;  %7865 = vmatprep.subr.bf16.mxu0 %v13416_v4  ;;  %4419 = vmatprep.mubr.f32.mxu0 %v4418_v24  ;;  %v11567_v4 = vsub.f32 %v11458_v61, %v13425_v29  ;;  %v13431_v24 = vand.u32 4294901760, %v11440_v17  ;;  %v13437_v61 = vand.u32 4294901760, %v11495_v25  ;;  %v13444_v17 = vand.u32 4294901760, %v11526_v15 }
 0x410   : > { %v11540_v44 = vsub.f32 %v11443_v19, %v13412_v22  ;;  %v7868_v22 = vpack.c.bf16 %v13419_v53, %v13418_v49  ;;  %v13420_v19 = vand.u32 4294901760, %v11390_v13  ;;  %v11572_v23 = vsub.f32 %v11461_v38, %v13427_v20  ;;  %v11575_v13 = vld [vmem:[%s8269_s24 + $0x360] sm:$0xff]  ;;  %4425 = vmatmul.mubr.f32.gmra.mrb[28].mxu0 %v4424_v35  ;;  %v11588_v20 = vld [vmem:[%s8269_s24 + $0x368] sm:$0xff]  ;;  %7909 = vmatprep.subr.bf16.mxu1 %v11093_v1 }
 0x411   : > { %13426 = vst [vmem:[#allocation83_spill] sm:$0xff] %v11567_v4  ;;  %13429 = vst [vmem:[#allocation65_spill] sm:$0xff] %v11575_v13  ;;  %v13434_v38 = vpack.c.bf16 %v13334_v2, %v13333_v41  ;;  %v11604_v7 = vsub.f32 %v11495_v25, %v13437_v61  ;;  %4799 = vmatprep.mubr.f32.mxu0 %v11288_v28  ;;  %v13441_v35 = vld [vmem:[#allocation74_spill] sm:$0xff]  ;;  %v11645_v25 = vld [vmem:[%s8269_s24 + $0x370] sm:$0xff]  ;;  %v13456_v28 = vand.u32 4294901760, %v11567_v4 }
 0x412   : > { %13413 = vst [vmem:[#allocation34_spill] sm:$0xff] %v11540_v44  ;;  %v11560_v58 = vpack.c.bf16 %v13421_v62, %v13420_v19  ;;  %13428 = vst [vmem:[#allocation86_spill] sm:$0xff] %v11572_v23  ;;  %v13430_v19 = vand.u32 4294901760, %v11435_v6  ;;  %v13447_v54 = vand.u32 4294901760, %v11540_v44  ;;  %7911 = vmatpush3.bf16.msra.mxu1 %v11104_v57  ;;  %v13457_v6 = vand.u32 4294901760, %v11572_v23 }
 0x413   : > { %13433 = vst [vmem:[#allocation89_spill] sm:$0xff] %v11588_v20  ;;  %7867 = vmatpush3.bf16.msra.mxu0 %v13434_v38  ;;  %13438 = vst [vmem:[#allocation91_spill] sm:$0xff] %v11604_v7  ;;  %v11610_v38 = vld [vmem:[%s8269_s24 + $0x3f8] sm:$0xff]  ;;  %7913 = vmatprep.subr.bf16.mxu1 %v11106_v16 }
 0x414   : > { %13422 = vst [vmem:[#allocation45_spill] sm:$0xff] %v11560_v58  ;;  %v11581_v62 = vpack.c.bf16 %v13431_v24, %v13430_v19  ;;  %v13435_v24 = vand.u32 4294901760, %v11492_v8  ;;  %v11607_v58 = vld [vmem:[%s8269_s24 + $0x3f0] sm:$0xff]  ;;  %13440 = vst [vmem:[#allocation93_spill] sm:$0xff] %v11610_v38  ;;  %7869 = vmatprep.subr.bf16.mxu0 %v7868_v22  ;;  %v13442_v19 = vld [vmem:[#allocation79_spill] sm:$0xff]  ;;  %v13446_v22 = vand.u32 4294901760, %v11531_v34 }
 0x415   : > { %13439 = vst [vmem:[#allocation92_spill] sm:$0xff] %v11607_v58  ;;  %13453 = vst [vmem:[#allocation97_spill] sm:$0xff] %v11645_v25 }
 0x416   : > { %13432 = vst [vmem:[#allocation88_spill] sm:$0xff] %v11581_v62  ;;  %v11599_v29 = vsub.f32 %v11492_v8, %v13435_v24  ;;  %v7872_v62 = vpack.c.bf16 %v13442_v19, %v13441_v35  ;;  %v13443_v8 = vand.u32 4294901760, %v11521_v37  ;;  %v11630_v19 = vpack.c.bf16 %v13447_v54, %v13446_v22  ;;  %7915 = vmatpush3.bf16.msra.mxu1 %v11129_v10 }
 0x417   : > { %v13449_v24 = vand.u32 4294901760, %v11545_v52  ;;  %7871 = vmatpush3.bf16.msra.mxu0 %v7870_v3  ;;  %v13455_v22 = vand.u32 4294901760, %v11575_v13  ;;  %v13459_v3 = vand.u32 4294901760, %v11588_v20 }
 0x418   : > { %13436 = vst [vmem:[#allocation90_spill] sm:$0xff] %v11599_v29  ;;  %v11620_v61 = vpack.c.bf16 %v13444_v17, %v13443_v8  ;;  %13448 = vst [vmem:[#allocation94_spill] sm:$0xff] %v11630_v19  ;;  %v13451_v8 = vand.u32 4294901760, %v11548_v50  ;;  %7873 = vmatprep.subr.bf16.mxu0 %v7872_v62  ;;  %v11663_v19 = vpack.c.bf16 %v13457_v6, %v13456_v28  ;;  %v13464_v28 = vand.u32 4294901760, %v11607_v58 }
 0x419   : > { %v11635_v15 = vsub.f32 %v11545_v52, %v13449_v24  ;;  %v11668_v54 = vsub.f32 %v11588_v20, %v13459_v3  ;;  %v13466_v3 = vand.u32 4294901760, %v11610_v38  ;;  %v13468_v24 = vpack.c.bf16 %v11009_v42, %v10985_v14 }
 0x41a   : > { %13445 = vst [vmem:[#allocation74_spill] sm:$0xff] %v11620_v61  ;;  %v11640_v17 = vsub.f32 %v11548_v50, %v13451_v8  ;;  %v11648_v61 = vld [vmem:[%s8269_s24 + $0x378] sm:$0xff]  ;;  %v11657_v8 = vsub.f32 %v11575_v13, %v13455_v22  ;;  %13458 = vst [vmem:[#allocation99_spill] sm:$0xff] %v11663_v19  ;;  %v13461_v50 = vand.u32 4294901760, %v11599_v29  ;;  %v13462_v22 = vand.u32 4294901760, %v11604_v7 }
 0x41b   : > { %13450 = vst [vmem:[#allocation95_spill] sm:$0xff] %v11635_v15  ;;  %13454 = vst [vmem:[#allocation98_spill] sm:$0xff] %v11648_v61  ;;  %v12674_v52 = vand.u32 4294901760, %v11635_v15  ;;  %v11683_v19 = vsub.f32 %v11607_v58, %v13464_v28  ;;  %v11688_v62 = vsub.f32 %v11610_v38, %v13466_v3  ;;  %7875 = vmatpush3.bf16.msra.mxu0 %v13468_v24  ;;  %v13472_v14 = vand.u32 4294901760, %v11645_v25  ;;  %v13488_v58 = vld [vmem:[#allocation77_spill] sm:$0xff] }
 0x41c   : > { %13452 = vst [vmem:[#allocation96_spill] sm:$0xff] %v11640_v17  ;;  %13460 = vst [vmem:[#allocation100_spill] sm:$0xff] %v11668_v54  ;;  %v11676_v13 = vpack.c.bf16 %v13462_v22, %v13461_v50  ;;  %v12673_v6 = vand.u32 4294901760, %v11640_v17  ;;  %v13469_v50 = vpack.c.bf16 %v11018_v63, %v11015_v26  ;;  %v13470_v22 = vld [vmem:[#allocation61_spill] sm:$0xff]  ;;  %v13473_v26 = vand.u32 4294901760, %v11648_v61 }
 0x41d   : > { %13465 = vst [vmem:[#allocation102_spill] sm:$0xff] %v11683_v19  ;;  %13467 = vst [vmem:[#allocation103_spill] sm:$0xff] %v11688_v62  ;;  %7949 = vmatprep.subr.bf16.mxu1 %v13470_v22  ;;  %v11709_v42 = vsub.f32 %v11645_v25, %v13472_v14  ;;  %v13474_v24 = vand.u32 4294901760, %v11300_v9  ;;  %v13478_v3 = vand.u32 4294901760, %v11446_v31  ;;  %v13479_v14 = vand.u32 4294901760, %v11657_v8  ;;  %v13484_v25 = vld [vmem:[#allocation4_spill] sm:$0xff] }
 0x41e   : > { %13463 = vst [vmem:[#allocation101_spill] sm:$0xff] %v11676_v13  ;;  %7877 = vmatprep.subr.bf16.mxu0 %v13469_v50  ;;  %v11702_v28 = vpack.c.bf16 %v12673_v6, %v12674_v52  ;;  %v11714_v63 = vsub.f32 %v11648_v61, %v13473_v26  ;;  %v13475_v6 = vld [vmem:[#allocation24_spill] sm:$0xff]  ;;  %v13476_v52 = vld [vmem:[#allocation49_spill] sm:$0xff]  ;;  %v13482_v61 = vld [vmem:[#allocation66_spill] sm:$0xff] }
 0x41f   : > { %4919 = vmatmul.mubr.f32.vlgmr.msra.gmra.mrb[30].mxu1 %v13474_v24  ;;  %v13477_v13 = vpack.c.bf16 %v13475_v6, %v13476_v52  ;;  %v13483_v24 = vld [vmem:[#allocation21_spill] sm:$0xff]  ;;  %v13486_v22 = vld [vmem:[#allocation23_spill] sm:$0xff]  ;;  %v13489_v52 = vand.u32 4294901760, %v13488_v58  ;;  %v13490_v6 = vand.u32 4294901760, %v11683_v19 }
 0x420   : > { %13471 = vst [vmem:[#allocation61_spill] sm:$0xff] %v11702_v28  ;;  %4926 = vmatprep.mubr.f32.mxu1 %v13478_v3  ;;  %v13480_v28 = vand.u32 4294901760, %v11668_v54  ;;  %7951 = vmatpush3.bf16.msra.mxu1 %v13482_v61  ;;  %v13485_v50 = vpack.c.bf16 %v13483_v24, %v13484_v25  ;;  %v13487_v38 = vand.u32 4294901760, %v13486_v22  ;;  %v13491_v3 = vand.u32 4294901760, %v11688_v62  ;;  %v13493_v54 = vld [vmem:[#allocation31_spill] sm:$0xff]  ;;  %v13496_v22 = vld [vmem:[#allocation5_spill] sm:$0xff] }
 0x421   : > { %7879 = vmatpush3.bf16.msra.mxu0 %v13477_v13  ;;  %7953 = vmatprep.subr.bf16.mxu1 %v13493_v54  ;;  %v12682_v61 = vand.u32 4294901760, %v11714_v63  ;;  %v13494_v25 = vand.u32 4294901760, %v11453_v45  ;;  %v13498_v58 = vld [vmem:[#allocation59_spill] sm:$0xff]  ;;  %v13500_v24 = vand.u32 4294901760, %v13304_v12  ;;  %v13504_v12 = vand.u32 4294901760, %v13307_v59 }
 0x422   : > { %v11729_v26 = vpack.c.bf16 %v13480_v28, %v13479_v14  ;;  %7881 = vmatprep.subr.bf16.mxu0 %v13485_v50  ;;  %v7916_v13 = vpack.c.bf16 %v13489_v52, %v13487_v38  ;;  %v11743_v20 = vpack.c.bf16 %v13491_v3, %v13490_v6  ;;  %v12683_v28 = vand.u32 4294901760, %v11709_v42  ;;  %v13495_v50 = vld [vmem:[#allocation76_spill] sm:$0xff] }
 0x423   : > { %4930 = vmatmul.mubr.f32.gmra.mrb[32].mxu1 %v13494_v25  ;;  %v13497_v14 = vpack.c.bf16 %v13495_v50, %v13496_v22  ;;  %v13499_v38 = vand.u32 4294901760, %v13303_v36  ;;  %v13502_v6 = vand.u32 4294901760, %v13305_v55  ;;  %v13503_v3 = vand.u32 4294901760, %v13306_v18  ;;  %v4193_v36 = vpop.permute.xlu0 %4192 }
 0x424   : > { %13481 = vst [vmem:[#allocation24_spill] sm:$0xff] %v11729_v26  ;;  %13492 = vst [vmem:[#allocation49_spill] sm:$0xff] %v11743_v20  ;;  %5207 = vmatprep.mubr.f32.mxu1 %v13498_v58  ;;  %v11762_v54 = vpack.c.bf16 %v12682_v61, %v12683_v28  ;;  %7955 = vmatpush3.bf16.msra.mxu1 %v13354_v30  ;;  %v13505_v50 = vand.u32 4294901760, %v13308_v46  ;;  %v13506_v30 = vand.u32 4294901760, %v13310_v21  ;;  %v13507_v55 = vand.u32 4294901760, %v13311_v33  ;;  %v13558_v61 = vld [vmem:[#allocation73_spill] sm:$0xff] }
 0x425   : > { %7883 = vmatpush3.bf16.msra.mxu0 %v13497_v14  ;;  %v7918_v52 = vpack.c.bf16 %v13500_v24, %v13499_v38  ;;  %v7920_v25 = vpack.c.bf16 %v13503_v3, %v13502_v6  ;;  %7957 = vmatprep.subr.bf16.mxu1 %v13358_v40  ;;  %v13509_v46 = vand.u32 4294901760, %v13313_v0  ;;  %v13510_v21 = vand.u32 4294901760, %v13314_v43  ;;  %v13523_v38 = vld [vmem:[#allocation79_spill] sm:$0xff]  ;;  %v13525_v6 = vld [vmem:[#allocation20_spill] sm:$0xff]  ;;  %v13573_v20 = vld [vmem:[#allocation85_spill] sm:$0xff] }
 0x426   : > { %13501 = vst [vmem:[#allocation66_spill] sm:$0xff] %v11762_v54  ;;  %7917 = vmatprep.subr.bf16.mxu0 %v7916_v13  ;;  %v7922_v22 = vpack.c.bf16 %v13505_v50, %v13504_v12  ;;  %v7924_v18 = vpack.c.bf16 %v13507_v55, %v13506_v30  ;;  %v13511_v33 = vand.u32 4294901760, %v13315_v56  ;;  %v13515_v0 = vand.u32 4294901760, %v13419_v53  ;;  %v13517_v13 = vld [vmem:[#allocation64_spill] sm:$0xff]  ;;  %v13527_v12 = vld [vmem:[#allocation22_spill] sm:$0xff] }
 0x427   : > { %v4201_v40 = vpop.permute.xlu0 %4200  ;;  %v13516_v56 = vand.u32 4294901760, %v11248_v51  ;;  %v13522_v53 = vand.u32 4294901760, %v13441_v35  ;;  %v13524_v24 = vand.u32 4294901760, %v13523_v38  ;;  %v13526_v3 = vand.u32 4294901760, %v13525_v6  ;;  %v13529_v30 = vld [vmem:[#allocation10_spill] sm:$0xff]  ;;  %v13571_v28 = vld [vmem:[#allocation84_spill] sm:$0xff] }
 0x428   : > { %4802 = vmatmul.mubr.f32.vlgmr.msra.gmra.mrb[30].mxu0 %v11300_v9  ;;  %7959 = vmatpush3.bf16.msra.mxu1 %v13371_v60  ;;  %v13508_v9 = vand.u32 4294901760, %v13312_v32  ;;  %v13512_v60 = vand.u32 4294901760, %v13333_v41  ;;  %v13519_v41 = vld [vmem:[#allocation72_spill] sm:$0xff]  ;;  %v13528_v50 = vand.u32 4294901760, %v13527_v12  ;;  %v13530_v55 = vld [vmem:[#allocation70_spill] sm:$0xff]  ;;  %v13572_v54 = vand.u32 4294901760, %v13571_v28 }
 0x429   : > { %4808 = vmatprep.mubr.f32.mxu0 %v11446_v31  ;;  %7919 = vmatpush3.bf16.msra.mxu0 %v7918_v52  ;;  %v7928_v31 = vpack.c.bf16 %v13511_v33, %v13510_v21  ;;  %v7936_v52 = vpack.c.bf16 %v13524_v24, %v13522_v53  ;;  %v13544_v53 = vld [vmem:[#allocation39_spill] sm:$0xff] }
 0x42a   : > { %7921 = vmatprep.subr.bf16.mxu0 %v7920_v25  ;;  %7961 = vmatprep.subr.bf16.mxu1 %v13380_v5  ;;  %v7926_v59 = vpack.c.bf16 %v13509_v46, %v13508_v9  ;;  %v13513_v5 = vand.u32 4294901760, %v13334_v2  ;;  %v5352_v25 = vsub.f32 %v13525_v6, %v13526_v3  ;;  %v13532_v9 = vld [vmem:[#allocation18_spill] sm:$0xff]  ;;  %v13545_v38 = vand.u32 4294901760, %v13544_v53  ;;  %v13546_v3 = vld [vmem:[#allocation11_spill] sm:$0xff] }
 0x42b   : > { %v4209_v2 = vpop.permute.xlu0 %4208 }
 0x42c   : > { %4811 = vmatmul.mubr.f32.gmra.mrb[32].mxu0 %v11453_v45  ;;  %7963 = vmatpush3.bf16.msra.mxu1 %v10939_v27  ;;  %v7930_v32 = vpack.c.bf16 %v13513_v5, %v13512_v60  ;;  %v13514_v27 = vand.u32 4294901760, %v13418_v49  ;;  %v5464_v45 = vsub.f32 %v11248_v51, %v13516_v56  ;;  %v13535_v60 = vld [vmem:[#allocation80_spill] sm:$0xff]  ;;  %v5499_v24 = vsub.f32 %v13544_v53, %v13545_v38 }
 0x42d   : > { %7923 = vmatpush3.bf16.msra.mxu0 %v7922_v22  ;;  %5096 = vmatprep.mubr.f32.mxu0 %v13498_v58  ;;  %v13521_v58 = vand.u32 4294901760, %v13424_v48  ;;  %v5359_v22 = vsub.f32 %v13527_v12, %v13528_v50  ;;  %v11828_v48 = vpop.permute.xlu1 %4168  ;;  %v13536_v5 = vand.u32 4294901760, %v13535_v60 }
 0x42e   : > { %7925 = vmatprep.subr.bf16.mxu0 %v7924_v18  ;;  %7965 = vmatprep.subr.bf16.mxu1 %v10979_v39  ;;  %v7932_v43 = vpack.c.bf16 %v13515_v0, %v13514_v27  ;;  %v13518_v39 = vand.u32 4294901760, %v13517_v13  ;;  %v13531_v18 = vcombine.low %v13529_v30, %v13530_v55  ;;  %v5465_v35 = vand.u32 4294901760, %v5464_v45  ;;  %v13537_v45 = vld [vmem:[#allocation27_spill] sm:$0xff]  ;;  %v13549_v30 = vld [vmem:[#allocation30_spill] sm:$0xff] }
 0x42f   : > { %v5353_v27 = vand.u32 4294901760, %v5352_v25  ;;  %v5360_v0 = vand.u32 4294901760, %v5359_v22  ;;  %v13547_v25 = vand.u32 4294901760, %v13546_v3  ;;  %v13548_v22 = vld [vmem:[#allocation40_spill] sm:$0xff]  ;;  %v13550_v55 = vand.u32 4294901760, %v13549_v30 }
 0x430   : > { %7967 = vmatpush3.bf16.msra.mxu1 %v10993_v47  ;;  %v5471_v14 = vsub.f32 %v13517_v13, %v13518_v39  ;;  %v13520_v47 = vand.u32 4294901760, %v13423_v11  ;;  %v4232_v11 = vsel %vm1335_vm2, %v13531_v18, %v4193_v36  ;;  %v13538_v39 = vand.u32 4294901760, %v13537_v45  ;;  %v13551_v18 = vld [vmem:[#allocation55_spill] sm:$0xff] }
 0x431   : > { %7927 = vmatpush3.bf16.msra.mxu0 %v7926_v59  ;;  %7969 = vmatprep.subr.bf16.mxu1 %v13519_v41  ;;  %v13533_v59 = vld [vmem:[#allocation67_spill] sm:$0xff]  ;;  %v5380_v50 = vsub.f32 %v13546_v3, %v13547_v25  ;;  %v5500_v38 = vand.u32 4294901760, %v5499_v24  ;;  %v13564_v24 = vld [vmem:[#allocation82_spill] sm:$0xff] }
 0x432   : > { %7929 = vmatprep.subr.bf16.mxu0 %v7928_v31  ;;  %v7934_v49 = vpack.c.bf16 %v13521_v58, %v13520_v47  ;;  %v5472_v46 = vand.u32 4294901760, %v5471_v14  ;;  %v13534_v21 = vand.u32 4294901760, %v13533_v59  ;;  %v4234_v31 = vsel %vm1338_vm3, %v4232_v11, %v4201_v40  ;;  %v13539_v14 = vld [vmem:[#allocation81_spill] sm:$0xff]  ;;  %v13542_v58 = vld [vmem:[#allocation35_spill] sm:$0xff] }
 0x433   : > { %v4236_v36 = vsel %vm1341_vm4, %v4234_v31, %v4209_v2  ;;  %v5366_v40 = vsub.f32 %v13537_v45, %v13538_v39  ;;  %v13552_v11 = vand.u32 4294901760, %v13551_v18  ;;  %v8014_v31 = vpack.c.bf16 %v5360_v0, %v5353_v27 }
 0x434   : > { %7971 = vmatpush3.bf16.msra.mxu1 %v13532_v9  ;;  %v5478_v33 = vsub.f32 %v13533_v59, %v13534_v21  ;;  %v11847_v47 = vand.u32 4294901760, %v4236_v36  ;;  %v5381_v25 = vand.u32 4294901760, %v5380_v50  ;;  %v13565_v50 = vld [vmem:[#allocation44_spill] sm:$0xff] }
 0x435   : > { %7931 = vmatpush3.bf16.msra.mxu0 %v7930_v32  ;;  %7973 = vmatprep.subr.bf16.mxu1 %v11093_v1  ;;  %v5485_v32 = vsub.f32 %v13535_v60, %v13536_v5  ;;  %v13540_v1 = vand.u32 4294901760, %v13539_v14  ;;  %v5506_v9 = vsub.f32 %v13551_v18, %v13552_v11  ;;  %v5367_v5 = vand.u32 4294901760, %v5366_v40 }
 0x436   : > { %7933 = vmatprep.subr.bf16.mxu0 %v7932_v43  ;;  %v8012_v43 = vpack.c.bf16 %v5472_v46, %v5465_v35  ;;  %v5479_v56 = vand.u32 4294901760, %v5478_v33  ;;  %13541 = vst [vmem:[#allocation21_spill] sm:$0xff] %v11847_v47  ;;  %v13553_v35 = vld [vmem:[#allocation32_spill] sm:$0xff]  ;;  %v13555_v33 = vld [vmem:[#allocation3_spill] sm:$0xff]  ;;  %v11874_v39 = vsub.f32 %v4236_v36, %v11847_v47 }
 0x437   : > { %v5373_v41 = vsub.f32 %v13539_v14, %v13540_v1  ;;  %v5486_v2 = vand.u32 4294901760, %v5485_v32  ;;  %v13554_v46 = vand.u32 4294901760, %v13553_v35  ;;  %v13560_v36 = vld [vmem:[#allocation28_spill] sm:$0xff] }
 0x438   : > { %7975 = vmatpush3.bf16.msra.mxu1 %v11104_v57 }
 0x439   : > { %7935 = vmatpush3.bf16.msra.mxu0 %v7934_v49  ;;  %7977 = vmatprep.subr.bf16.mxu1 %v11106_v16  ;;  %v13543_v49 = vand.u32 4294901760, %v13542_v58  ;;  %v5387_v16 = vsub.f32 %v13549_v30, %v13550_v55  ;;  %v5513_v21 = vsub.f32 %v13553_v35, %v13554_v46  ;;  %v5374_v32 = vand.u32 4294901760, %v5373_v41  ;;  %v13557_v55 = vld [vmem:[#allocation41_spill] sm:$0xff] }
 0x43a   : > { %7937 = vmatprep.subr.bf16.mxu0 %v7936_v52  ;;  %v11856_v52 = vpop.permute.xlu1 %4176  ;;  %v8016_v1 = vpack.c.bf16 %v5486_v2, %v5479_v56  ;;  %v5507_v46 = vand.u32 4294901760, %v5506_v9  ;;  %v13561_v56 = vld [vmem:[#allocation60_spill] sm:$0xff]  ;;  %v13563_v2 = vand.u32 4294901760, %v11521_v37  ;;  %v13567_v9 = vld [vmem:[#allocation42_spill] sm:$0xff] }
 0x43b   : > { %v5492_v57 = vsub.f32 %v13542_v58, %v13543_v49  ;;  %v5388_v11 = vand.u32 4294901760, %v5387_v16  ;;  %v13562_v40 = vand.u32 4294901760, %v13561_v56  ;;  %v13566_v16 = vand.u32 4294901760, %v13565_v50  ;;  %v13576_v50 = vld [vmem:[#allocation43_spill] sm:$0xff] }
 0x43c   : > { %7979 = vmatpush3.bf16.msra.mxu1 %v11129_v10  ;;  %v5514_v10 = vand.u32 4294901760, %v5513_v21  ;;  %v13568_v21 = vand.u32 4294901760, %v13567_v9  ;;  %v13579_v9 = vld [vmem:[#allocation62_spill] sm:$0xff] }
 0x43d   : > { %7939 = vmatpush3.bf16.msra.mxu0 %v13548_v22  ;;  %8013 = vmatprep.subr.bf16.mxu1 %v8012_v43  ;;  %v5493_v49 = vand.u32 4294901760, %v5492_v57  ;;  %v13556_v22 = vld [vmem:[#allocation75_spill] sm:$0xff]  ;;  %v8018_v43 = vpack.c.bf16 %v5374_v32, %v5367_v5  ;;  %v5401_v41 = vsub.f32 %v13561_v56, %v13562_v40  ;;  %v5520_v57 = vsub.f32 %v11521_v37, %v13563_v2  ;;  %v13569_v5 = vld [vmem:[#allocation50_spill] sm:$0xff] }
 0x43e   : > { %7941 = vmatprep.subr.bf16.mxu0 %v13555_v33  ;;  %v13559_v33 = vand.u32 4294901760, %v13558_v61  ;;  %v11881_v0 = vpop.permute.xlu1 %4184  ;;  %v13570_v32 = vand.u32 4294901760, %v13569_v5  ;;  %v13574_v2 = vand.u32 4294901760, %v13573_v20 }
 0x43f   : > { %5209 = vmatmul.mubr.f32.vlgmr.msra.gmra.mrb[34].mxu1 %v13556_v22  ;;  %v5402_v20 = vand.u32 4294901760, %v5401_v41  ;;  %v5521_v28 = vand.u32 4294901760, %v5520_v57  ;;  %v13585_v41 = vand.u32 4294901760, %v11572_v23 }
 0x440   : > { %v5394_v27 = vsub.f32 %v13558_v61, %v13559_v33  ;;  %5214 = vmatprep.mubr.f32.mxu1 %v13560_v36  ;;  %8015 = vmatpush3.bf16.msra.mxu1 %v8014_v31  ;;  %v8020_v33 = vpack.c.bf16 %v5500_v38, %v5493_v49  ;;  %v5527_v40 = vsub.f32 %v13569_v5, %v13570_v32  ;;  %v13577_v49 = vld [vmem:[#allocation63_spill] sm:$0xff] }
 0x441   : > { %7943 = vmatpush3.bf16.msra.mxu0 %v13557_v55  ;;  %8017 = vmatprep.subr.bf16.mxu1 %v8016_v1  ;;  %v11895_v55 = vpack.c.bf16 %v13568_v21, %v13566_v16  ;;  %v11905_v26 = vpack.c.bf16 %v13574_v2, %v13572_v54  ;;  %v11907_v1 = vpop.permute.xlu0 %4194  ;;  %v8022_v16 = vpack.c.bf16 %v5388_v11, %v5381_v25  ;;  %v13578_v38 = vand.u32 4294901760, %v13577_v49 }
 0x442   : > { %7945 = vmatprep.subr.bf16.mxu0 %v13564_v24  ;;  %v13575_v24 = vld [vmem:[#allocation57_spill] sm:$0xff]  ;;  %v13580_v21 = vand.u32 4294901760, %v13579_v9  ;;  %v8024_v32 = vpack.c.bf16 %v5514_v10, %v5507_v46  ;;  %v5395_v5 = vand.u32 4294901760, %v5394_v27  ;;  %v13581_v54 = vand.u32 4294901760, %v11531_v34  ;;  %v11934_v49 = vpop.permute.xlu1 %4170 }
 0x443   : > { %5216 = vmatmul.mubr.f32.gmra.mrb[36].mxu1 %v13575_v24  ;;  %v13583_v11 = vand.u32 4294901760, %v11874_v39  ;;  %v5528_v10 = vand.u32 4294901760, %v5527_v40  ;;  %v13584_v27 = vand.u32 4294901760, %v11567_v4  ;;  %v5541_v57 = vsub.f32 %v11572_v23, %v13585_v41  ;;  %v13592_v41 = vld [vmem:[#allocation87_spill] sm:$0xff] }
 0x444   : > { %v11915_v31 = vpack.c.bf16 %v13580_v21, %v13578_v38  ;;  %8019 = vmatpush3.bf16.msra.mxu1 %v8018_v43  ;;  %5573 = vmatprep.mubr.f32.mxu1 %v11847_v47  ;;  %v5408_v2 = vsub.f32 %v11531_v34, %v13581_v54  ;;  %v13586_v38 = vand.u32 4294901760, %v11599_v29  ;;  %v13587_v9 = vand.u32 4294901760, %v11604_v7 }
 0x445   : > { %7947 = vmatpush3.bf16.msra.mxu0 %v13576_v50  ;;  %v13582_v50 = vand.u32 4294901760, %v11540_v44  ;;  %8021 = vmatprep.subr.bf16.mxu1 %v8020_v33  ;;  %v5320_v46 = vsub.f32 %v11874_v39, %v13583_v11  ;;  %v5534_v43 = vsub.f32 %v11567_v4, %v13584_v27  ;;  %v13588_v21 = vand.u32 4294901760, %v11635_v15 }
 0x446   : > { %7981 = vmatprep.subr.bf16.mxu0 %v11895_v55  ;;  %v5422_v33 = vsub.f32 %v11599_v29, %v13586_v38  ;;  %v5429_v40 = vsub.f32 %v11604_v7, %v13587_v9  ;;  %v13593_v38 = vand.u32 4294901760, %v13592_v41  ;;  %v8026_v9 = vpack.c.bf16 %v5402_v20, %v5395_v5  ;;  %v13594_v7 = vld [vmem:[#allocation54_spill] sm:$0xff] }
 0x447   : > { %v5415_v25 = vsub.f32 %v11540_v44, %v13582_v50  ;;  %v5548_v54 = vsub.f32 %v11635_v15, %v13588_v21  ;;  %v13589_v50 = vand.u32 4294901760, %v11640_v17  ;;  %v13595_v21 = vand.u32 4294901760, %v13594_v7  ;;  %v13596_v15 = vld [vmem:[#allocation58_spill] sm:$0xff] }
 0x448   : > { %5098 = vmatmul.mubr.f32.vlgmr.msra.gmra.mrb[34].mxu0 %v13556_v22  ;;  %v13590_v22 = vld [vmem:[#allocation53_spill] sm:$0xff]  ;;  %8023 = vmatpush3.bf16.msra.mxu1 %v8022_v16  ;;  %v13597_v29 = vand.u32 4294901760, %v13596_v15  ;;  %v5321_v4 = vand.u32 4294901760, %v5320_v46  ;;  %v5535_v44 = vand.u32 4294901760, %v5534_v43  ;;  %v5542_v41 = vand.u32 4294901760, %v5541_v57  ;;  %v13598_v15 = vld [vmem:[#allocation26_spill] sm:$0xff] }
 0x449   : > { %v5555_v11 = vsub.f32 %v11640_v17, %v13589_v50  ;;  %5103 = vmatprep.mubr.f32.mxu0 %v13560_v36  ;;  %7983 = vmatpush3.bf16.msra.mxu0 %v11905_v26  ;;  %v13591_v27 = vand.u32 4294901760, %v13590_v22  ;;  %v5409_v50 = vand.u32 4294901760, %v5408_v2  ;;  %v5416_v36 = vand.u32 4294901760, %v5415_v25  ;;  %v4203_v17 = vpop.permute.xlu0 %4202  ;;  %v13603_v25 = vld [vmem:[#allocation100_spill] sm:$0xff] }
 0x44a   : > { %7985 = vmatprep.subr.bf16.mxu0 %v11915_v31  ;;  %v11962_v23 = vpack.c.bf16 %v13597_v29, %v13595_v21  ;;  %8025 = vmatprep.subr.bf16.mxu1 %v8024_v32  ;;  %v8028_v22 = vpack.c.bf16 %v5528_v10, %v5521_v28  ;;  %v5423_v16 = vand.u32 4294901760, %v5422_v33  ;;  %v13599_v7 = vand.u32 4294901760, %v13598_v15  ;;  %v13600_v29 = vld [vmem:[#allocation13_spill] sm:$0xff]  ;;  %v4179_v10 = vpop.permute.xlu1 %4178  ;;  %v13607_v33 = vld [vmem:[#allocation6_spill] sm:$0xff] }
 0x44b   : > { %v11955_v47 = vpack.c.bf16 %v13593_v38, %v13591_v27  ;;  %v5430_v27 = vand.u32 4294901760, %v5429_v40  ;;  %v5549_v38 = vand.u32 4294901760, %v5548_v54  ;;  %v5556_v5 = vand.u32 4294901760, %v5555_v11 }
 0x44c   : > { %5105 = vmatmul.mubr.f32.gmra.mrb[36].mxu0 %v13575_v24  ;;  %v13601_v20 = vand.u32 4294901760, %v13600_v29  ;;  %v13602_v32 = vand.u32 4294901760, %v11657_v8  ;;  %v13604_v46 = vand.u32 4294901760, %v13603_v25  ;;  %8027 = vmatpush3.bf16.msra.mxu1 %v8026_v9  ;;  %v8030_v43 = vpack.c.bf16 %v5416_v36, %v5409_v50  ;;  %v13611_v9 = vld [vmem:[#allocation37_spill] sm:$0xff] }
 0x44d   : > { %7987 = vmatpush3.bf16.msra.mxu0 %v11955_v47  ;;  %5322 = vmatprep.mubr.f32.mxu0 %v5321_v4  ;;  %v13605_v4 = vld [vmem:[#allocation38_spill] sm:$0xff]  ;;  %v13608_v40 = vand.u32 4294901760, %v13607_v33  ;;  %v8032_v11 = vpack.c.bf16 %v5542_v41, %v5535_v44  ;;  %v13609_v21 = vand.u32 4294901760, %v11683_v19  ;;  %v13617_v33 = vld [vmem:[#allocation7_spill] sm:$0xff]  ;;  %v8036_v41 = vpack.c.bf16 %v5556_v5, %v5549_v38 }
 0x44e   : > { %v11970_v2 = vpack.c.bf16 %v13601_v20, %v13599_v7  ;;  %v5436_v28 = vsub.f32 %v11657_v8, %v13602_v32  ;;  %v5443_v24 = vsub.f32 %v13603_v25, %v13604_v46  ;;  %7989 = vmatprep.subr.bf16.mxu0 %v11962_v23  ;;  %v13606_v57 = vand.u32 4294901760, %v13605_v4  ;;  %8029 = vmatprep.subr.bf16.mxu1 %v8028_v22  ;;  %v13613_v32 = vld [vmem:[#allocation12_spill] sm:$0xff]  ;;  %v13623_v38 = vld [vmem:[#allocation47_spill] sm:$0xff] }
 0x44f   : > { %v5562_v15 = vsub.f32 %v11683_v19, %v13609_v21  ;;  %v13610_v7 = vand.u32 4294901760, %v11688_v62  ;;  %v13612_v20 = vand.u32 4294901760, %v13611_v9  ;;  %v13614_v50 = vand.u32 4294901760, %v13613_v32  ;;  %v13615_v4 = vld [vmem:[#allocation56_spill] sm:$0xff]  ;;  %v13620_v21 = vld [vmem:[#allocation17_spill] sm:$0xff]  ;;  %v13624_v5 = vld [vmem:[#allocation71_spill] sm:$0xff] }
 0x450   : > { %v11983_v54 = vpack.c.bf16 %v13608_v40, %v13606_v57  ;;  %v8034_v46 = vpack.c.bf16 %v5430_v27, %v5423_v16  ;;  %v13616_v57 = vand.u32 4294901760, %v13615_v4  ;;  %v13618_v22 = vand.u32 4294901760, %v13617_v33  ;;  %v13619_v40 = vld [vmem:[#allocation14_spill] sm:$0xff]  ;;  %8031 = vmatpush3.bf16.msra.mxu1 %v8030_v43  ;;  %v13628_v43 = vld [vmem:[#allocation16_spill] sm:$0xff] }
 0x451   : > { %v5569_v29 = vsub.f32 %v11688_v62, %v13610_v7  ;;  %v11995_v36 = vpack.c.bf16 %v13614_v50, %v13612_v20  ;;  %v13621_v19 = vcombine.low %v13619_v40, %v13620_v21  ;;  %v4211_v62 = vpop.permute.xlu0 %4210  ;;  %7991 = vmatpush3.bf16.msra.mxu0 %v11970_v2  ;;  %v5437_v9 = vand.u32 4294901760, %v5436_v28  ;;  %8033 = vmatprep.subr.bf16.mxu1 %v8032_v11  ;;  %v13634_v11 = vld [vmem:[#allocation25_spill] sm:$0xff] }
 0x452   : > { %v12001_v44 = vpack.c.bf16 %v13618_v22, %v13616_v57  ;;  %v5444_v20 = vand.u32 4294901760, %v5443_v24  ;;  %v13622_v16 = vand.u32 4294901760, %v11709_v42  ;;  %v13625_v50 = vcombine.low %v13623_v38, %v13624_v5  ;;  %7993 = vmatprep.subr.bf16.mxu0 %v11983_v54  ;;  %v4187_v22 = vpop.permute.xlu1 %4186  ;;  %v13632_v38 = vld [vmem:[#allocation19_spill] sm:$0xff] }
 0x453   : > { %v4226_v7 = vsel %vm1335_vm2, %v13621_v19, %v11828_v48  ;;  %v13626_v19 = vand.u32 4294901760, %v11714_v63  ;;  %v5570_v57 = vand.u32 4294901760, %v5569_v29  ;;  %v13636_v29 = vld [vmem:[#allocation8_spill] sm:$0xff] }
 0x454   : > { %v5450_v27 = vsub.f32 %v11709_v42, %v13622_v16  ;;  %v4228_v32 = vsel %vm1338_vm3, %v4226_v7, %v11856_v52  ;;  %v4233_v4 = vsel %vm1335_vm2, %v13625_v50, %v11907_v1  ;;  %v5563_v52 = vand.u32 4294901760, %v5562_v15  ;;  %v13627_v1 = vld [vmem:[#allocation68_spill] sm:$0xff]  ;;  %v13630_v7 = vld [vmem:[#allocation29_spill] sm:$0xff]  ;;  %8035 = vmatpush3.bf16.msra.mxu1 %v8034_v46 }
 0x455   : > { %v5457_v48 = vsub.f32 %v11714_v63, %v13626_v19  ;;  %v4230_v28 = vsel %vm1341_vm4, %v4228_v32, %v11881_v0  ;;  %v4235_v24 = vsel %vm1338_vm3, %v4233_v4, %v4203_v17  ;;  %v13629_v40 = vcombine.low %v13627_v1, %v13628_v43  ;;  %7995 = vmatpush3.bf16.msra.mxu0 %v11995_v36 }
 0x456   : > { %v4237_v33 = vsel %vm1341_vm4, %v4235_v24, %v4211_v62  ;;  %v13631_v16 = vand.u32 4294901760, %v13630_v7  ;;  %v13633_v0 = vand.u32 4294901760, %v13632_v38  ;;  %v8038_v17 = vpack.c.bf16 %v5444_v20, %v5437_v9  ;;  %7997 = vmatprep.subr.bf16.mxu0 %v12001_v44  ;;  %8037 = vmatprep.subr.bf16.mxu1 %v8036_v41  ;;  %v13638_v20 = vld [vmem:[#allocation48_spill] sm:$0xff] }
 0x457   : > { %v4227_v21 = vsel %vm1335_vm2, %v13629_v40, %v11934_v49  ;;  %v13635_v15 = vand.u32 4294901760, %v13634_v11  ;;  %v13637_v62 = vand.u32 4294901760, %v13636_v29  ;;  %v12045_v50 = vand.u32 4294901760, %v4230_v28  ;;  %v13640_v40 = vld [vmem:[#allocation51_spill] sm:$0xff] }
 0x458   : > { %v12037_v32 = vpack.c.bf16 %v13633_v0, %v13631_v16  ;;  %v4229_v4 = vsel %vm1338_vm3, %v4227_v21, %v4179_v10  ;;  %v5451_v49 = vand.u32 4294901760, %v5450_v27  ;;  %v5458_v19 = vand.u32 4294901760, %v5457_v48  ;;  %8039 = vmatpush3.bf16.msra.mxu1 %v8038_v17  ;;  %v13642_v48 = vld [vmem:[#allocation36_spill] sm:$0xff]  ;;  %v13648_v0 = vld [vmem:[#allocation89_spill] sm:$0xff] }
 0x459   : > { %v12043_v5 = vpack.c.bf16 %v13637_v62, %v13635_v15  ;;  %v12049_v24 = vand.u32 4294901760, %v4237_v33  ;;  %v4231_v1 = vsel %vm1341_vm4, %v4229_v4, %v4187_v22  ;;  %v8040_v9 = vpack.c.bf16 %v5570_v57, %v5563_v52  ;;  %v13644_v52 = vld [vmem:[#allocation15_spill] sm:$0xff]  ;;  %v13652_v4 = vld [vmem:[#allocation93_spill] sm:$0xff] }
 0x45a   : > { %7999 = vmatpush3.bf16.msra.mxu0 %v12037_v32  ;;  %v13639_v43 = vand.u32 4294901760, %v13638_v20  ;;  %v13641_v7 = vand.u32 4294901760, %v13640_v40  ;;  %v12060_v10 = vsub.f32 %v4230_v28, %v12045_v50  ;;  %v12062_v46 = vand.u32 4294901760, %v4231_v1  ;;  %v13646_v28 = vld [vmem:[#allocation65_spill] sm:$0xff] }
 0x45b   : > { %8001 = vmatprep.subr.bf16.mxu0 %v12043_v5  ;;  %v8042_v27 = vpack.c.bf16 %v5458_v19, %v5451_v49  ;;  %v13643_v41 = vand.u32 4294901760, %v13642_v48  ;;  %v13645_v57 = vand.u32 4294901760, %v13644_v52  ;;  %v12072_v21 = vsub.f32 %v4237_v33, %v12049_v24  ;;  %8041 = vmatprep.subr.bf16.mxu1 %v8040_v9  ;;  %v13650_v33 = vld [vmem:[#allocation92_spill] sm:$0xff]  ;;  %v13654_v20 = vld [vmem:[#allocation97_spill] sm:$0xff] }
 0x45c   : > { %v12057_v16 = vpack.c.bf16 %v13641_v7, %v13639_v43  ;;  %v13647_v38 = vand.u32 4294901760, %v13646_v28  ;;  %v13649_v11 = vand.u32 4294901760, %v13648_v0  ;;  %v5325_v15 = vand.u32 4294901760, %v12060_v10  ;;  %v13656_v43 = vld [vmem:[#allocation98_spill] sm:$0xff] }
 0x45d   : > { %v12069_v22 = vpack.c.bf16 %v13645_v57, %v13643_v41  ;;  %v12083_v29 = vsub.f32 %v4231_v1, %v12062_v46  ;;  %8043 = vmatpush3.bf16.msra.mxu1 %v8042_v27  ;;  %v13651_v62 = vand.u32 4294901760, %v13650_v33  ;;  %v13653_v49 = vand.u32 4294901760, %v13652_v4  ;;  %v13666_v33 = vld [vmem:[#allocation96_spill] sm:$0xff]  ;;  %v13667_v4 = vld [vmem:[#allocation102_spill] sm:$0xff] }
 0x45e   : > { %8003 = vmatpush3.bf16.msra.mxu0 %v12057_v16  ;;  %v12079_v17 = vpack.c.bf16 %v13649_v11, %v13647_v38  ;;  %8077 = vmatprep.subr.bf16.mxu1 %v11895_v55  ;;  %v5334_v9 = vand.u32 4294901760, %v12072_v21  ;;  %v13655_v1 = vand.u32 4294901760, %v13654_v20  ;;  %v13657_v40 = vand.u32 4294901760, %v13656_v43 }
 0x45f   : > { %8005 = vmatprep.subr.bf16.mxu0 %v12069_v22  ;;  %v12091_v19 = vpack.c.bf16 %v13653_v49, %v13651_v62  ;;  %v5326_v27 = vsub.f32 %v12060_v10, %v5325_v15  ;;  %v5340_v48 = vand.u32 4294901760, %v12083_v29  ;;  %v8044_v41 = vpack.c.bf16 %v13517_v13, %v11248_v51  ;;  %v13668_v49 = vld [vmem:[#allocation103_spill] sm:$0xff] }
 0x460   : > { %5575 = vmatmul.mubr.f32.vlgmr.msra.gmra.mrb[38].mxu1 %v12045_v50  ;;  %v12100_v7 = vpack.c.bf16 %v13657_v40, %v13655_v1  ;;  %v5335_v52 = vsub.f32 %v12072_v21, %v5334_v9  ;;  %v8046_v57 = vpack.c.bf16 %v13527_v12, %v13525_v6  ;;  %v13658_v38 = vand.u32 4294901760, %v11874_v39 }
 0x461   : > { %5580 = vmatprep.mubr.f32.mxu1 %v12049_v24  ;;  %8079 = vmatpush3.bf16.msra.mxu1 %v11905_v26  ;;  %v5327_v28 = vand.u32 4294901760, %v5326_v27  ;;  %v5341_v51 = vsub.f32 %v12083_v29, %v5340_v48  ;;  %v8048_v13 = vpack.c.bf16 %v13535_v60, %v13533_v59  ;;  %v8050_v6 = vpack.c.bf16 %v13539_v14, %v13537_v45  ;;  %v13659_v14 = vld [vmem:[#allocation50_spill] sm:$0xff] }
 0x462   : > { %8007 = vmatpush3.bf16.msra.mxu0 %v12079_v17  ;;  %8081 = vmatprep.subr.bf16.mxu1 %v11915_v31  ;;  %v5336_v0 = vand.u32 4294901760, %v5335_v52  ;;  %v8052_v11 = vpack.c.bf16 %v13544_v53, %v13542_v58  ;;  %v8054_v59 = vpack.c.bf16 %v13549_v30, %v13546_v3  ;;  %v8056_v60 = vpack.c.bf16 %v13553_v35, %v13551_v18  ;;  %v13660_v53 = vld [vmem:[#allocation34_spill] sm:$0xff]  ;;  %v13661_v30 = vld [vmem:[#allocation83_spill] sm:$0xff] }
 0x463   : > { %8009 = vmatprep.subr.bf16.mxu0 %v12091_v19  ;;  %v5342_v12 = vand.u32 4294901760, %v5341_v51  ;;  %v8058_v45 = vpack.c.bf16 %v13561_v56, %v13558_v61  ;;  %v8060_v58 = vpack.c.bf16 %v13659_v14, %v11521_v37  ;;  %v8062_v3 = vpack.c.bf16 %v13660_v53, %v11531_v34  ;;  %v13662_v18 = vld [vmem:[#allocation86_spill] sm:$0xff]  ;;  %v13665_v37 = vld [vmem:[#allocation95_spill] sm:$0xff] }
 0x464   : > { %5582 = vmatmul.mubr.f32.gmra.mrb[40].mxu1 %v12062_v46  ;;  %v8064_v35 = vpack.c.bf16 %v13662_v18, %v13661_v30  ;;  %v13663_v61 = vld [vmem:[#allocation90_spill] sm:$0xff]  ;;  %v8068_v62 = vpack.c.bf16 %v13666_v33, %v13665_v37  ;;  %v8070_v34 = vpack.c.bf16 %v13603_v25, %v11657_v8  ;;  %v8072_v20 = vpack.c.bf16 %v13668_v49, %v13667_v4  ;;  %v13669_v8 = vld [vmem:[#allocation21_spill] sm:$0xff] }
 0x465   : > { %8083 = vmatpush3.bf16.msra.mxu1 %v11955_v47  ;;  %5833 = vmatprep.mubr.f32.mxu1 %v13658_v38  ;;  %v8074_v1 = vpack.c.bf16 %v11714_v63, %v11709_v42  ;;  %v13671_v42 = vld [vmem:[#allocation78_spill] sm:$0xff]  ;;  %v13672_v63 = vld [vmem:[#allocation69_spill] sm:$0xff] }
 0x466   : > { %8011 = vmatpush3.bf16.msra.mxu0 %v12100_v7  ;;  %8085 = vmatprep.subr.bf16.mxu1 %v11962_v23  ;;  %v13678_v25 = vld [vmem:[#allocation74_spill] sm:$0xff] }
 0x467   : > { %8045 = vmatprep.subr.bf16.mxu0 %v8044_v41 }
 0x469   : > { %5328 = vmatmul.mubr.f32.vlgmr.msra.gmra.mrb[38].mxu0 %v5327_v28  ;;  %8087 = vmatpush3.bf16.msra.mxu1 %v11970_v2 }
 0x46a   : > { %5337 = vmatprep.mubr.f32.mxu0 %v5336_v0  ;;  %8047 = vmatpush3.bf16.msra.mxu0 %v8046_v57 }
 0x46b   : > { %8049 = vmatprep.subr.bf16.mxu0 %v8048_v13  ;;  %8089 = vmatprep.subr.bf16.mxu1 %v11983_v54 }
 0x46d   : > { %5343 = vmatmul.mubr.f32.gmra.mrb[40].mxu0 %v5342_v12  ;;  %8091 = vmatpush3.bf16.msra.mxu1 %v11995_v36 }
 0x46e   : > { %8051 = vmatpush3.bf16.msra.mxu0 %v8050_v6  ;;  %5717 = vmatprep.mubr.f32.mxu0 %v11874_v39  ;;  %v13664_v39 = vld [vmem:[#allocation91_spill] sm:$0xff] }
 0x46f   : > { %8053 = vmatprep.subr.bf16.mxu0 %v8052_v11  ;;  %8093 = vmatprep.subr.bf16.mxu1 %v12001_v44  ;;  %v8066_v56 = vpack.c.bf16 %v13664_v39, %v13663_v61 }
 0x471   : > { %8095 = vmatpush3.bf16.msra.mxu1 %v12037_v32 }
 0x472   : > { %8055 = vmatpush3.bf16.msra.mxu0 %v8054_v59  ;;  %8097 = vmatprep.subr.bf16.mxu1 %v12043_v5 }
 0x473   : > { %8057 = vmatprep.subr.bf16.mxu0 %v8056_v60 }
 0x475   : > { %8099 = vmatpush3.bf16.msra.mxu1 %v12057_v16 }
 0x476   : > { %8059 = vmatpush3.bf16.msra.mxu0 %v8058_v45  ;;  %8101 = vmatprep.subr.bf16.mxu1 %v12069_v22 }
 0x477   : > { %8061 = vmatprep.subr.bf16.mxu0 %v8060_v58 }
 0x479   : > { %8103 = vmatpush3.bf16.msra.mxu1 %v12079_v17 }
 0x47a   : > { %8063 = vmatpush3.bf16.msra.mxu0 %v8062_v3  ;;  %8105 = vmatprep.subr.bf16.mxu1 %v12091_v19 }
 0x47b   : > { %8065 = vmatprep.subr.bf16.mxu0 %v8064_v35 }
 0x47d   : > { %8107 = vmatpush3.bf16.msra.mxu1 %v12100_v7 }
 0x47e   : > { %8067 = vmatpush3.bf16.msra.mxu0 %v8066_v56  ;;  %8141 = vmatprep.subr.bf16.mxu1 %v11895_v55  ;;  %v13670_v55 = vld [vmem:[#allocation9_spill] sm:$0xff] }
 0x47f   : > { %8069 = vmatprep.subr.bf16.mxu0 %v8068_v62 }
 0x480   : > { %5837 = vmatmul.mubr.f32.vlgmr.msra.gmra.mrb[42].mxu1 %v5325_v15 }
 0x481   : > { %5844 = vmatprep.mubr.f32.mxu1 %v5334_v9  ;;  %8143 = vmatpush3.bf16.msra.mxu1 %v11905_v26  ;;  %v13673_v26 = vld [vmem:[#allocation33_spill] sm:$0xff] }
 0x482   : > { %8071 = vmatpush3.bf16.msra.mxu0 %v8070_v34  ;;  %8145 = vmatprep.subr.bf16.mxu1 %v11915_v31  ;;  %v13676_v31 = vld [vmem:[#allocation45_spill] sm:$0xff] }
 0x483   : > { %8073 = vmatprep.subr.bf16.mxu0 %v8072_v20 }
 0x484   : > { %5848 = vmatmul.mubr.f32.gmra.mrb[44].mxu1 %v5340_v48 }
 0x485   : > { %8147 = vmatpush3.bf16.msra.mxu1 %v11955_v47  ;;  %6125 = vmatprep.mubr.f32.mxu1 %v13669_v8  ;;  %v13675_v47 = vld [vmem:[#allocation46_spill] sm:$0xff] }
 0x486   : > { %8075 = vmatpush3.bf16.msra.mxu0 %v8074_v1  ;;  %8149 = vmatprep.subr.bf16.mxu1 %v11962_v23  ;;  %v13674_v23 = vld [vmem:[#allocation52_spill] sm:$0xff] }
 0x487   : > { %8109 = vmatprep.subr.bf16.mxu0 %v13670_v55  ;;  %v6431_v1 = vld [vmem:[%s12253_s3 + $0x10] sm:$0xff] }
 0x489   : > { %5720 = vmatmul.mubr.f32.vlgmr.msra.gmra.mrb[42].mxu0 %v12060_v10  ;;  %8151 = vmatpush3.bf16.msra.mxu1 %v11970_v2  ;;  %v13677_v2 = vld [vmem:[#allocation88_spill] sm:$0xff]  ;;  %v13685_v10 = vld [vmem:[#allocation66_spill] sm:$0xff] }
 0x48a   : > { %5726 = vmatprep.mubr.f32.mxu0 %v12072_v21  ;;  %8111 = vmatpush3.bf16.msra.mxu0 %v13671_v42 }
 0x48b   : > { %8113 = vmatprep.subr.bf16.mxu0 %v13672_v63  ;;  %8153 = vmatprep.subr.bf16.mxu1 %v11983_v54  ;;  %v13679_v54 = vld [vmem:[#allocation94_spill] sm:$0xff] }
 0x48d   : > { %5729 = vmatmul.mubr.f32.gmra.mrb[44].mxu0 %v12083_v29  ;;  %8155 = vmatpush3.bf16.msra.mxu1 %v11995_v36  ;;  %v13680_v36 = vld [vmem:[#allocation99_spill] sm:$0xff] }
 0x48e   : > { %8115 = vmatpush3.bf16.msra.mxu0 %v13673_v26  ;;  %6014 = vmatprep.mubr.f32.mxu0 %v13669_v8 }
 0x48f   : > { %8117 = vmatprep.subr.bf16.mxu0 %v13674_v23  ;;  %8157 = vmatprep.subr.bf16.mxu1 %v12001_v44  ;;  %v13681_v44 = vld [vmem:[#allocation101_spill] sm:$0xff] }
 0x491   : > { %8159 = vmatpush3.bf16.msra.mxu1 %v12037_v32  ;;  %v13682_v32 = vld [vmem:[#allocation61_spill] sm:$0xff] }
 0x492   : > { %8119 = vmatpush3.bf16.msra.mxu0 %v13675_v47  ;;  %8161 = vmatprep.subr.bf16.mxu1 %v12043_v5  ;;  %v13683_v5 = vld [vmem:[#allocation24_spill] sm:$0xff] }
 0x493   : > { %8121 = vmatprep.subr.bf16.mxu0 %v13676_v31 }
 0x495   : > { %8163 = vmatpush3.bf16.msra.mxu1 %v12057_v16  ;;  %v13684_v16 = vld [vmem:[#allocation49_spill] sm:$0xff] }
 0x496   : > { %8123 = vmatpush3.bf16.msra.mxu0 %v13677_v2  ;;  %8165 = vmatprep.subr.bf16.mxu1 %v12069_v22 }
 0x497   : > { %8125 = vmatprep.subr.bf16.mxu0 %v13678_v25 }
 0x499   : > { %8167 = vmatpush3.bf16.msra.mxu1 %v12079_v17 }
 0x49a   : > { %8127 = vmatpush3.bf16.msra.mxu0 %v13679_v54  ;;  %8169 = vmatprep.subr.bf16.mxu1 %v12091_v19 }
 0x49b   : > { %8129 = vmatprep.subr.bf16.mxu0 %v13680_v36 }
 0x49d   : > { %8171 = vmatpush3.bf16.msra.mxu1 %v12100_v7 }
 0x49e   : > { %8131 = vmatpush3.bf16.msra.mxu0 %v13681_v44 }
 0x49f   : > { %8133 = vmatprep.subr.bf16.mxu0 %v13682_v32 }
 0x4a0   : > { %6127 = vmatmul.mubr.f32.vlgmr.msra.gmra.mrb[46].mxu1 %v12045_v50 }
 0x4a1   : > { %6132 = vmatprep.mubr.f32.mxu1 %v12049_v24 }
 0x4a2   : > { %8135 = vmatpush3.bf16.msra.mxu0 %v13683_v5 }
 0x4a3   : > { %8137 = vmatprep.subr.bf16.mxu0 %v13684_v16 }
 0x4a4   : > { %6134 = vmatmul.mubr.f32.gmra.mrb[48].mxu1 %v12062_v46 }
 0x4a6   : > { %8139 = vmatpush3.bf16.msra.mxu0 %v13685_v10 }
 0x4a9   : > { %6016 = vmatmul.mubr.f32.vlgmr.msra.gmra.mrb[46].mxu0 %v12045_v50 }
 0x4aa   : > { %6021 = vmatprep.mubr.f32.mxu0 %v12049_v24 }
 0x4ad   : > { %6023 = vmatmul.mubr.f32.gmra.mrb[48].mxu0 %v12062_v46 }
 0x4ae   : > { %7386 = vmatprep.mubr.msk.f32.mxu0 %vm225_vm1, %v6431_v1 }
 0x4ca   : > { %v6974_v22 = vpop.f32.mrb[26].mxu1 }
 0x4cb   : > { %v6975_v21 = vpop.f32.mrb[27].mxu1 }
 0x4cc   : > { %v6976_v17 = vadd.f32 %v6975_v21, %v6974_v22 }
 0x4d2   : > { %v6936_v15 = vpop.f32.mrb[26].mxu0 }
 0x4d3   : > { %v6937_v29 = vpop.f32.mrb[27].mxu0 }
 0x4d4   : > { %v6938_v19 = vadd.f32 %v6937_v29, %v6936_v15 }
 0x4d6   : > { %v4659_v9 = vadd.f32 %v6976_v17, %v6938_v19 }
 0x4d7   : > { %v6977_v43 = vpop.f32.mrb[28].mxu1 }
 0x4d8   : > { %v6978_v40 = vpop.f32.mrb[29].mxu1 }
 0x4d9   : > { %v6979_v7 = vadd.f32 %v6978_v40, %v6977_v43 }
 0x4e3   : > { %v6939_v27 = vpop.f32.mrb[28].mxu0 }
 0x4e4   : > { %v6940_v48 = vpop.f32.mrb[29].mxu0 }
 0x4e5   : > { %v6941_v41 = vadd.f32 %v6940_v48, %v6939_v27 }
 0x4e7   : > { %v4666_v52 = vadd.f32 %v6979_v7, %v6941_v41 }
 0x4f2   : > { %v7050_v57 = vpop.f32.mrb[30].mxu1 }
 0x4f3   : > { %v7051_v50 = vpop.f32.mrb[31].mxu1 }
 0x4f4   : > { %v7052_v28 = vadd.f32 %v7051_v50, %v7050_v57 }
 0x4f6   : > { %v7053_v24 = vpop.f32.mrb[32].mxu1 }
 0x4f7   : > { %v7054_v38 = vpop.f32.mrb[33].mxu1 }
 0x4f8   : > { %v7055_v46 = vadd.f32 %v7054_v38, %v7053_v24 }
 0x4fb   : > { %v7012_v51 = vpop.f32.mrb[30].mxu0 }
 0x4fc   : > { %v7013_v13 = vpop.f32.mrb[31].mxu0 }
 0x4fd   : > { %v7014_v0 = vadd.f32 %v7013_v13, %v7012_v51 }
 0x4ff   : > { %v4804_v6 = vadd.f32 %v7014_v0, %v4659_v9  ;;  %v7015_v12 = vpop.f32.mrb[32].mxu0 }
 0x500   : > { %v7016_v11 = vpop.f32.mrb[33].mxu0 }
 0x501   : > { %v7017_v59 = vadd.f32 %v7016_v11, %v7015_v12  ;;  %v4921_v60 = vadd.f32 %v7052_v28, %v4804_v6 }
 0x503   : > { %v4813_v45 = vadd.f32 %v7017_v59, %v4666_v52 }
 0x505   : > { %v4932_v14 = vadd.f32 %v7055_v46, %v4813_v45 }
 0x512   : > { %v7126_v58 = vpop.f32.mrb[34].mxu1 }
 0x513   : > { %v7127_v53 = vpop.f32.mrb[35].mxu1 }
 0x514   : > { %v7128_v3 = vadd.f32 %v7127_v53, %v7126_v58 }
 0x516   : > { %v7129_v30 = vpop.f32.mrb[36].mxu1 }
 0x517   : > { %v7130_v18 = vpop.f32.mrb[37].mxu1 }
 0x518   : > { %v7131_v35 = vadd.f32 %v7130_v18, %v7129_v30 }
 0x51b   : > { %v7088_v61 = vpop.f32.mrb[34].mxu0 }
 0x51c   : > { %v7089_v39 = vpop.f32.mrb[35].mxu0 }
 0x51d   : > { %v7090_v56 = vadd.f32 %v7089_v39, %v7088_v61 }
 0x51f   : > { %v5100_v37 = vadd.f32 %v7090_v56, %v4921_v60  ;;  %v7091_v33 = vpop.f32.mrb[36].mxu0 }
 0x520   : > { %v7092_v62 = vpop.f32.mrb[37].mxu0 }
 0x521   : > { %v7093_v34 = vadd.f32 %v7092_v62, %v7091_v33  ;;  %v5211_v4 = vadd.f32 %v7128_v3, %v5100_v37 }
 0x523   : > { %v5107_v49 = vadd.f32 %v7093_v34, %v4932_v14  ;;  %v6432_v34 = vld [vmem:[%s12253_s3 + $0x18] sm:$0xff] }
 0x525   : > { %v5218_v20 = vadd.f32 %v7131_v35, %v5107_v49  ;;  %v3276_v49 = vld [vmem:[%s12253_s3] sm:$0xff] }
 0x533   : > { %v7202_v8 = vpop.f32.mrb[38].mxu1 }
 0x534   : > { %v7203_v55 = vpop.f32.mrb[39].mxu1 }
 0x535   : > { %v7204_v42 = vadd.f32 %v7203_v55, %v7202_v8  ;;  %v8212_v8 = vld [vmem:[%s12255_s5 + $0x8] sm:$0xff] }
 0x537   : > { %v7205_v63 = vpop.f32.mrb[40].mxu1 }
 0x538   : > { %v7206_v26 = vpop.f32.mrb[41].mxu1 }
 0x539   : > { %v7207_v23 = vadd.f32 %v7206_v26, %v7205_v63  ;;  %v8213_v63 = vld [vmem:[%s12255_s5] sm:$0xff] }
 0x53c   : > { %v7164_v47 = vpop.f32.mrb[38].mxu0 }
 0x53d   : > { %v7165_v31 = vpop.f32.mrb[39].mxu0 }
 0x53e   : > { %v7166_v2 = vadd.f32 %v7165_v31, %v7164_v47 }
 0x540   : > { %v5330_v25 = vadd.f32 %v7166_v2, %v5211_v4  ;;  %v7167_v54 = vpop.f32.mrb[40].mxu0  ;;  %v13686_v4 = vld [vmem:[#allocation2_spill] sm:$0xff] }
 0x541   : > { %v7168_v36 = vpop.f32.mrb[41].mxu0 }
 0x542   : > { %v7169_v44 = vadd.f32 %v7168_v36, %v7167_v54  ;;  %v5577_v32 = vadd.f32 %v7204_v42, %v5330_v25 }
 0x544   : > { %v5345_v5 = vadd.f32 %v7169_v44, %v5218_v20  ;;  %v3277_v20 = vld [vmem:[%s12253_s3 + $0x8] sm:$0xff] }
 0x546   : > { %v5584_v16 = vadd.f32 %v7207_v23, %v5345_v5 }
 0x553   : > { %v7278_v10 = vpop.f32.mrb[42].mxu1 }
 0x554   : > { %v7279_v22 = vpop.f32.mrb[43].mxu1 }
 0x555   : > { %v7280_v21 = vadd.f32 %v7279_v22, %v7278_v10 }
 0x557   : > { %v7281_v17 = vpop.f32.mrb[44].mxu1 }
 0x558   : > { %v7282_v15 = vpop.f32.mrb[45].mxu1 }
 0x559   : > { %v7283_v29 = vadd.f32 %v7282_v15, %v7281_v17 }
 0x55c   : > { %v7240_v19 = vpop.f32.mrb[42].mxu0 }
 0x55d   : > { %v7241_v9 = vpop.f32.mrb[43].mxu0 }
 0x55e   : > { %v7242_v43 = vadd.f32 %v7241_v9, %v7240_v19 }
 0x560   : > { %v5722_v40 = vadd.f32 %v7242_v43, %v5577_v32  ;;  %v7243_v7 = vpop.f32.mrb[44].mxu0 }
 0x561   : > { %v7244_v27 = vpop.f32.mrb[45].mxu0 }
 0x562   : > { %v7245_v48 = vadd.f32 %v7244_v27, %v7243_v7  ;;  %v5839_v41 = vadd.f32 %v7280_v21, %v5722_v40 }
 0x564   : > { %v5731_v52 = vadd.f32 %v7245_v48, %v5584_v16 }
 0x566   : > { %v5850_v57 = vadd.f32 %v7283_v29, %v5731_v52 }
 0x573   : > { %v7354_v50 = vpop.f32.mrb[46].mxu1 }
 0x574   : > { %v7355_v28 = vpop.f32.mrb[47].mxu1 }
 0x575   : > { %v7356_v24 = vadd.f32 %v7355_v28, %v7354_v50 }
 0x577   : > { %v7357_v38 = vpop.f32.mrb[48].mxu1 }
 0x578   : > { %v7358_v46 = vpop.f32.mrb[49].mxu1 }
 0x579   : > { %v7359_v51 = vadd.f32 %v7358_v46, %v7357_v38 }
 0x57c   : > { %v7316_v13 = vpop.f32.mrb[46].mxu0 }
 0x57d   : > { %v7317_v0 = vpop.f32.mrb[47].mxu0 }
 0x57e   : > { %v7318_v6 = vadd.f32 %v7317_v0, %v7316_v13 }
 0x580   : > { %v6018_v12 = vadd.f32 %v7318_v6, %v5839_v41  ;;  %v7319_v11 = vpop.f32.mrb[48].mxu0 }
 0x581   : > { %v7320_v59 = vpop.f32.mrb[49].mxu0 }
 0x582   : > { %v6129_v60 = vadd.f32 %v7356_v24, %v6018_v12  ;;  %v7321_v45 = vadd.f32 %v7320_v59, %v7319_v11 }
 0x584   : > { %v6429_v14 = vmul.f32 -1.442695, %v6129_v60  ;;  %v6025_v58 = vadd.f32 %v7321_v45, %v5850_v57 }
 0x586   : > { %8204 = vpow2.f32 %v6429_v14  ;;  %v6136_v53 = vadd.f32 %v7359_v51, %v6025_v58 }
 0x588   : > { %v6430_v3 = vmul.f32 -1.442695, %v6136_v53 }
 0x58a   : > { %8206 = vpow2.f32 %v6430_v3 }
 0x590   : > { %v8205_v30 = vpop.eup %8204 }
 0x591   : > { %v6145_v18 = vadd.f32 1.0, %v8205_v30 }
 0x593   : > { %8208 = vrcp.f32 %v6145_v18 }
 0x594   : > { %v8207_v35 = vpop.eup %8206 }
 0x595   : > { %v6146_v61 = vadd.f32 1.0, %v8207_v35 }
 0x597   : > { %8210 = vrcp.f32 %v6146_v61 }
 0x59d   : > { %v8209_v39 = vpop.eup %8208 }
 0x59e   : > { %v6151_v37 = vmul.f32 %v8209_v39, %v6129_v60 }
 0x5a1   : > { %v8211_v56 = vpop.eup %8210 }
 0x5a2   : > { %v6152_v33 = vmul.f32 %v8211_v56, %v6136_v53 }
 0x5a4   : > { %v8172_v62 = vpack.c.bf16 %v6152_v33, %v6151_v37 }
 0x5a6   : > { %8173 = vmatprep.subr.bf16.mxu0 %v8172_v62 }
 0x5a7   : > { %8175 = vmatpush3.bf16.msra.mxu0 %v8172_v62 }
 0x5a8   : > { %8177 = vmatprep.subr.bf16.mxu0 %v13686_v4 }
 0x5aa   : > { %7387 = vmatmul.mubr.msk.f32.vlgmr.msra.gmra.mrb[50].mxu0 %vm225_vm1, %v6432_v34 }
 0x5ab   : > { %8179 = vmatpush3.bf16.msra.mxu0 %v13686_v4  ;;  %7393 = vmatprep.mubr.msk.f32.mxu0 %vm225_vm1, %v3276_v49 }
 0x5b2   : > { %7394 = vmatmul.mubr.msk.f32.vlgmr.msra.gmra.mrb[50].mxu0 %vm225_vm1, %v3277_v20 }
 0x685   : > { %v7395_v1 = vpop.f32.mrb[50].mxu0 }
 0x686   : > { %v6319_v55 = vadd.f32 %v8212_v8, %v7395_v1  ;;  %v6309_v42 = vpop.f32.mrb[51].mxu0 }
 0x687   : > { %v6318_v26 = vadd.f32 %v8213_v63, %v6309_v42 }
 0x688   : > { %6321 = vst.msk [vmem:[%s12255_s5 + $0x8] sm:$0xff] %vm1335_vm2, %v6319_v55 }
 0x689   : > { %6320 = vst.msk [vmem:[%s12255_s5] sm:$0xff] %vm1335_vm2, %v6318_v26 }
 0x68a PF: > { %s15_s18 = sadd.s32 1, %s8220_s18  }
 0x68b   : > { %p12_p5 = scmp.ge.s32.totalorder %s15_s18, 4  }
 0x68d   :  { %14 = sbr.rel (!%p12_p5) target bundleno = 1 (0x1), region = 73 }

</bundles_post_ra>
